<compile_context>
chip_gen: v5e
topology: v5e:2x2
jax: 0.10.0
libtpu: 0.0.40
codegen_flags: <defaults>
</compile_context>

<pallas_src>
import functools
import math

import jax
import jax.numpy as jnp
from jax.experimental import pallas as pl
from jax.experimental.pallas import tpu as pltpu

GELU_C = math.sqrt(2.0 / math.pi)


def _gelu_tanh(h):
    # new_gelu (tanh approximation) in f32; tanh lowers to the EUP slot,
    # reuse h*h to trim VALU work.
    h2 = h * h
    return 0.5 * h * (1.0 + jnp.tanh(GELU_C * h * (1.0 + 0.044715 * h2)))


# ---------------------------------------------------------------------------
# Kernel A: weights fully VMEM-resident.  grid = (M // tm,)
# ---------------------------------------------------------------------------
def _mlp_resident_kernel(x_ref, wfc_ref, wproj_ref, o_ref, *, th):
    # x_ref: (tm, C) bf16 ; wfc_ref: (C, H) bf16 ; wproj_ref: (H, C) bf16
    H = wfc_ref.shape[1]
    x = x_ref[...]
    acc = jnp.zeros((x_ref.shape[0], o_ref.shape[1]), jnp.float32)
    # Static (unrolled) loop over H slabs: bounds the f32 (tm, th) GELU
    # intermediate while the weights stay resident (their BlockSpec index is
    # constant, so Pallas only DMAs them for the first grid step).
    for j in range(H // th):
        wfc_slab = wfc_ref[:, j * th:(j + 1) * th]          # (C, th)
        wproj_slab = wproj_ref[j * th:(j + 1) * th, :]      # (th, C)
        h = jnp.dot(x, wfc_slab, preferred_element_type=jnp.float32)
        h = _gelu_tanh(h)
        acc = acc + jnp.dot(h.astype(wproj_slab.dtype), wproj_slab,
                            preferred_element_type=jnp.float32)
    # TODO(synk): training-mode dropout (p=0.2) would use pltpu.prng_seed +
    # pltpu.stateful_bernoulli here; inference mode is identity.
    o_ref[...] = acc.astype(o_ref.dtype)


# ---------------------------------------------------------------------------
# Kernel B: streamed weight slabs (large C).  grid = (M // tm, H // th)
# ---------------------------------------------------------------------------
def _mlp_streamed_kernel(x_ref, wfc_ref, wproj_ref, o_ref, acc_ref):
    # x_ref: (tm, C) ; wfc_ref: (C, th) ; wproj_ref: (th, C) ; acc_ref f32 (tm, C)
    j = pl.program_id(1)

    @pl.when(j == 0)
    def _():
        acc_ref[...] = jnp.zeros_like(acc_ref)

    h = jnp.dot(x_ref[...], wfc_ref[...], preferred_element_type=jnp.float32)
    h = _gelu_tanh(h)
    acc_ref[...] += jnp.dot(h.astype(wproj_ref.dtype), wproj_ref[...],
                            preferred_element_type=jnp.float32)

    @pl.when(j == pl.num_programs(1) - 1)
    def _():
        # TODO(synk): training-mode dropout (p=0.2) would go here.
        o_ref[...] = acc_ref[...].astype(o_ref.dtype)


# ---------------------------------------------------------------------------
# Host-side helpers / wrapper
# ---------------------------------------------------------------------------
def _vmem_capacity_bytes():
    try:
        return int(pltpu.get_tpu_info().vmem_capacity_bytes)
    except Exception:
        return 64 << 20   # conservative (v7x per-core VMEM)


def _largest_divisor(n, candidates):
    for c in candidates:
        if n % c == 0:
            return c
    return n


def _pick_th_inner(H, tm):
    # Bound the f32 (tm, th) GELU intermediate to ~2 MiB with a 128-aligned
    # divisor of H.
    target = max(128, min(H, (2 << 20) // max(4 * tm, 1)))
    for c in (2048, 1536, 1024, 768, 512, 384, 256, 128):
        if c <= target and H % c == 0:
            return c
    return H


def prepare_mlp_weights(w_fc, w_proj):
    """Cast parameters to bf16 ONCE (hoisted out of the per-call path)."""
    return jnp.asarray(w_fc, jnp.bfloat16), jnp.asarray(w_proj, jnp.bfloat16)


def mlp_forward(x, w_fc, w_proj, *, tm=None, th=None, out_dtype=None):
    """Inference-mode GPT-MLP forward.

    x: [B, T, C]; w_fc: [C, 4C]; w_proj: [4C, C]  ->  [B, T, C]
    Pass weights already in bf16 (prepare_mlp_weights) to avoid a per-call cast.
    """
    B, T, C = x.shape
    Cw, H = w_fc.shape
    assert Cw == C and w_proj.shape == (H, C), "weight shapes inconsistent"
    assert C % 128 == 0, "n_embd must be a multiple of 128 for lane-dense tiles"
    M = B * T
    out_dtype = out_dtype or x.dtype
    out_bytes = jnp.dtype(out_dtype).itemsize

    # bf16 operands on the MXU; f32 accumulation inside the kernel.
    x2 = x.reshape(M, C).astype(jnp.bfloat16)
    wfc = w_fc if w_fc.dtype == jnp.bfloat16 else w_fc.astype(jnp.bfloat16)
    wproj = w_proj if w_proj.dtype == jnp.bfloat16 else w_proj.astype(jnp.bfloat16)

    # ---- token tile (M axis, "parallel") ---------------------------------
    if tm is None:
        tm = _largest_divisor(M, (1024, 768, 512, 384, 256, 128))
        # v7x megacore: keep >= 2 M-tiles so both TensorCores get work.
        if M // tm < 2 and tm >= 512 and tm % 256 == 0:
            tm //= 2
    assert M % tm == 0, "tm must divide B*T"
    assert tm % 128 == 0 or tm == M, (
        "tm should be a multiple of 128 (full MXU rows); only tiny demo "
        "shapes may fall back to tm == M")

    vmem_cap = _vmem_capacity_bytes()
    w_bytes = 4 * C * H                      # both weights in bf16
    flops = 4 * M * C * H                    # two matmuls
    transcendentals = M * H                  # one tanh per hidden element

    # ---- path A: weights fully resident in VMEM --------------------------
    th_res = th or _pick_th_inner(H, tm)
    resident_est = (2 * w_bytes                  # weights (double-buffered)
                    + 2 * tm * C * 2             # x tile (bf16, double-buffered)
                    + 2 * tm * C * out_bytes     # out tile (double-buffered)
                    + tm * th_res * 4            # f32 GELU intermediate
                    + tm * C * 4)                # f32 accumulator
    if th is None and resident_est <= int(0.7 * vmem_cap):
        vmem_limit = min(int(0.9 * vmem_cap),
                         max(resident_est + (8 << 20), 32 << 20))
        cost = pl.CostEstimate(
            flops=flops, transcendentals=transcendentals,
            bytes_accessed=M * C * 2 + w_bytes + M * C * out_bytes)
        out2 = pl.pallas_call(
            functools.partial(_mlp_resident_kernel, th=th_res),
            out_shape=jax.ShapeDtypeStruct((M, C), out_dtype),
            grid_spec=pltpu.PrefetchScalarGridSpec(
                num_scalar_prefetch=0,
                grid=(M // tm,),
                in_specs=[
                    pl.BlockSpec((tm, C), lambda i: (i, 0)),   # x tile (streamed)
                    pl.BlockSpec((C, H), lambda i: (0, 0)),    # W_fc (resident)
                    pl.BlockSpec((H, C), lambda i: (0, 0)),    # W_proj (resident)
                ],
                out_specs=pl.BlockSpec((tm, C), lambda i: (i, 0)),
            ),
            compiler_params=pltpu.CompilerParams(
                dimension_semantics=("parallel",),
                vmem_limit_bytes=vmem_limit),
            cost_estimate=cost,
        )(x2, wfc, wproj)
        return out2.reshape(B, T, C)

    # ---- path B: streamed weight slabs (large C) --------------------------
    th_s = th or _largest_divisor(H, (1024, 768, 512, 384, 256, 128))
    assert H % th_s == 0 and th_s % 128 == 0, (
        "th must divide 4*n_embd and be a multiple of 128 (lanes)")
    streamed_est = (2 * (tm * C * 2 + C * th_s * 2 + th_s * C * 2
                         + tm * C * out_bytes)
                    + tm * C * 4            # f32 accumulator scratch
                    + tm * th_s * 4)        # f32 GELU intermediate
    vmem_limit = min(int(0.9 * vmem_cap),
                     max(streamed_est + (8 << 20), 32 << 20))
    cost = pl.CostEstimate(
        flops=flops, transcendentals=transcendentals,
        bytes_accessed=(M * C * 2
                        + (M // tm) * w_bytes        # weights re-streamed per M tile
                        + M * C * out_bytes))
    out2 = pl.pallas_call(
        _mlp_streamed_kernel,
        out_shape=jax.ShapeDtypeStruct((M, C), out_dtype),
        grid_spec=pltpu.PrefetchScalarGridSpec(
            num_scalar_prefetch=0,
            grid=(M // tm, H // th_s),      # reduction (H) axis innermost
            in_specs=[
                pl.BlockSpec((tm, C), lambda i, j: (i, 0)),
                pl.BlockSpec((C, th_s), lambda i, j: (0, j)),
                pl.BlockSpec((th_s, C), lambda i, j: (j, 0)),
            ],
            out_specs=pl.BlockSpec((tm, C), lambda i, j: (i, 0)),
            scratch_shapes=[pltpu.VMEM((tm, C), jnp.float32)],
        ),
        compiler_params=pltpu.CompilerParams(
            dimension_semantics=("parallel", "arbitrary"),
            vmem_limit_bytes=vmem_limit),
        cost_estimate=cost,
    )(x2, wfc, wproj)
    return out2.reshape(B, T, C)


def mlp_reference(x, w_fc, w_proj):
    h = jnp.einsum("btc,ch->bth", x, w_fc)
    h = 0.5 * h * (1.0 + jnp.tanh(GELU_C * (h + 0.044715 * h ** 3)))
    return jnp.einsum("bth,hc->btc", h, w_proj)


if __name__ == "__main__":
    # Small shapes consistent with the module (n_embd=384).
    B, T, C = 2, 8, 384
    H = 4 * C

    key = jax.random.PRNGKey(0)
    kx, kfc, kproj = jax.random.split(key, 3)

    x = jax.random.normal(kx, (B, T, C), dtype=jnp.float32)
    # nn.Linear(bias=False) weights, stored transposed vs. PyTorch so the
    # kernel does row-major (x @ W) matmuls.
    w_fc = jax.random.normal(kfc, (C, H), dtype=jnp.float32) * 0.02
    w_proj = jax.random.normal(kproj, (H, C), dtype=jnp.float32) * 0.02

    # Hoisted, once-per-model cast (per perf review): the kernel consumes bf16.
    wfc_bf16, wproj_bf16 = prepare_mlp_weights(w_fc, w_proj)

    y = jax.block_until_ready(mlp_forward(x, wfc_bf16, wproj_bf16))

    # Reference in f32 using the same bf16-rounded operands the kernel sees,
    # so the comparison isolates kernel math (bf16 MXU tolerances ~1e-2).
    xr = x.astype(jnp.bfloat16).astype(jnp.float32)
    wfr = wfc_bf16.astype(jnp.float32)
    wpr = wproj_bf16.astype(jnp.float32)
    y_ref = mlp_reference(xr, wfr, wpr)

    assert y.shape == (B, T, C)
    assert jnp.allclose(y, y_ref, atol=2e-2, rtol=2e-2), "mismatch vs reference"

    print("KERNEL_OK")
</pallas_src>

<mosaic_0001>
module attributes {stable_mosaic.version = 11 : i64} {
  func.func @_mlp_resident_kernel(%arg0: i32, %arg1: memref<16x384xbf16, #tpu.memory_space<vmem>>, %arg2: memref<384x1536xbf16, #tpu.memory_space<vmem>>, %arg3: memref<1536x384xbf16, #tpu.memory_space<vmem>>, %arg4: memref<16x384xf32, #tpu.memory_space<vmem>>) attributes {dimension_semantics = [#tpu.dimension_semantics<parallel>], iteration_bounds = array<i64: 1>, scalar_prefetch = 0 : i64, scratch_operands = 0 : i64, tpu.core_type = #tpu.core_type<tc>, window_params = [{transform_indices = @transform_0, window_bounds = array<i64: 16, 384>}, {pipeline_mode = #tpu.pipeline_mode<synchronous>, transform_indices = @transform_1, window_bounds = array<i64: 384, 1536>}, {pipeline_mode = #tpu.pipeline_mode<synchronous>, transform_indices = @transform_2, window_bounds = array<i64: 1536, 384>}, {transform_indices = @transform_3, window_bounds = array<i64: 16, 384>}]} {
    %c0 = arith.constant 0 : index
    %c0_0 = arith.constant 0 : index
    %0 = vector.load %arg1[%c0, %c0_0] : memref<16x384xbf16, #tpu.memory_space<vmem>>, vector<16x384xbf16>
    %cst = arith.constant 0.000000e+00 : f32
    %1 = vector.broadcast %cst : f32 to vector<16x384xf32>
    %c0_1 = arith.constant 0 : index
    %c0_2 = arith.constant 0 : index
    %2 = vector.load %arg2[%c0_1, %c0_2] : memref<384x1536xbf16, #tpu.memory_space<vmem>>, vector<384x1536xbf16>
    %c0_3 = arith.constant 0 : index
    %c0_4 = arith.constant 0 : index
    %3 = vector.load %arg3[%c0_3, %c0_4] : memref<1536x384xbf16, #tpu.memory_space<vmem>>, vector<1536x384xbf16>
    %cst_5 = arith.constant dense<0.000000e+00> : vector<16x1536xf32>
    %4 = tpu.matmul %0, %2, %cst_5 {dimension_numbers = #tpu.dot_dimension_numbers<[1], [0], [0], [1], [0, 0, 1, 1], [], []>} : vector<16x384xbf16>, vector<384x1536xbf16>, vector<16x1536xf32> -> vector<16x1536xf32>
    %5 = arith.mulf %4, %4 : vector<16x1536xf32>
    %cst_6 = arith.constant 5.000000e-01 : f32
    %6 = vector.broadcast %cst_6 : f32 to vector<16x1536xf32>
    %7 = arith.mulf %6, %4 : vector<16x1536xf32>
    %cst_7 = arith.constant 0.797884583 : f32
    %8 = vector.broadcast %cst_7 : f32 to vector<16x1536xf32>
    %9 = arith.mulf %8, %4 : vector<16x1536xf32>
    %cst_8 = arith.constant 4.471500e-02 : f32
    %10 = vector.broadcast %cst_8 : f32 to vector<16x1536xf32>
    %11 = arith.mulf %10, %5 : vector<16x1536xf32>
    %cst_9 = arith.constant 1.000000e+00 : f32
    %12 = vector.broadcast %cst_9 : f32 to vector<16x1536xf32>
    %13 = arith.addf %12, %11 : vector<16x1536xf32>
    %14 = arith.mulf %9, %13 : vector<16x1536xf32>
    %15 = math.tanh %14 : vector<16x1536xf32>
    %cst_10 = arith.constant 1.000000e+00 : f32
    %16 = vector.broadcast %cst_10 : f32 to vector<16x1536xf32>
    %17 = arith.addf %16, %15 : vector<16x1536xf32>
    %18 = arith.mulf %7, %17 : vector<16x1536xf32>
    %19 = arith.truncf %18 : vector<16x1536xf32> to vector<16x1536xbf16>
    %cst_11 = arith.constant dense<0.000000e+00> : vector<16x384xf32>
    %20 = tpu.matmul %19, %3, %cst_11 {dimension_numbers = #tpu.dot_dimension_numbers<[1], [0], [0], [1], [0, 0, 1, 1], [], []>} : vector<16x1536xbf16>, vector<1536x384xbf16>, vector<16x384xf32> -> vector<16x384xf32>
    %21 = arith.addf %1, %20 : vector<16x384xf32>
    %c0_12 = arith.constant 0 : index
    %c0_13 = arith.constant 0 : index
    %22 = vector.load %arg4[%c0_12, %c0_13] : memref<16x384xf32, #tpu.memory_space<vmem>>, vector<16x384xf32>
    tpu.vector_store %arg4[%c0_12, %c0_13], %21 {strides = array<i32>} : memref<16x384xf32, #tpu.memory_space<vmem>>, vector<16x384xf32>,
    return
  }
  func.func @transform_0(%arg0: i32) -> (i32, i32) {
    %c0_i32 = arith.constant 0 : i32
    %c0_i32_0 = arith.constant 0 : i32
    return %arg0, %c0_i32 : i32, i32
  }
  func.func @transform_1(%arg0: i32) -> (i32, i32) {
    %c0_i32 = arith.constant 0 : i32
    %c0_i32_0 = arith.constant 0 : i32
    %c0_i32_1 = arith.constant 0 : i32
    return %c0_i32, %c0_i32_0 : i32, i32
  }
  func.func @transform_2(%arg0: i32) -> (i32, i32) {
    %c0_i32 = arith.constant 0 : i32
    %c0_i32_0 = arith.constant 0 : i32
    %c0_i32_1 = arith.constant 0 : i32
    return %c0_i32, %c0_i32_0 : i32, i32
  }
  func.func @transform_3(%arg0: i32) -> (i32, i32) {
    %c0_i32 = arith.constant 0 : i32
    %c0_i32_0 = arith.constant 0 : i32
    return %arg0, %c0_i32 : i32, i32
  }
}

</mosaic_0001>

<bundles_post_ra>
// kernel: tpu_custom_call.1
= control target key start
LH: loop header
LB: loop body
LE: loop exit
PB: predicated region body
PF: predicated region fallthrough
CT: control target
= control target key end

     0   :  { %8 = vsyncpa [#allocation3], 0  ;;  %s8530_s0 = inlined_call_operand.hbm [shape: bf16[16,384], index: 0, kind: input, shape index: {}]   ;;  %s8531_s1 = inlined_call_operand.hbm [shape: bf16[384,1536], index: 1, kind: input, shape index: {}]   ;;  %s8532_s2 = inlined_call_operand.hbm [shape: bf16[1536,384], index: 2, kind: input, shape index: {}]   ;;  %s8533_s3 = inlined_call_operand.hbm [shape: f32[16,384], index: 3, kind: output, shape index: {}]  }
   0x1   :  { %9 = vsyncpa [#allocation6], 0  ;;  %s28_s14 = sshll.u32 %s8531_s1, 4  ;;  %s29_s14 = int_to_ptr.hbm [resolvable:$true] %s28_s14 }
   0x2   :  { %10 = vsyncpa [#allocation4], 0  ;;  %s8047_s15 = smov [#allocation5]   ;;  %s15_s19 = sshll.u32 %s8530_s0, 4  ;;  %s16_s19 = int_to_ptr.hbm [resolvable:$true] %s15_s19 }
   0x3   :  { %s30_s16 = sshll.u32 %s8047_s15, 4  ;;  %s8048_s20 = smov 768   ;;  %s31_s16 = int_to_ptr.vmem [resolvable:$true] %s30_s16 }
   0x4   :  { %s8049_s21 = smov 48   ;;  %s8050_s22 = smov [#allocation2]  }
   0x5   :  { %36 = dma.hbm_to_vmem [thread:$0]  %s29_s14, 36864, %s31_s16, [#allocation6], %s8048_s20, %s8048_s20, %s8049_s21  }
   0x6   :  { %s17_s23 = sshll.u32 %s8050_s22, 4  ;;  %s8051_s24 = smov 192   ;;  %s18_s23 = int_to_ptr.vmem [resolvable:$true] %s17_s23 }
   0x7   :  { %s8052_s25 = smov 12   ;;  %s41_s27 = sshll.u32 %s8532_s2, 4  ;;  %s42_s27 = int_to_ptr.hbm [resolvable:$true] %s41_s27 }
   0x8   :  { %23 = dma.hbm_to_vmem [thread:$0]  %s16_s19, 384, %s18_s23, [#allocation3], %s8051_s24, %s8051_s24, %s8052_s25  }
   0x9   :  { %s8053_s28 = smov [#allocation7]  }
   0xa   :  { %s43_s29 = sshll.u32 %s8053_s28, 4  ;;  %s44_s29 = int_to_ptr.vmem [resolvable:$true] %s43_s29 }
   0xb   :  { %49 = dma.hbm_to_vmem [thread:$0]  %s42_s27, 36864, %s44_s29, [#allocation6], %s8051_s24, %s8051_s24, %s8052_s25  }
   0xc   :  { %8041 = dma.done.wait [#allocation3], 384  }
   0xd   :  { %8042 = vsyncadd [#allocation3], 4294966912 }
   0xe   :  { %8043 = dma.done.wait [#allocation6], 73728  }
   0xf   :  { %8044 = vsyncadd [#allocation6], 4294893568  ;;  %v5342_v0 = vld [vmem:[#allocation5 + $0x2a0] sm:$0xf]  ;;  %v7401_v1 = vld [vmem:[#allocation5 + $0x2cc] sm:$0xf0] }
  0x10   :  { %v5726_v2 = vld [vmem:[#allocation5 + $0x5a0] sm:$0xf]  ;;  %v5343_v3 = vor.u32 %v7401_v1, %v5342_v0  ;;  %v7497_v4 = vld [vmem:[#allocation5 + $0x5cc] sm:$0xf0]  ;;  %v7395_v9 = vld [vmem:[#allocation5 + $0x2a4] sm:$0xf] }
  0x11   :  { %v6110_v5 = vld [vmem:[#allocation5 + $0x8a0] sm:$0xf]  ;;  %v7593_v6 = vld [vmem:[#allocation5 + $0x8cc] sm:$0xf0]  ;;  %v5727_v7 = vor.u32 %v7497_v4, %v5726_v2  ;;  %v5344_v10 = vld [vmem:[#allocation5 + $0x2d0] sm:$0xf0] }
  0x12   :  { %v6111_v8 = vor.u32 %v7593_v6, %v6110_v5  ;;  %v5294_v11 = vld [vmem:[#allocation5 + $0x240] sm:$0xf]  ;;  %2194 = vmatpush.bf16.msra.mxu0 %v5343_v3  ;;  %v5347_v12 = vor.u32 %v7395_v9, %v5344_v10  ;;  %v7389_v13 = vld [vmem:[#allocation5 + $0x26c] sm:$0xf0]  ;;  %v7383_v20 = vld [vmem:[#allocation5 + $0x244] sm:$0xf] }
  0x13   :  { %v5678_v14 = vld [vmem:[#allocation5 + $0x540] sm:$0xf]  ;;  %v7485_v15 = vld [vmem:[#allocation5 + $0x56c] sm:$0xf0]  ;;  %2208 = vmatpush.bf16.msra.mxu1 %v5727_v7  ;;  %v5295_v16 = vor.u32 %v7389_v13, %v5294_v11  ;;  %v5296_v22 = vld [vmem:[#allocation5 + $0x270] sm:$0xf0] }
  0x14   :  { %2222 = vmatpush.bf16.msra.mxu2 %v6111_v8  ;;  %v5679_v17 = vor.u32 %v7485_v15, %v5678_v14  ;;  %v6062_v18 = vld [vmem:[#allocation5 + $0x840] sm:$0xf]  ;;  %v7581_v19 = vld [vmem:[#allocation5 + $0x86c] sm:$0xf0]  ;;  %2236 = vmatpush.bf16.msra.mxu3 %v5347_v12  ;;  %v5299_v25 = vor.u32 %v7383_v20, %v5296_v22  ;;  %v7371_v31 = vld [vmem:[#allocation5 + $0x1e4] sm:$0xf] }
  0x15   :  { %v6063_v21 = vor.u32 %v7581_v19, %v6062_v18  ;;  %v5246_v23 = vld [vmem:[#allocation5 + $0x1e0] sm:$0xf]  ;;  %v7377_v24 = vld [vmem:[#allocation5 + $0x20c] sm:$0xf0]  ;;  %v5248_v32 = vld [vmem:[#allocation5 + $0x210] sm:$0xf0] }
  0x16   :  { %v5630_v26 = vld [vmem:[#allocation5 + $0x4e0] sm:$0xf]  ;;  %v7473_v27 = vld [vmem:[#allocation5 + $0x50c] sm:$0xf0]  ;;  %2195 = vmatpush.bf16.msra.mxu0 %v5295_v16  ;;  %v5247_v29 = vor.u32 %v7377_v24, %v5246_v23  ;;  %v5251_v38 = vor.u32 %v7371_v31, %v5248_v32  ;;  %v7359_v42 = vld [vmem:[#allocation5 + $0x184] sm:$0xf] }
  0x17   :  { %v6014_v28 = vld [vmem:[#allocation5 + $0x7e0] sm:$0xf]  ;;  %v7569_v30 = vld [vmem:[#allocation5 + $0x80c] sm:$0xf0]  ;;  %2209 = vmatpush.bf16.msra.mxu1 %v5679_v17  ;;  %v5631_v33 = vor.u32 %v7473_v27, %v5630_v26  ;;  %v5200_v43 = vld [vmem:[#allocation5 + $0x1b0] sm:$0xf0] }
  0x18   :  { %2223 = vmatpush.bf16.msra.mxu2 %v6063_v21  ;;  %v6015_v34 = vor.u32 %v7569_v30, %v6014_v28  ;;  %v5198_v35 = vld [vmem:[#allocation5 + $0x180] sm:$0xf]  ;;  %v7365_v36 = vld [vmem:[#allocation5 + $0x1ac] sm:$0xf0]  ;;  %2237 = vmatpush.bf16.msra.mxu3 %v5299_v25  ;;  %v5203_v50 = vor.u32 %v7359_v42, %v5200_v43  ;;  %v7347_v54 = vld [vmem:[#allocation5 + $0x124] sm:$0xf] }
  0x19   :  { %v5582_v37 = vld [vmem:[#allocation5 + $0x480] sm:$0xf]  ;;  %v7461_v39 = vld [vmem:[#allocation5 + $0x4ac] sm:$0xf0]  ;;  %v5199_v44 = vor.u32 %v7365_v36, %v5198_v35  ;;  %v5152_v55 = vld [vmem:[#allocation5 + $0x150] sm:$0xf0] }
  0x1a   :  { %v5966_v40 = vld [vmem:[#allocation5 + $0x780] sm:$0xf]  ;;  %v7557_v41 = vld [vmem:[#allocation5 + $0x7ac] sm:$0xf0]  ;;  %2196 = vmatpush.bf16.msra.mxu0 %v5247_v29  ;;  %v5583_v45 = vor.u32 %v7461_v39, %v5582_v37  ;;  %v5155_v62 = vor.u32 %v7347_v54, %v5152_v55  ;;  %v7335_v2 = vld [vmem:[#allocation5 + $0xc4] sm:$0xf] }
  0x1b   :  { %2210 = vmatpush.bf16.msra.mxu1 %v5631_v33  ;;  %v5967_v46 = vor.u32 %v7557_v41, %v5966_v40  ;;  %v5150_v47 = vld [vmem:[#allocation5 + $0x120] sm:$0xf]  ;;  %v7353_v48 = vld [vmem:[#allocation5 + $0x14c] sm:$0xf0]  ;;  %v5104_v3 = vld [vmem:[#allocation5 + $0xf0] sm:$0xf0] }
  0x1c   :  { %2224 = vmatpush.bf16.msra.mxu2 %v6015_v34  ;;  %v5534_v49 = vld [vmem:[#allocation5 + $0x420] sm:$0xf]  ;;  %2238 = vmatpush.bf16.msra.mxu3 %v5251_v38  ;;  %v7449_v51 = vld [vmem:[#allocation5 + $0x44c] sm:$0xf0]  ;;  %v5151_v56 = vor.u32 %v7353_v48, %v5150_v47  ;;  %v5107_v10 = vor.u32 %v7335_v2, %v5104_v3  ;;  %v7323_v14 = vld [vmem:[#allocation5 + $0x64] sm:$0xf] }
  0x1d   :  { %v5918_v52 = vld [vmem:[#allocation5 + $0x720] sm:$0xf]  ;;  %v7545_v53 = vld [vmem:[#allocation5 + $0x74c] sm:$0xf0]  ;;  %v5535_v57 = vor.u32 %v7449_v51, %v5534_v49  ;;  %v5056_v15 = vld [vmem:[#allocation5 + $0x90] sm:$0xf0] }
  0x1e   :  { %2197 = vmatpush.bf16.msra.mxu0 %v5199_v44  ;;  %v5919_v58 = vor.u32 %v7545_v53, %v5918_v52  ;;  %v5102_v59 = vld [vmem:[#allocation5 + $0xc0] sm:$0xf]  ;;  %v7341_v60 = vld [vmem:[#allocation5 + $0xec] sm:$0xf0]  ;;  %v7311_v25 = vld [vmem:[#allocation5 + $0x4] sm:$0xf]  ;;  %v5059_v26 = vor.u32 %v7323_v14, %v5056_v15 }
  0x1f   :  { %2211 = vmatpush.bf16.msra.mxu1 %v5583_v45  ;;  %v5486_v61 = vld [vmem:[#allocation5 + $0x3c0] sm:$0xf]  ;;  %v7437_v63 = vld [vmem:[#allocation5 + $0x3ec] sm:$0xf0]  ;;  %v5103_v4 = vor.u32 %v7341_v60, %v5102_v59  ;;  %v5008_v27 = vld [vmem:[#allocation5 + $0x30] sm:$0xf0] }
  0x20   :  { %2225 = vmatpush.bf16.msra.mxu2 %v5967_v46  ;;  %2239 = vmatpush.bf16.msra.mxu3 %v5203_v50  ;;  %v5870_v0 = vld [vmem:[#allocation5 + $0x6c0] sm:$0xf]  ;;  %v7533_v1 = vld [vmem:[#allocation5 + $0x6ec] sm:$0xf0]  ;;  %v5487_v5 = vor.u32 %v7437_v63, %v5486_v61  ;;  %v7491_v28 = vld [vmem:[#allocation5 + $0x5a4] sm:$0xf]  ;;  %v5011_v42 = vor.u32 %v7311_v25, %v5008_v27 }
  0x21   :  { %v5871_v6 = vor.u32 %v7533_v1, %v5870_v0  ;;  %v5054_v7 = vld [vmem:[#allocation5 + $0x60] sm:$0xf]  ;;  %v7329_v8 = vld [vmem:[#allocation5 + $0x8c] sm:$0xf0]  ;;  %v5728_v29 = vld [vmem:[#allocation5 + $0x5d0] sm:$0xf0] }
  0x22   :  { %2198 = vmatpush.bf16.msra.mxu0 %v5151_v56  ;;  %v5438_v9 = vld [vmem:[#allocation5 + $0x360] sm:$0xf]  ;;  %v7425_v11 = vld [vmem:[#allocation5 + $0x38c] sm:$0xf0]  ;;  %v5055_v17 = vor.u32 %v7329_v8, %v5054_v7  ;;  %v7587_v30 = vld [vmem:[#allocation5 + $0x8a4] sm:$0xf]  ;;  %v5731_v43 = vor.u32 %v7491_v28, %v5728_v29 }
  0x23   :  { %2212 = vmatpush.bf16.msra.mxu1 %v5535_v57  ;;  %v5822_v12 = vld [vmem:[#allocation5 + $0x660] sm:$0xf]  ;;  %v7521_v13 = vld [vmem:[#allocation5 + $0x68c] sm:$0xf0]  ;;  %v5439_v21 = vor.u32 %v7425_v11, %v5438_v9  ;;  %v6112_v31 = vld [vmem:[#allocation5 + $0x8d0] sm:$0xf0] }
  0x24   :  { %2226 = vmatpush.bf16.msra.mxu2 %v5919_v58  ;;  %2240 = vmatpush.bf16.msra.mxu3 %v5155_v62  ;;  %v5006_v16 = vld [vmem:[#allocation5] sm:$0xf]  ;;  %v7317_v18 = vld [vmem:[#allocation5 + $0x2c] sm:$0xf0]  ;;  %v5823_v22 = vor.u32 %v7521_v13, %v5822_v12  ;;  %v5350_v32 = vld [vmem:[#allocation5 + $0x2a8] sm:$0xf]  ;;  %v6115_v47 = vor.u32 %v7587_v30, %v6112_v31 }
  0x25   :  { %v5390_v19 = vld [vmem:[#allocation5 + $0x300] sm:$0xf]  ;;  %v7413_v20 = vld [vmem:[#allocation5 + $0x32c] sm:$0xf0]  ;;  %v5007_v33 = vor.u32 %v7317_v18, %v5006_v16  ;;  %v7402_v34 = vld [vmem:[#allocation5 + $0x2d4] sm:$0xf0] }
  0x26   :  { %2199 = vmatpush.bf16.msra.mxu0 %v5103_v4  ;;  %v5774_v23 = vld [vmem:[#allocation5 + $0x600] sm:$0xf]  ;;  %v7509_v24 = vld [vmem:[#allocation5 + $0x62c] sm:$0xf0]  ;;  %v5734_v35 = vld [vmem:[#allocation5 + $0x5a8] sm:$0xf]  ;;  %v5391_v37 = vor.u32 %v7413_v20, %v5390_v19  ;;  %v5351_v48 = vor.u32 %v7402_v34, %v5350_v32 }
  0x27   :  { %2213 = vmatpush.bf16.msra.mxu1 %v5487_v5  ;;  %v7498_v36 = vld [vmem:[#allocation5 + $0x5d4] sm:$0xf0]  ;;  %v5775_v38 = vor.u32 %v7509_v24, %v5774_v23  ;;  %v7479_v39 = vld [vmem:[#allocation5 + $0x544] sm:$0xf]  ;;  %v5002_v40 = vld [vmem:[#allocation2 + $0x8] sm:$0xf] }
  0x28   :  { %2227 = vmatpush.bf16.msra.mxu2 %v5871_v6  ;;  %2241 = vmatpush.bf16.msra.mxu3 %v5107_v10  ;;  %v7310_v41 = vld [vmem:[#allocation2 + $0x10] sm:$0xf0]  ;;  %v5680_v44 = vld [vmem:[#allocation5 + $0x570] sm:$0xf0]  ;;  %v7575_v45 = vld [vmem:[#allocation5 + $0x844] sm:$0xf]  ;;  %v5735_v52 = vor.u32 %v7498_v36, %v5734_v35 }
  0x29   :  { %v6064_v46 = vld [vmem:[#allocation5 + $0x870] sm:$0xf0]  ;;  %v4994_v49 = vld [vmem:[#allocation2] sm:$0xf]  ;;  %v7308_v51 = vld [vmem:[#allocation2 + $0x4] sm:$0xf]  ;;  %v8086_v55 = vor.u32 %v7310_v41, %v5002_v40  ;;  %v5683_v61 = vor.u32 %v7479_v39, %v5680_v44 }
  0x2a   :  { %2200 = vmatpush.bf16.msra.mxu0 %v5055_v17  ;;  %v7309_v50 = vld [vmem:[#allocation2 + $0x8] sm:$0xf0]  ;;  %v5302_v53 = vld [vmem:[#allocation5 + $0x248] sm:$0xf]  ;;  %v7390_v54 = vld [vmem:[#allocation5 + $0x274] sm:$0xf0]  ;;  %v6067_v62 = vor.u32 %v7575_v45, %v6064_v46 }
  0x2b   :  { %2214 = vmatpush.bf16.msra.mxu1 %v5439_v21  ;;  %v4996_v56 = vld [vmem:[#allocation2 + $0xc] sm:$0xf0]  ;;  %v5686_v57 = vld [vmem:[#allocation5 + $0x548] sm:$0xf]  ;;  %v8088_v59 = vor.u32 %v7309_v50, %v4994_v49  ;;  %v5303_v63 = vor.u32 %v7390_v54, %v5302_v53  ;;  %v7467_v0 = vld [vmem:[#allocation5 + $0x4e4] sm:$0xf] }
  0x2c   :  { %2228 = vmatpush.bf16.msra.mxu2 %v5823_v22  ;;  %2242 = vmatpush.bf16.msra.mxu3 %v5059_v26  ;;  %v7486_v58 = vld [vmem:[#allocation5 + $0x574] sm:$0xf0]  ;;  %v8090_v60 = vor.u32 %v7308_v51, %v4996_v56  ;;  %v5632_v1 = vld [vmem:[#allocation5 + $0x510] sm:$0xf0]  ;;  %v7563_v2 = vld [vmem:[#allocation5 + $0x7e4] sm:$0xf] }
  0x2d   :  { %v5687_v3 = vor.u32 %v7486_v58, %v5686_v57  ;;  %v6016_v4 = vld [vmem:[#allocation5 + $0x810] sm:$0xf0]  ;;  %v5254_v5 = vld [vmem:[#allocation5 + $0x1e8] sm:$0xf]  ;;  %v7378_v6 = vld [vmem:[#allocation5 + $0x214] sm:$0xf0]  ;;  %v5635_v9 = vor.u32 %v7467_v0, %v5632_v1 }
  0x2e   :  { %2201 = vmatpush.bf16.msra.mxu0 %v5007_v33  ;;  %v5638_v7 = vld [vmem:[#allocation5 + $0x4e8] sm:$0xf]  ;;  %v7474_v8 = vld [vmem:[#allocation5 + $0x514] sm:$0xf0]  ;;  %v6019_v10 = vor.u32 %v7563_v2, %v6016_v4  ;;  %v5255_v11 = vor.u32 %v7378_v6, %v5254_v5  ;;  %v7455_v12 = vld [vmem:[#allocation5 + $0x484] sm:$0xf] }
  0x2f   :  { %2215 = vmatpush.bf16.msra.mxu1 %v5391_v37  ;;  %v5584_v13 = vld [vmem:[#allocation5 + $0x4b0] sm:$0xf0]  ;;  %v7551_v14 = vld [vmem:[#allocation5 + $0x784] sm:$0xf]  ;;  %v5639_v15 = vor.u32 %v7474_v8, %v5638_v7  ;;  %v5206_v17 = vld [vmem:[#allocation5 + $0x188] sm:$0xf] }
  0x30   :  { %2229 = vmatpush.bf16.msra.mxu2 %v5775_v38  ;;  %2243 = vmatpush.bf16.msra.mxu3 %v5011_v42  ;;  %v5968_v16 = vld [vmem:[#allocation5 + $0x7b0] sm:$0xf0]  ;;  %v7366_v18 = vld [vmem:[#allocation5 + $0x1b4] sm:$0xf0]  ;;  %v5590_v19 = vld [vmem:[#allocation5 + $0x488] sm:$0xf]  ;;  %v5587_v21 = vor.u32 %v7455_v12, %v5584_v13 }
  0x31   :  { %2202 = vmatmul.bf16.vlgmr.msra.gmra.mxu0 %v8088_v59  ;;  %v7462_v20 = vld [vmem:[#allocation5 + $0x4b4] sm:$0xf0]  ;;  %v5971_v22 = vor.u32 %v7551_v14, %v5968_v16  ;;  %v5207_v23 = vor.u32 %v7366_v18, %v5206_v17  ;;  %v7443_v24 = vld [vmem:[#allocation5 + $0x424] sm:$0xf]  ;;  %v5536_v25 = vld [vmem:[#allocation5 + $0x450] sm:$0xf0] }
  0x32   :  { %2250 = vmatpush.bf16.msrb.mxu0 %v5731_v43  ;;  %2216 = vmatmul.bf16.vlgmr.msra.gmra.mxu1 %v8090_v60  ;;  %v7539_v26 = vld [vmem:[#allocation5 + $0x724] sm:$0xf]  ;;  %v5591_v27 = vor.u32 %v7462_v20, %v5590_v19  ;;  %v5920_v28 = vld [vmem:[#allocation5 + $0x750] sm:$0xf0]  ;;  %v5158_v29 = vld [vmem:[#allocation5 + $0x128] sm:$0xf]  ;;  %v5539_v33 = vor.u32 %v7443_v24, %v5536_v25 }
  0x33   :  { %2264 = vmatpush.bf16.msrb.mxu1 %v6115_v47  ;;  %2230 = vmatmul.bf16.vlgmr.msra.gmra.mxu2 %v8086_v55  ;;  %v7354_v30 = vld [vmem:[#allocation5 + $0x154] sm:$0xf0]  ;;  %v5542_v31 = vld [vmem:[#allocation5 + $0x428] sm:$0xf]  ;;  %v5923_v34 = vor.u32 %v7539_v26, %v5920_v28  ;;  %v7431_v36 = vld [vmem:[#allocation5 + $0x3c4] sm:$0xf] }
  0x34   :  { %2278 = vmatpush.bf16.msrb.mxu2 %v5351_v48  ;;  %2292 = vmatpush.bf16.msrb.mxu3 %v5735_v52  ;;  %v7450_v32 = vld [vmem:[#allocation5 + $0x454] sm:$0xf0]  ;;  %v5159_v35 = vor.u32 %v7354_v30, %v5158_v29  ;;  %v5488_v37 = vld [vmem:[#allocation5 + $0x3f0] sm:$0xf0]  ;;  %v7527_v38 = vld [vmem:[#allocation5 + $0x6c4] sm:$0xf] }
  0x35   :  { %2244 = vmatmul.bf16.vlgmr.msra.gmra.mxu3 %v8088_v59  ;;  %v5543_v39 = vor.u32 %v7450_v32, %v5542_v31  ;;  %v5872_v40 = vld [vmem:[#allocation5 + $0x6f0] sm:$0xf0]  ;;  %v5110_v41 = vld [vmem:[#allocation5 + $0xc8] sm:$0xf]  ;;  %v7342_v42 = vld [vmem:[#allocation5 + $0xf4] sm:$0xf0]  ;;  %v5491_v45 = vor.u32 %v7431_v36, %v5488_v37 }
  0x36   :  { %2251 = vmatpush.bf16.msrb.mxu0 %v5683_v61  ;;  %v5494_v43 = vld [vmem:[#allocation5 + $0x3c8] sm:$0xf]  ;;  %v7438_v44 = vld [vmem:[#allocation5 + $0x3f4] sm:$0xf0]  ;;  %v5875_v46 = vor.u32 %v7527_v38, %v5872_v40  ;;  %v5111_v47 = vor.u32 %v7342_v42, %v5110_v41  ;;  %v7419_v48 = vld [vmem:[#allocation5 + $0x364] sm:$0xf] }
  0x37   :  { %2265 = vmatpush.bf16.msrb.mxu1 %v6067_v62  ;;  %v5440_v49 = vld [vmem:[#allocation5 + $0x390] sm:$0xf0]  ;;  %v7515_v50 = vld [vmem:[#allocation5 + $0x664] sm:$0xf]  ;;  %v5495_v51 = vor.u32 %v7438_v44, %v5494_v43  ;;  %v5062_v53 = vld [vmem:[#allocation5 + $0x68] sm:$0xf] }
  0x38   :  { %2279 = vmatpush.bf16.msrb.mxu2 %v5303_v63  ;;  %2293 = vmatpush.bf16.msrb.mxu3 %v5687_v3  ;;  %v5824_v52 = vld [vmem:[#allocation5 + $0x690] sm:$0xf0]  ;;  %v7330_v54 = vld [vmem:[#allocation5 + $0x94] sm:$0xf0]  ;;  %v5446_v56 = vld [vmem:[#allocation5 + $0x368] sm:$0xf]  ;;  %v5443_v58 = vor.u32 %v7419_v48, %v5440_v49 }
  0x39   :  { %v7426_v57 = vld [vmem:[#allocation5 + $0x394] sm:$0xf0]  ;;  %v7407_v61 = vld [vmem:[#allocation5 + $0x304] sm:$0xf]  ;;  %v5392_v62 = vld [vmem:[#allocation5 + $0x330] sm:$0xf0]  ;;  %v5827_v63 = vor.u32 %v7515_v50, %v5824_v52  ;;  %v5063_v0 = vor.u32 %v7330_v54, %v5062_v53 }
  0x3a   :  { %2252 = vmatpush.bf16.msrb.mxu0 %v5635_v9  ;;  %v7503_v1 = vld [vmem:[#allocation5 + $0x604] sm:$0xf]  ;;  %v5776_v2 = vld [vmem:[#allocation5 + $0x630] sm:$0xf0]  ;;  %v5014_v3 = vld [vmem:[#allocation5 + $0x8] sm:$0xf]  ;;  %v5447_v4 = vor.u32 %v7426_v57, %v5446_v56 }
  0x3b   :  { %2266 = vmatpush.bf16.msrb.mxu1 %v6019_v10  ;;  %v7318_v5 = vld [vmem:[#allocation5 + $0x34] sm:$0xf0]  ;;  %v5398_v6 = vld [vmem:[#allocation5 + $0x308] sm:$0xf]  ;;  %v7396_v10 = vld [vmem:[#allocation5 + $0x2ac] sm:$0xf] }
  0x3c   :  { %2280 = vmatpush.bf16.msrb.mxu2 %v5255_v11  ;;  %2294 = vmatpush.bf16.msrb.mxu3 %v5639_v15  ;;  %v7414_v7 = vld [vmem:[#allocation5 + $0x334] sm:$0xf0]  ;;  %v6118_v8 = vld [vmem:[#allocation5 + $0x8a8] sm:$0xf]  ;;  %v5395_v11 = vor.u32 %v7407_v61, %v5392_v62  ;;  %v5352_v12 = vld [vmem:[#allocation5 + $0x2d8] sm:$0xf0]  ;;  %v5779_v15 = vor.u32 %v7503_v1, %v5776_v2  ;;  %v5015_v16 = vor.u32 %v7318_v5, %v5014_v3 }
  0x3d   :  { %v7594_v9 = vld [vmem:[#allocation5 + $0x8d4] sm:$0xf0]  ;;  %v7492_v13 = vld [vmem:[#allocation5 + $0x5ac] sm:$0xf]  ;;  %v5736_v14 = vld [vmem:[#allocation5 + $0x5d8] sm:$0xf0]  ;;  %v5399_v19 = vor.u32 %v7414_v7, %v5398_v6 }
  0x3e   :  { %2253 = vmatpush.bf16.msrb.mxu0 %v5587_v21  ;;  %v7588_v17 = vld [vmem:[#allocation5 + $0x8ac] sm:$0xf]  ;;  %v6120_v18 = vld [vmem:[#allocation5 + $0x8d8] sm:$0xf0]  ;;  %v6119_v20 = vor.u32 %v7594_v9, %v6118_v8  ;;  %v5355_v21 = vor.u32 %v7396_v10, %v5352_v12  ;;  %v7582_v24 = vld [vmem:[#allocation5 + $0x874] sm:$0xf0] }
  0x3f   :  { %2267 = vmatpush.bf16.msrb.mxu1 %v5971_v22  ;;  %v5739_v22 = vor.u32 %v7492_v13, %v5736_v14  ;;  %v7384_v25 = vld [vmem:[#allocation5 + $0x24c] sm:$0xf]  ;;  %v6123_v26 = vor.u32 %v7588_v17, %v6120_v18  ;;  %v5688_v29 = vld [vmem:[#allocation5 + $0x578] sm:$0xf0]  ;;  %v7570_v36 = vld [vmem:[#allocation5 + $0x814] sm:$0xf0] }
  0x40   :  { %2281 = vmatpush.bf16.msrb.mxu2 %v5207_v23  ;;  %2295 = vmatpush.bf16.msrb.mxu3 %v5591_v27  ;;  %v6070_v23 = vld [vmem:[#allocation5 + $0x848] sm:$0xf]  ;;  %v5304_v27 = vld [vmem:[#allocation5 + $0x278] sm:$0xf0]  ;;  %v7480_v28 = vld [vmem:[#allocation5 + $0x54c] sm:$0xf] }
  0x41   :  { %v7576_v30 = vld [vmem:[#allocation5 + $0x84c] sm:$0xf]  ;;  %v6072_v31 = vld [vmem:[#allocation5 + $0x878] sm:$0xf0]  ;;  %v6071_v32 = vor.u32 %v7582_v24, %v6070_v23  ;;  %v7558_v48 = vld [vmem:[#allocation5 + $0x7b4] sm:$0xf0] }
  0x42   :  { %2254 = vmatpush.bf16.msrb.mxu0 %v5539_v33  ;;  %v5307_v33 = vor.u32 %v7384_v25, %v5304_v27  ;;  %v7372_v37 = vld [vmem:[#allocation5 + $0x1ec] sm:$0xf]  ;;  %v6075_v38 = vor.u32 %v7576_v30, %v6072_v31  ;;  %v5640_v41 = vld [vmem:[#allocation5 + $0x518] sm:$0xf0]  ;;  %v5926_v62 = vld [vmem:[#allocation5 + $0x728] sm:$0xf] }
  0x43   :  { %2268 = vmatpush.bf16.msrb.mxu1 %v5923_v34  ;;  %v5691_v34 = vor.u32 %v7480_v28, %v5688_v29  ;;  %v7468_v40 = vld [vmem:[#allocation5 + $0x4ec] sm:$0xf]  ;;  %v6024_v43 = vld [vmem:[#allocation5 + $0x818] sm:$0xf0]  ;;  %v5878_v10 = vld [vmem:[#allocation5 + $0x6c8] sm:$0xf] }
  0x44   :  { %2282 = vmatpush.bf16.msrb.mxu2 %v5159_v35  ;;  %2296 = vmatpush.bf16.msrb.mxu3 %v5543_v39  ;;  %v6022_v35 = vld [vmem:[#allocation5 + $0x7e8] sm:$0xf]  ;;  %v5256_v39 = vld [vmem:[#allocation5 + $0x218] sm:$0xf0]  ;;  %v7564_v42 = vld [vmem:[#allocation5 + $0x7ec] sm:$0xf] }
  0x45   :  { %v6023_v44 = vor.u32 %v7570_v36, %v6022_v35  ;;  %v7360_v49 = vld [vmem:[#allocation5 + $0x18c] sm:$0xf]  ;;  %v6027_v50 = vor.u32 %v7564_v42, %v6024_v43  ;;  %v5592_v53 = vld [vmem:[#allocation5 + $0x4b8] sm:$0xf0]  ;;  %v7522_v23 = vld [vmem:[#allocation5 + $0x694] sm:$0xf0] }
  0x46   :  { %2255 = vmatpush.bf16.msrb.mxu0 %v5491_v45  ;;  %v5259_v45 = vor.u32 %v7372_v37, %v5256_v39  ;;  %v7456_v52 = vld [vmem:[#allocation5 + $0x48c] sm:$0xf]  ;;  %v5976_v56 = vld [vmem:[#allocation5 + $0x7b8] sm:$0xf0]  ;;  %v5358_v43 = vld [vmem:[#allocation5 + $0x2b0] sm:$0xf] }
  0x47   :  { %2269 = vmatpush.bf16.msrb.mxu1 %v5875_v46  ;;  %v5643_v46 = vor.u32 %v7468_v40, %v5640_v41  ;;  %v7552_v54 = vld [vmem:[#allocation5 + $0x78c] sm:$0xf]  ;;  %v5595_v61 = vor.u32 %v7456_v52, %v5592_v53  ;;  %v5160_v2 = vld [vmem:[#allocation5 + $0x158] sm:$0xf0]  ;;  %v7397_v52 = vld [vmem:[#allocation5 + $0x2b4] sm:$0xf] }
  0x48   :  { %2283 = vmatpush.bf16.msrb.mxu2 %v5111_v47  ;;  %2297 = vmatpush.bf16.msrb.mxu3 %v5495_v51  ;;  %v5974_v47 = vld [vmem:[#allocation5 + $0x788] sm:$0xf]  ;;  %v5208_v51 = vld [vmem:[#allocation5 + $0x1b8] sm:$0xf0]  ;;  %v5979_v1 = vor.u32 %v7552_v54, %v5976_v56  ;;  %v7444_v3 = vld [vmem:[#allocation5 + $0x42c] sm:$0xf] }
  0x49   :  { %v5975_v57 = vor.u32 %v7558_v48, %v5974_v47  ;;  %v7540_v5 = vld [vmem:[#allocation5 + $0x72c] sm:$0xf]  ;;  %v5928_v6 = vld [vmem:[#allocation5 + $0x758] sm:$0xf0]  ;;  %v7499_v47 = vld [vmem:[#allocation5 + $0x5dc] sm:$0xf0] }
  0x4a   :  { %2256 = vmatpush.bf16.msrb.mxu0 %v5443_v58  ;;  %v5211_v58 = vor.u32 %v7360_v49, %v5208_v51  ;;  %v7336_v12 = vld [vmem:[#allocation5 + $0xcc] sm:$0xf]  ;;  %v5931_v13 = vor.u32 %v7540_v5, %v5928_v6  ;;  %v5112_v14 = vld [vmem:[#allocation5 + $0xf8] sm:$0xf0]  ;;  %v6126_v48 = vld [vmem:[#allocation5 + $0x8b0] sm:$0xf] }
  0x4b   :  { %2270 = vmatpush.bf16.msrb.mxu1 %v5827_v63  ;;  %v7546_v63 = vld [vmem:[#allocation5 + $0x754] sm:$0xf0]  ;;  %v7528_v17 = vld [vmem:[#allocation5 + $0x6cc] sm:$0xf]  ;;  %v5880_v18 = vld [vmem:[#allocation5 + $0x6f8] sm:$0xf0] }
  0x4c   :  { %2284 = vmatpush.bf16.msrb.mxu2 %v5063_v0  ;;  %2298 = vmatpush.bf16.msrb.mxu3 %v5447_v4  ;;  %v7348_v0 = vld [vmem:[#allocation5 + $0x12c] sm:$0xf]  ;;  %v5544_v4 = vld [vmem:[#allocation5 + $0x458] sm:$0xf0]  ;;  %v5927_v7 = vor.u32 %v7546_v63, %v5926_v62  ;;  %v5883_v25 = vor.u32 %v7528_v17, %v5880_v18  ;;  %v7595_v49 = vld [vmem:[#allocation5 + $0x8dc] sm:$0xf0] }
  0x4d   :  { %v5163_v8 = vor.u32 %v7348_v0, %v5160_v2  ;;  %v5547_v9 = vor.u32 %v7444_v3, %v5544_v4  ;;  %v7324_v24 = vld [vmem:[#allocation5 + $0x6c] sm:$0xf]  ;;  %v5448_v28 = vld [vmem:[#allocation5 + $0x398] sm:$0xf0]  ;;  %v5360_v53 = vld [vmem:[#allocation5 + $0x2e0] sm:$0xf0] }
  0x4e   :  { %2257 = vmatpush.bf16.msrb.mxu0 %v5395_v11  ;;  %v7534_v11 = vld [vmem:[#allocation5 + $0x6f4] sm:$0xf0]  ;;  %v7420_v27 = vld [vmem:[#allocation5 + $0x36c] sm:$0xf]  ;;  %v5832_v30 = vld [vmem:[#allocation5 + $0x698] sm:$0xf0]  ;;  %v5363_v0 = vor.u32 %v7397_v52, %v5360_v53 }
  0x4f   :  { %2271 = vmatpush.bf16.msrb.mxu1 %v5779_v15  ;;  %v7432_v15 = vld [vmem:[#allocation5 + $0x3cc] sm:$0xf]  ;;  %v5451_v35 = vor.u32 %v7420_v27, %v5448_v28  ;;  %v5016_v37 = vld [vmem:[#allocation5 + $0x38] sm:$0xf0]  ;;  %v7391_v62 = vld [vmem:[#allocation5 + $0x27c] sm:$0xf0] }
  0x50   :  { %2285 = vmatpush.bf16.msrb.mxu2 %v5015_v16  ;;  %2299 = vmatpush.bf16.msrb.mxu3 %v5399_v19  ;;  %v5496_v16 = vld [vmem:[#allocation5 + $0x3f8] sm:$0xf0]  ;;  %v5879_v19 = vor.u32 %v7534_v11, %v5878_v10  ;;  %v7516_v29 = vld [vmem:[#allocation5 + $0x66c] sm:$0xf]  ;;  %v5694_v63 = vld [vmem:[#allocation5 + $0x550] sm:$0xf] }
  0x51   :  { %2258 = vmatmul.bf16.vlgmr.msrb.gmra.mxu0 %v8090_v60  ;;  %v7312_v36 = vld [vmem:[#allocation5 + $0xc] sm:$0xf]  ;;  %v5835_v39 = vor.u32 %v7516_v29, %v5832_v30  ;;  %v5400_v40 = vld [vmem:[#allocation5 + $0x338] sm:$0xf0]  ;;  %v6078_v2 = vld [vmem:[#allocation5 + $0x850] sm:$0xf] }
  0x52   :  { %2306 = vmatpush.bf16.msra.mxu0 %v6119_v20  ;;  %2272 = vmatmul.bf16.vlgmr.msrb.gmra.mxu1 %v8086_v55  ;;  %v5115_v20 = vor.u32 %v7336_v12, %v5112_v14  ;;  %v7504_v41 = vld [vmem:[#allocation5 + $0x60c] sm:$0xf]  ;;  %v5784_v42 = vld [vmem:[#allocation5 + $0x638] sm:$0xf0]  ;;  %v7583_v3 = vld [vmem:[#allocation5 + $0x87c] sm:$0xf0] }
  0x53   :  { %2320 = vmatpush.bf16.msra.mxu1 %v5355_v21  ;;  %2286 = vmatmul.bf16.vlgmr.msrb.gmra.mxu2 %v8088_v59  ;;  %v5499_v21 = vor.u32 %v7432_v15, %v5496_v16  ;;  %v5787_v54 = vor.u32 %v7504_v41, %v5784_v42  ;;  %v7385_v4 = vld [vmem:[#allocation5 + $0x254] sm:$0xf]  ;;  %v5312_v5 = vld [vmem:[#allocation5 + $0x280] sm:$0xf0]  ;;  %v7379_v10 = vld [vmem:[#allocation5 + $0x21c] sm:$0xf0] }
  0x54   :  { %2334 = vmatpush.bf16.msra.mxu2 %v5739_v22  ;;  %2348 = vmatpush.bf16.msra.mxu3 %v6123_v26  ;;  %v5830_v22 = vld [vmem:[#allocation5 + $0x668] sm:$0xf]  ;;  %v5064_v26 = vld [vmem:[#allocation5 + $0x98] sm:$0xf0]  ;;  %v5646_v11 = vld [vmem:[#allocation5 + $0x4f0] sm:$0xf]  ;;  %v5315_v12 = vor.u32 %v7385_v4, %v5312_v5 }
  0x55   :  { %2300 = vmatmul.bf16.vlgmr.msrb.gmra.mxu3 %v8090_v60  ;;  %v5831_v31 = vor.u32 %v7522_v23, %v5830_v22  ;;  %v6030_v14 = vld [vmem:[#allocation5 + $0x7f0] sm:$0xf]  ;;  %v7571_v15 = vld [vmem:[#allocation5 + $0x81c] sm:$0xf0]  ;;  %v7373_v16 = vld [vmem:[#allocation5 + $0x1f4] sm:$0xf] }
  0x56   :  { %2307 = vmatpush.bf16.msra.mxu0 %v6071_v32  ;;  %v5782_v32 = vld [vmem:[#allocation5 + $0x608] sm:$0xf]  ;;  %v5264_v17 = vld [vmem:[#allocation5 + $0x220] sm:$0xf0]  ;;  %v7367_v22 = vld [vmem:[#allocation5 + $0x1bc] sm:$0xf0] }
  0x57   :  { %2321 = vmatpush.bf16.msra.mxu1 %v5307_v33  ;;  %v7510_v33 = vld [vmem:[#allocation5 + $0x634] sm:$0xf0]  ;;  %v5598_v23 = vld [vmem:[#allocation5 + $0x490] sm:$0xf]  ;;  %v7559_v27 = vld [vmem:[#allocation5 + $0x7bc] sm:$0xf0] }
  0x58   :  { %2335 = vmatpush.bf16.msra.mxu2 %v5691_v34  ;;  %2349 = vmatpush.bf16.msra.mxu3 %v6075_v38  ;;  %v5067_v34 = vor.u32 %v7324_v24, %v5064_v26  ;;  %v7408_v38 = vld [vmem:[#allocation5 + $0x30c] sm:$0xf]  ;;  %v5267_v24 = vor.u32 %v7373_v16, %v5264_v17  ;;  %v5982_v26 = vld [vmem:[#allocation5 + $0x790] sm:$0xf]  ;;  %v7361_v28 = vld [vmem:[#allocation5 + $0x194] sm:$0xf] }
  0x59   :  { %v5403_v51 = vor.u32 %v7408_v38, %v5400_v40  ;;  %v5216_v29 = vld [vmem:[#allocation5 + $0x1c0] sm:$0xf0]  ;;  %v5934_v38 = vld [vmem:[#allocation5 + $0x730] sm:$0xf]  ;;  %v7349_v40 = vld [vmem:[#allocation5 + $0x134] sm:$0xf] }
  0x5a   :  { %2308 = vmatpush.bf16.msra.mxu0 %v6023_v44  ;;  %v7403_v44 = vld [vmem:[#allocation5 + $0x2dc] sm:$0xf0]  ;;  %v5168_v41 = vld [vmem:[#allocation5 + $0x160] sm:$0xf0]  ;;  %v7337_v52 = vld [vmem:[#allocation5 + $0xd4] sm:$0xf] }
  0x5b   :  { %2322 = vmatpush.bf16.msra.mxu1 %v5259_v45  ;;  %v5742_v45 = vld [vmem:[#allocation5 + $0x5b0] sm:$0xf]  ;;  %v5359_v56 = vor.u32 %v7403_v44, %v5358_v43  ;;  %v5120_v53 = vld [vmem:[#allocation5 + $0x100] sm:$0xf0]  ;;  %v7493_v17 = vld [vmem:[#allocation5 + $0x5b4] sm:$0xf] }
  0x5c   :  { %2336 = vmatpush.bf16.msra.mxu2 %v5643_v46  ;;  %2350 = vmatpush.bf16.msra.mxu3 %v6027_v50  ;;  %v5783_v46 = vor.u32 %v7510_v33, %v5782_v32  ;;  %v5019_v50 = vor.u32 %v7312_v36, %v5016_v37  ;;  %v5983_v32 = vor.u32 %v7559_v27, %v5982_v26  ;;  %v5166_v33 = vld [vmem:[#allocation5 + $0x130] sm:$0xf]  ;;  %v7451_v37 = vld [vmem:[#allocation5 + $0x45c] sm:$0xf0]  ;;  %v5072_v4 = vld [vmem:[#allocation5 + $0xa0] sm:$0xf0] }
  0x5d   :  { %v5219_v36 = vor.u32 %v7361_v28, %v5216_v29  ;;  %v5024_v16 = vld [vmem:[#allocation5 + $0x40] sm:$0xf0]  ;;  %v5750_v26 = vld [vmem:[#allocation5 + $0x5b8] sm:$0xf]  ;;  %v7500_v27 = vld [vmem:[#allocation5 + $0x5e4] sm:$0xf0] }
  0x5e   :  { %2309 = vmatpush.bf16.msra.mxu0 %v5975_v57  ;;  %v5743_v57 = vor.u32 %v7499_v47, %v5742_v45  ;;  %v5118_v45 = vld [vmem:[#allocation5 + $0xd0] sm:$0xf]  ;;  %s8054_s0 = smov [#allocation8]   ;;  %s4978_s5 = sshll.u32 %s8533_s3, 4  ;;  %s4979_s5 = int_to_ptr.hbm [resolvable:$true] %s4978_s5 }
  0x5f   :  { %2323 = vmatpush.bf16.msra.mxu1 %v5211_v58  ;;  %v6127_v58 = vor.u32 %v7595_v49, %v6126_v48  ;;  %v5502_v47 = vld [vmem:[#allocation5 + $0x3d0] sm:$0xf]  ;;  %v5171_v48 = vor.u32 %v7349_v40, %v5168_v41  ;;  %v7439_v49 = vld [vmem:[#allocation5 + $0x3fc] sm:$0xf0]  ;;  %v7488_v40 = vld [vmem:[#allocation5 + $0x584] sm:$0xf0] }
  0x60   :  { %2337 = vmatpush.bf16.msra.mxu2 %v5595_v61  ;;  %2351 = vmatpush.bf16.msra.mxu3 %v5979_v1  ;;  %v5310_v61 = vld [vmem:[#allocation5 + $0x250] sm:$0xf]  ;;  %v7487_v1 = vld [vmem:[#allocation5 + $0x57c] sm:$0xf0]  ;;  %s4976_s2 = sshll.u32 %s8054_s0, 4  ;;  %s8055_s6 = smov 384   ;;  %s4977_s2 = int_to_ptr.vmem [resolvable:$true] %s4976_s2 }
  0x61   :  { %v5311_v6 = vor.u32 %v7391_v62, %v5310_v61  ;;  %v7331_v61 = vld [vmem:[#allocation5 + $0x9c] sm:$0xf0]  ;;  %v5454_v62 = vld [vmem:[#allocation5 + $0x370] sm:$0xf]  ;;  %s8056_s7 = smov 24  }
  0x62   :  { %2310 = vmatpush.bf16.msra.mxu0 %v5927_v7  ;;  %v5695_v7 = vor.u32 %v7487_v1, %v5694_v63  ;;  %v5123_v63 = vor.u32 %v7337_v52, %v5120_v53  ;;  %v5838_v1 = vld [vmem:[#allocation5 + $0x670] sm:$0xf]  ;;  %v7476_v52 = vld [vmem:[#allocation5 + $0x524] sm:$0xf0] }
  0x63   :  { %2324 = vmatpush.bf16.msra.mxu1 %v5163_v8  ;;  %v6079_v8 = vor.u32 %v7583_v3, %v6078_v2  ;;  %v7523_v2 = vld [vmem:[#allocation5 + $0x69c] sm:$0xf0]  ;;  %v7325_v3 = vld [vmem:[#allocation5 + $0x74] sm:$0xf] }
  0x64   :  { %2338 = vmatpush.bf16.msra.mxu2 %v5547_v9  ;;  %2352 = vmatpush.bf16.msra.mxu3 %v5931_v13  ;;  %v5262_v9 = vld [vmem:[#allocation5 + $0x1f0] sm:$0xf]  ;;  %v7475_v13 = vld [vmem:[#allocation5 + $0x51c] sm:$0xf0] }
  0x65   :  { %v5263_v18 = vor.u32 %v7379_v10, %v5262_v9  ;;  %v5839_v9 = vor.u32 %v7523_v2, %v5838_v1  ;;  %v5406_v10 = vld [vmem:[#allocation5 + $0x310] sm:$0xf]  ;;  %v7368_v1 = vld [vmem:[#allocation5 + $0x1c4] sm:$0xf0]  ;;  %v5606_v2 = vld [vmem:[#allocation5 + $0x498] sm:$0xf] }
  0x66   :  { %2311 = vmatpush.bf16.msra.mxu0 %v5879_v19  ;;  %v5647_v19 = vor.u32 %v7475_v13, %v5646_v11  ;;  %v7415_v11 = vld [vmem:[#allocation5 + $0x33c] sm:$0xf0]  ;;  %v5075_v13 = vor.u32 %v7325_v3, %v5072_v4  ;;  %v7464_v3 = vld [vmem:[#allocation5 + $0x4c4] sm:$0xf0] }
  0x67   :  { %2325 = vmatpush.bf16.msra.mxu1 %v5115_v20  ;;  %v6031_v20 = vor.u32 %v7571_v15, %v6030_v14  ;;  %v7511_v14 = vld [vmem:[#allocation5 + $0x63c] sm:$0xf0]  ;;  %v7313_v15 = vld [vmem:[#allocation5 + $0x14] sm:$0xf] }
  0x68   :  { %2339 = vmatpush.bf16.msra.mxu2 %v5499_v21  ;;  %2353 = vmatpush.bf16.msra.mxu3 %v5883_v25  ;;  %v5214_v21 = vld [vmem:[#allocation5 + $0x190] sm:$0xf]  ;;  %v7463_v25 = vld [vmem:[#allocation5 + $0x4bc] sm:$0xf0]  ;;  %v5027_v28 = vor.u32 %v7313_v15, %v5024_v16  ;;  %v7452_v15 = vld [vmem:[#allocation5 + $0x464] sm:$0xf0] }
  0x69   :  { %v5215_v30 = vor.u32 %v7367_v22, %v5214_v21  ;;  %v6128_v21 = vld [vmem:[#allocation5 + $0x8e0] sm:$0xf0]  ;;  %v5366_v22 = vld [vmem:[#allocation5 + $0x2b8] sm:$0xf] }
  0x6a   :  { %2312 = vmatpush.bf16.msra.mxu0 %v5831_v31  ;;  %v5599_v31 = vor.u32 %v7463_v25, %v5598_v23  ;;  %v7404_v23 = vld [vmem:[#allocation5 + $0x2e4] sm:$0xf0] }
  0x6b   :  { %2326 = vmatpush.bf16.msra.mxu1 %v5067_v34  ;;  %v7355_v34 = vld [vmem:[#allocation5 + $0x15c] sm:$0xf0] }
  0x6c   :  { %2340 = vmatpush.bf16.msra.mxu2 %v5451_v35  ;;  %2354 = vmatpush.bf16.msra.mxu3 %v5835_v39  ;;  %v5550_v35 = vld [vmem:[#allocation5 + $0x430] sm:$0xf]  ;;  %v7547_v39 = vld [vmem:[#allocation5 + $0x75c] sm:$0xf0]  ;;  %v5167_v42 = vor.u32 %v7355_v34, %v5166_v33  ;;  %v5696_v33 = vld [vmem:[#allocation5 + $0x580] sm:$0xf0] }
  0x6d   :  { %v5551_v43 = vor.u32 %v7451_v37, %v5550_v35  ;;  %v5935_v44 = vor.u32 %v7547_v39, %v5934_v38  ;;  %v7577_v34 = vld [vmem:[#allocation5 + $0x854] sm:$0xf]  ;;  %v5751_v35 = vor.u32 %v7500_v27, %v5750_v26  ;;  %v5318_v37 = vld [vmem:[#allocation5 + $0x258] sm:$0xf]  ;;  %v7392_v38 = vld [vmem:[#allocation5 + $0x284] sm:$0xf0] }
  0x6e   :  { %2313 = vmatpush.bf16.msra.mxu0 %v5783_v46  ;;  %v7343_v46 = vld [vmem:[#allocation5 + $0xfc] sm:$0xf0]  ;;  %v5702_v39 = vld [vmem:[#allocation5 + $0x558] sm:$0xf]  ;;  %v7440_v27 = vld [vmem:[#allocation5 + $0x404] sm:$0xf0] }
  0x6f   :  { %2327 = vmatpush.bf16.msra.mxu1 %v5019_v50  ;;  %v5886_v50 = vld [vmem:[#allocation5 + $0x6d0] sm:$0xf]  ;;  %v5510_v26 = vld [vmem:[#allocation5 + $0x3d8] sm:$0xf] }
  0x70   :  { %2341 = vmatpush.bf16.msra.mxu2 %v5403_v51  ;;  %2355 = vmatpush.bf16.msra.mxu3 %v5787_v54  ;;  %v7535_v51 = vld [vmem:[#allocation5 + $0x6fc] sm:$0xf0]  ;;  %v5119_v54 = vor.u32 %v7343_v46, %v5118_v45  ;;  %v5648_v45 = vld [vmem:[#allocation5 + $0x520] sm:$0xf0]  ;;  %v7565_v46 = vld [vmem:[#allocation5 + $0x7f4] sm:$0xf] }
  0x71   :  { %2314 = vmatmul.bf16.vlgmr.msra.gmra.mxu0 %v8086_v55 }
  0x72   :  { %2362 = vmatpush.bf16.msrb.mxu0 %v5359_v56  ;;  %2328 = vmatmul.bf16.vlgmr.msra.gmra.mxu1 %v8088_v59  ;;  %v5503_v56 = vor.u32 %v7439_v49, %v5502_v47  ;;  %v5703_v47 = vor.u32 %v7488_v40, %v5702_v39  ;;  %v5270_v49 = vld [vmem:[#allocation5 + $0x1f8] sm:$0xf]  ;;  %v7428_v39 = vld [vmem:[#allocation5 + $0x3a4] sm:$0xf0] }
  0x73   :  { %2376 = vmatpush.bf16.msrb.mxu1 %v5743_v57  ;;  %2342 = vmatmul.bf16.vlgmr.msra.gmra.mxu2 %v8090_v60  ;;  %v5887_v57 = vor.u32 %v7535_v51, %v5886_v50  ;;  %v7380_v50 = vld [vmem:[#allocation5 + $0x224] sm:$0xf0]  ;;  %v5654_v51 = vld [vmem:[#allocation5 + $0x4f8] sm:$0xf] }
  0x74   :  { %2390 = vmatpush.bf16.msrb.mxu2 %v6127_v58  ;;  %2404 = vmatpush.bf16.msrb.mxu3 %v5363_v0  ;;  %v5070_v58 = vld [vmem:[#allocation5 + $0x70] sm:$0xf]  ;;  %v7427_v0 = vld [vmem:[#allocation5 + $0x39c] sm:$0xf0] }
  0x75   :  { %2356 = vmatmul.bf16.vlgmr.msra.gmra.mxu3 %v8086_v55  ;;  %v5071_v5 = vor.u32 %v7331_v61, %v5070_v58  ;;  %v5600_v58 = vld [vmem:[#allocation5 + $0x4c0] sm:$0xf0]  ;;  %v7553_v61 = vld [vmem:[#allocation5 + $0x794] sm:$0xf] }
  0x76   :  { %2363 = vmatpush.bf16.msrb.mxu0 %v5311_v6  ;;  %v5022_v6 = vld [vmem:[#allocation5 + $0x10] sm:$0xf] }
  0x77   :  { %2377 = vmatpush.bf16.msrb.mxu1 %v5695_v7  ;;  %v7319_v7 = vld [vmem:[#allocation5 + $0x3c] sm:$0xf0] }
  0x78   :  { %2391 = vmatpush.bf16.msrb.mxu2 %v6079_v8  ;;  %2405 = vmatpush.bf16.msrb.mxu3 %v5315_v12  ;;  %v5455_v8 = vor.u32 %v7427_v0, %v5454_v62  ;;  %v5790_v12 = vld [vmem:[#allocation5 + $0x610] sm:$0xf]  ;;  %v5655_v62 = vor.u32 %v7476_v52, %v5654_v51  ;;  %v5222_v0 = vld [vmem:[#allocation5 + $0x198] sm:$0xf]  ;;  %v7416_v51 = vld [vmem:[#allocation5 + $0x344] sm:$0xf0] }
  0x79   :  { %v5791_v25 = vor.u32 %v7511_v14, %v5790_v12  ;;  %v5174_v12 = vld [vmem:[#allocation5 + $0x138] sm:$0xf] }
  0x7a   :  { %2364 = vmatpush.bf16.msrb.mxu0 %v5263_v18  ;;  %v5744_v18 = vld [vmem:[#allocation5 + $0x5e0] sm:$0xf0]  ;;  %v5558_v14 = vld [vmem:[#allocation5 + $0x438] sm:$0xf] }
  0x7b   :  { %2378 = vmatpush.bf16.msrb.mxu1 %v5647_v19  ;;  %v7589_v19 = vld [vmem:[#allocation5 + $0x8b4] sm:$0xf]  ;;  %v5747_v29 = vor.u32 %v7493_v17, %v5744_v18  ;;  %v6134_v52 = vld [vmem:[#allocation5 + $0x8b8] sm:$0xf] }
  0x7c   :  { %2392 = vmatpush.bf16.msrb.mxu2 %v6031_v20  ;;  %2406 = vmatpush.bf16.msrb.mxu3 %v5267_v24  ;;  %v5023_v20 = vor.u32 %v7319_v7, %v5022_v6  ;;  %v5407_v24 = vor.u32 %v7415_v11, %v5406_v10  ;;  %v5223_v6 = vor.u32 %v7368_v1, %v5222_v0  ;;  %v7445_v7 = vld [vmem:[#allocation5 + $0x434] sm:$0xf]  ;;  %v5936_v11 = vld [vmem:[#allocation5 + $0x760] sm:$0xf0]  ;;  %v7590_v0 = vld [vmem:[#allocation5 + $0x8bc] sm:$0xf] }
  0x7d   :  { %v5607_v10 = vor.u32 %v7464_v3, %v5606_v2  ;;  %v6136_v1 = vld [vmem:[#allocation5 + $0x8e8] sm:$0xf0] }
  0x7e   :  { %2365 = vmatpush.bf16.msrb.mxu0 %v5215_v30  ;;  %v6131_v30 = vor.u32 %v7589_v19, %v6128_v21  ;;  %v7433_v19 = vld [vmem:[#allocation5 + $0x3d4] sm:$0xf] }
  0x7f   :  { %2379 = vmatpush.bf16.msrb.mxu1 %v5599_v31  ;;  %v5367_v31 = vor.u32 %v7404_v23, %v5366_v22  ;;  %v7529_v21 = vld [vmem:[#allocation5 + $0x6d4] sm:$0xf]  ;;  %v5559_v22 = vor.u32 %v7452_v15, %v5558_v14  ;;  %v5888_v23 = vld [vmem:[#allocation5 + $0x700] sm:$0xf0]  ;;  %v6088_v14 = vld [vmem:[#allocation5 + $0x888] sm:$0xf0] }
  0x80   :  { %2393 = vmatpush.bf16.msrb.mxu2 %v5983_v32  ;;  %2407 = vmatpush.bf16.msrb.mxu3 %v5219_v36  ;;  %v7481_v32 = vld [vmem:[#allocation5 + $0x554] sm:$0xf]  ;;  %v6080_v36 = vld [vmem:[#allocation5 + $0x880] sm:$0xf0] }
  0x81   :  { %v5699_v41 = vor.u32 %v7481_v32, %v5696_v33  ;;  %v5456_v32 = vld [vmem:[#allocation5 + $0x3a0] sm:$0xf0]  ;;  %v7517_v33 = vld [vmem:[#allocation5 + $0x674] sm:$0xf] }
  0x82   :  { %2366 = vmatpush.bf16.msrb.mxu0 %v5167_v42  ;;  %v6083_v42 = vor.u32 %v7577_v34, %v6080_v36  ;;  %v5511_v34 = vor.u32 %v7440_v27, %v5510_v26  ;;  %v5078_v36 = vld [vmem:[#allocation5 + $0x78] sm:$0xf]  ;;  %v6040_v26 = vld [vmem:[#allocation5 + $0x828] sm:$0xf0] }
  0x83   :  { %2380 = vmatpush.bf16.msrb.mxu1 %v5551_v43  ;;  %v5319_v43 = vor.u32 %v7392_v38, %v5318_v37  ;;  %v7332_v37 = vld [vmem:[#allocation5 + $0xa4] sm:$0xf0]  ;;  %v5462_v38 = vld [vmem:[#allocation5 + $0x378] sm:$0xf] }
  0x84   :  { %2394 = vmatpush.bf16.msrb.mxu2 %v5935_v44  ;;  %2408 = vmatpush.bf16.msrb.mxu3 %v5171_v48  ;;  %v7469_v44 = vld [vmem:[#allocation5 + $0x4f4] sm:$0xf]  ;;  %v6032_v48 = vld [vmem:[#allocation5 + $0x820] sm:$0xf0] }
  0x85   :  { %v5651_v53 = vor.u32 %v7469_v44, %v5648_v45  ;;  %v5079_v44 = vor.u32 %v7332_v37, %v5078_v36  ;;  %v7505_v45 = vld [vmem:[#allocation5 + $0x614] sm:$0xf]  ;;  %v5608_v36 = vld [vmem:[#allocation5 + $0x4c8] sm:$0xf0]  ;;  %v7554_v37 = vld [vmem:[#allocation5 + $0x79c] sm:$0xf] }
  0x86   :  { %2367 = vmatpush.bf16.msrb.mxu0 %v5119_v54  ;;  %v6035_v54 = vor.u32 %v7565_v46, %v6032_v48  ;;  %v5792_v46 = vld [vmem:[#allocation5 + $0x640] sm:$0xf0]  ;;  %v5463_v48 = vor.u32 %v7428_v39, %v5462_v38  ;;  %v5992_v38 = vld [vmem:[#allocation5 + $0x7c8] sm:$0xf0] }
  0x87   :  { %2381 = vmatpush.bf16.msrb.mxu1 %v5503_v56  ;;  %v5271_v56 = vor.u32 %v7380_v50, %v5270_v49  ;;  %v7320_v49 = vld [vmem:[#allocation5 + $0x44] sm:$0xf0]  ;;  %v5414_v50 = vld [vmem:[#allocation5 + $0x318] sm:$0xf] }
  0x88   :  { %2395 = vmatpush.bf16.msrb.mxu2 %v5887_v57  ;;  %2409 = vmatpush.bf16.msrb.mxu3 %v5123_v63  ;;  %v7457_v57 = vld [vmem:[#allocation5 + $0x494] sm:$0xf]  ;;  %v5984_v63 = vld [vmem:[#allocation5 + $0x7c0] sm:$0xf0]  ;;  %v5415_v2 = vor.u32 %v7416_v51, %v5414_v50  ;;  %v5944_v50 = vld [vmem:[#allocation5 + $0x768] sm:$0xf0] }
  0x89   :  { %v5603_v4 = vor.u32 %v7457_v57, %v5600_v58  ;;  %v5368_v57 = vld [vmem:[#allocation5 + $0x2e8] sm:$0xf0]  ;;  %v7494_v58 = vld [vmem:[#allocation5 + $0x5bc] sm:$0xf] }
  0x8a   :  { %2368 = vmatpush.bf16.msrb.mxu0 %v5071_v5  ;;  %v5987_v5 = vor.u32 %v7553_v61, %v5984_v63  ;;  %v5752_v61 = vld [vmem:[#allocation5 + $0x5e8] sm:$0xf0] }
  0x8b   :  { %2382 = vmatpush.bf16.msrb.mxu1 %v5455_v8  ;;  %v5552_v8 = vld [vmem:[#allocation5 + $0x460] sm:$0xf0] }
  0x8c   :  { %2396 = vmatpush.bf16.msrb.mxu2 %v5839_v9  ;;  %2410 = vmatpush.bf16.msrb.mxu3 %v5075_v13  ;;  %v7541_v9 = vld [vmem:[#allocation5 + $0x734] sm:$0xf]  ;;  %v7356_v13 = vld [vmem:[#allocation5 + $0x164] sm:$0xf0]  ;;  %v5555_v16 = vor.u32 %v7445_v7, %v5552_v8  ;;  %v7386_v8 = vld [vmem:[#allocation5 + $0x25c] sm:$0xf] }
  0x8d   :  { %v5939_v17 = vor.u32 %v7541_v9, %v5936_v11  ;;  %v5175_v18 = vor.u32 %v7356_v13, %v5174_v12  ;;  %v7584_v7 = vld [vmem:[#allocation5 + $0x884] sm:$0xf0]  ;;  %v6139_v9 = vor.u32 %v7590_v0, %v6136_v1  ;;  %v7482_v11 = vld [vmem:[#allocation5 + $0x55c] sm:$0xf]  ;;  %v5704_v12 = vld [vmem:[#allocation5 + $0x588] sm:$0xf0] }
  0x8e   :  { %2369 = vmatpush.bf16.msrb.mxu0 %v5023_v20  ;;  %v5504_v20 = vld [vmem:[#allocation5 + $0x400] sm:$0xf0]  ;;  %v7578_v13 = vld [vmem:[#allocation5 + $0x85c] sm:$0xf]  ;;  %v5896_v1 = vld [vmem:[#allocation5 + $0x708] sm:$0xf0] }
  0x8f   :  { %2383 = vmatpush.bf16.msrb.mxu1 %v5407_v24  ;;  %v5126_v24 = vld [vmem:[#allocation5 + $0xd8] sm:$0xf]  ;;  %v7530_v0 = vld [vmem:[#allocation5 + $0x6dc] sm:$0xf] }
  0x90   :  { %2397 = vmatpush.bf16.msrb.mxu2 %v5791_v25  ;;  %2411 = vmatpush.bf16.msrb.mxu3 %v5027_v28  ;;  %v7344_v25 = vld [vmem:[#allocation5 + $0x104] sm:$0xf0]  ;;  %v5507_v28 = vor.u32 %v7433_v19, %v5504_v20  ;;  %v7374_v20 = vld [vmem:[#allocation5 + $0x1fc] sm:$0xf] }
  0x91   :  { %2370 = vmatmul.bf16.vlgmr.msrb.gmra.mxu0 %v8088_v59  ;;  %v7572_v19 = vld [vmem:[#allocation5 + $0x824] sm:$0xf0] }
  0x92   :  { %2418 = vmatpush.bf16.msra.mxu0 %v5747_v29  ;;  %2384 = vmatmul.bf16.vlgmr.msrb.gmra.mxu1 %v8090_v60  ;;  %v5891_v29 = vor.u32 %v7529_v21, %v5888_v23  ;;  %v6091_v21 = vor.u32 %v7578_v13, %v6088_v14  ;;  %v7470_v23 = vld [vmem:[#allocation5 + $0x4fc] sm:$0xf]  ;;  %v5848_v13 = vld [vmem:[#allocation5 + $0x6a8] sm:$0xf0] }
  0x93   :  { %2432 = vmatpush.bf16.msra.mxu1 %v6131_v30  ;;  %2398 = vmatmul.bf16.vlgmr.msrb.gmra.mxu2 %v8086_v55  ;;  %v5127_v30 = vor.u32 %v7344_v25, %v5126_v24  ;;  %v5656_v24 = vld [vmem:[#allocation5 + $0x528] sm:$0xf0]  ;;  %v7566_v25 = vld [vmem:[#allocation5 + $0x7fc] sm:$0xf] }
  0x94   :  { %2446 = vmatpush.bf16.msra.mxu2 %v5367_v31  ;;  %2460 = vmatpush.bf16.msra.mxu3 %v5751_v35  ;;  %v7421_v31 = vld [vmem:[#allocation5 + $0x374] sm:$0xf]  ;;  %v5840_v35 = vld [vmem:[#allocation5 + $0x6a0] sm:$0xf0] }
  0x95   :  { %2412 = vmatmul.bf16.vlgmr.msrb.gmra.mxu3 %v8088_v59  ;;  %v5459_v40 = vor.u32 %v7421_v31, %v5456_v32  ;;  %v7560_v31 = vld [vmem:[#allocation5 + $0x7c4] sm:$0xf0]  ;;  %v7362_v32 = vld [vmem:[#allocation5 + $0x19c] sm:$0xf] }
  0x96   :  { %2419 = vmatpush.bf16.msra.mxu0 %v5699_v41  ;;  %v7409_v41 = vld [vmem:[#allocation5 + $0x314] sm:$0xf] }
  0x97   :  { %2433 = vmatpush.bf16.msra.mxu1 %v6083_v42  ;;  %v5408_v42 = vld [vmem:[#allocation5 + $0x340] sm:$0xf0] }
  0x98   :  { %2447 = vmatpush.bf16.msra.mxu2 %v5319_v43  ;;  %2461 = vmatpush.bf16.msra.mxu3 %v5703_v47  ;;  %v5843_v43 = vor.u32 %v7517_v33, %v5840_v35  ;;  %v5030_v47 = vld [vmem:[#allocation5 + $0x18] sm:$0xf]  ;;  %v6043_v33 = vor.u32 %v7566_v25, %v6040_v26  ;;  %v7458_v35 = vld [vmem:[#allocation5 + $0x49c] sm:$0xf]  ;;  %v5800_v25 = vld [vmem:[#allocation5 + $0x648] sm:$0xf0] }
  0x99   :  { %v5031_v63 = vor.u32 %v7320_v49, %v5030_v47  ;;  %v7446_v47 = vld [vmem:[#allocation5 + $0x43c] sm:$0xf]  ;;  %v5374_v26 = vld [vmem:[#allocation5 + $0x2c0] sm:$0xf] }
  0x9a   :  { %2420 = vmatpush.bf16.msra.mxu0 %v5651_v53  ;;  %v7596_v53 = vld [vmem:[#allocation5 + $0x8e4] sm:$0xf0]  ;;  %v7542_v49 = vld [vmem:[#allocation5 + $0x73c] sm:$0xf] }
  0x9b   :  { %2434 = vmatpush.bf16.msra.mxu1 %v6035_v54  ;;  %v7398_v54 = vld [vmem:[#allocation5 + $0x2bc] sm:$0xf]  ;;  %v6135_v3 = vor.u32 %v7596_v53, %v6134_v52 }
  0x9c   :  { %2448 = vmatpush.bf16.msra.mxu2 %v5271_v56  ;;  %2462 = vmatpush.bf16.msra.mxu3 %v5655_v62  ;;  %v5411_v56 = vor.u32 %v7409_v41, %v5408_v42  ;;  %v5795_v62 = vor.u32 %v7505_v45, %v5792_v46  ;;  %v5611_v41 = vor.u32 %v7458_v35, %v5608_v36  ;;  %v5942_v42 = vld [vmem:[#allocation5 + $0x738] sm:$0xf]  ;;  %v5176_v46 = vld [vmem:[#allocation5 + $0x168] sm:$0xf0]  ;;  %v7399_v35 = vld [vmem:[#allocation5 + $0x2c4] sm:$0xf] }
  0x9d   :  { %v5995_v45 = vor.u32 %v7554_v37, %v5992_v38  ;;  %v5376_v36 = vld [vmem:[#allocation5 + $0x2f0] sm:$0xf0] }
  0x9e   :  { %2421 = vmatpush.bf16.msra.mxu0 %v5603_v4  ;;  %v5371_v4 = vor.u32 %v7398_v54, %v5368_v57  ;;  %v5894_v54 = vld [vmem:[#allocation5 + $0x6d8] sm:$0xf]  ;;  %v7338_v57 = vld [vmem:[#allocation5 + $0xdc] sm:$0xf] }
  0x9f   :  { %2435 = vmatpush.bf16.msra.mxu1 %v5987_v5  ;;  %v5755_v5 = vor.u32 %v7494_v58, %v5752_v61  ;;  %v5947_v58 = vor.u32 %v7542_v49, %v5944_v50  ;;  %v5128_v61 = vld [vmem:[#allocation5 + $0x108] sm:$0xf0]  ;;  %v5328_v49 = vld [vmem:[#allocation5 + $0x290] sm:$0xf0] }
  0xa0   :  { %2449 = vmatpush.bf16.msra.mxu2 %v5223_v6  ;;  %2463 = vmatpush.bf16.msra.mxu3 %v5607_v10  ;;  %v6086_v6 = vld [vmem:[#allocation5 + $0x858] sm:$0xf]  ;;  %v5320_v10 = vld [vmem:[#allocation5 + $0x288] sm:$0xf0] }
  0xa1   :  { %v6087_v15 = vor.u32 %v7584_v7, %v6086_v6  ;;  %v7524_v6 = vld [vmem:[#allocation5 + $0x6a4] sm:$0xf0]  ;;  %v7326_v7 = vld [vmem:[#allocation5 + $0x7c] sm:$0xf] }
  0xa2   :  { %2422 = vmatpush.bf16.msra.mxu0 %v5555_v16  ;;  %v5323_v16 = vor.u32 %v7386_v8, %v5320_v10  ;;  %v5899_v8 = vor.u32 %v7530_v0, %v5896_v1  ;;  %v7422_v10 = vld [vmem:[#allocation5 + $0x37c] sm:$0xf]  ;;  %v5280_v0 = vld [vmem:[#allocation5 + $0x230] sm:$0xf0] }
  0xa3   :  { %2436 = vmatpush.bf16.msra.mxu1 %v5939_v17  ;;  %v5707_v17 = vor.u32 %v7482_v11, %v5704_v12  ;;  %v5464_v11 = vld [vmem:[#allocation5 + $0x3a8] sm:$0xf0]  ;;  %v7518_v12 = vld [vmem:[#allocation5 + $0x67c] sm:$0xf] }
  0xa4   :  { %2450 = vmatpush.bf16.msra.mxu2 %v5175_v18  ;;  %2464 = vmatpush.bf16.msra.mxu3 %v5559_v22  ;;  %v6038_v18 = vld [vmem:[#allocation5 + $0x7f8] sm:$0xf]  ;;  %v5272_v22 = vld [vmem:[#allocation5 + $0x228] sm:$0xf0] }
  0xa5   :  { %v6039_v27 = vor.u32 %v7572_v19, %v6038_v18  ;;  %v5467_v18 = vor.u32 %v7422_v10, %v5464_v11  ;;  %v7314_v19 = vld [vmem:[#allocation5 + $0x1c] sm:$0xf]  ;;  %v7561_v10 = vld [vmem:[#allocation5 + $0x7cc] sm:$0xf0]  ;;  %v7363_v11 = vld [vmem:[#allocation5 + $0x1a4] sm:$0xf] }
  0xa6   :  { %2423 = vmatpush.bf16.msra.mxu0 %v5507_v28  ;;  %v5275_v28 = vor.u32 %v7374_v20, %v5272_v22  ;;  %v5032_v20 = vld [vmem:[#allocation5 + $0x48] sm:$0xf0]  ;;  %v5851_v22 = vor.u32 %v7518_v12, %v5848_v13  ;;  %v5232_v12 = vld [vmem:[#allocation5 + $0x1d0] sm:$0xf0] }
  0xa7   :  { %2437 = vmatpush.bf16.msra.mxu1 %v5891_v29  ;;  %v5659_v29 = vor.u32 %v7470_v23, %v5656_v24  ;;  %v5416_v23 = vld [vmem:[#allocation5 + $0x348] sm:$0xf0]  ;;  %v7506_v24 = vld [vmem:[#allocation5 + $0x61c] sm:$0xf] }
  0xa8   :  { %2451 = vmatpush.bf16.msra.mxu2 %v5127_v30  ;;  %2465 = vmatpush.bf16.msra.mxu3 %v5511_v34  ;;  %v5990_v30 = vld [vmem:[#allocation5 + $0x798] sm:$0xf]  ;;  %v5224_v34 = vld [vmem:[#allocation5 + $0x1c8] sm:$0xf0]  ;;  %v5803_v37 = vor.u32 %v7506_v24, %v5800_v25  ;;  %v5184_v24 = vld [vmem:[#allocation5 + $0x170] sm:$0xf0] }
  0xa9   :  { %v5991_v39 = vor.u32 %v7560_v31, %v5990_v30  ;;  %v7501_v30 = vld [vmem:[#allocation5 + $0x5ec] sm:$0xf0]  ;;  %v6142_v31 = vld [vmem:[#allocation5 + $0x8c0] sm:$0xf] }
  0xaa   :  { %2424 = vmatpush.bf16.msra.mxu0 %v5459_v40  ;;  %v5227_v40 = vor.u32 %v7362_v32, %v5224_v34  ;;  %v7597_v32 = vld [vmem:[#allocation5 + $0x8ec] sm:$0xf0] }
  0xab   :  { %2438 = vmatpush.bf16.msra.mxu1 %v5843_v43  ;;  %v7548_v43 = vld [vmem:[#allocation5 + $0x764] sm:$0xf0] }
  0xac   :  { %2452 = vmatpush.bf16.msra.mxu2 %v5079_v44  ;;  %2466 = vmatpush.bf16.msra.mxu3 %v5463_v48  ;;  %v7350_v44 = vld [vmem:[#allocation5 + $0x13c] sm:$0xf]  ;;  %v5560_v48 = vld [vmem:[#allocation5 + $0x468] sm:$0xf0]  ;;  %v5943_v51 = vor.u32 %v7548_v43, %v5942_v42  ;;  %v7393_v42 = vld [vmem:[#allocation5 + $0x28c] sm:$0xf0] }
  0xad   :  { %v5179_v52 = vor.u32 %v7350_v44, %v5176_v46  ;;  %v5563_v53 = vor.u32 %v7446_v47, %v5560_v48  ;;  %v5710_v43 = vld [vmem:[#allocation5 + $0x560] sm:$0xf]  ;;  %v5379_v44 = vor.u32 %v7399_v35, %v5376_v36  ;;  %v7585_v47 = vld [vmem:[#allocation5 + $0x88c] sm:$0xf0]  ;;  %v7387_v48 = vld [vmem:[#allocation5 + $0x264] sm:$0xf] }
  0xae   :  { %2425 = vmatpush.bf16.msra.mxu0 %v5411_v56  ;;  %v7536_v56 = vld [vmem:[#allocation5 + $0x704] sm:$0xf0]  ;;  %v6094_v46 = vld [vmem:[#allocation5 + $0x860] sm:$0xf]  ;;  %v7339_v35 = vld [vmem:[#allocation5 + $0xe4] sm:$0xf] }
  0xaf   :  { %2439 = vmatpush.bf16.msra.mxu1 %v5795_v62  ;;  %v7434_v62 = vld [vmem:[#allocation5 + $0x3dc] sm:$0xf]  ;;  %v5136_v36 = vld [vmem:[#allocation5 + $0x110] sm:$0xf0] }
  0xb0   :  { %2453 = vmatpush.bf16.msra.mxu2 %v5031_v63  ;;  %2467 = vmatpush.bf16.msra.mxu3 %v5415_v2  ;;  %v5512_v63 = vld [vmem:[#allocation5 + $0x408] sm:$0xf0]  ;;  %v5895_v2 = vor.u32 %v7536_v56, %v5894_v54  ;;  %v7381_v54 = vld [vmem:[#allocation5 + $0x22c] sm:$0xf0]  ;;  %v5662_v56 = vld [vmem:[#allocation5 + $0x500] sm:$0xf] }
  0xb1   :  { %2426 = vmatmul.bf16.vlgmr.msra.gmra.mxu0 %v8090_v60 }
  0xb2   :  { %2474 = vmatpush.bf16.msrb.mxu0 %v6135_v3  ;;  %2440 = vmatmul.bf16.vlgmr.msra.gmra.mxu1 %v8086_v55  ;;  %v5131_v3 = vor.u32 %v7338_v57, %v5128_v61  ;;  %v5331_v57 = vor.u32 %v7387_v48, %v5328_v49  ;;  %v6046_v61 = vld [vmem:[#allocation5 + $0x800] sm:$0xf]  ;;  %v5088_v48 = vld [vmem:[#allocation5 + $0xb0] sm:$0xf0] }
  0xb3   :  { %2488 = vmatpush.bf16.msrb.mxu1 %v5371_v4  ;;  %2454 = vmatmul.bf16.vlgmr.msra.gmra.mxu2 %v8088_v59  ;;  %v5515_v4 = vor.u32 %v7434_v62, %v5512_v63  ;;  %v7573_v62 = vld [vmem:[#allocation5 + $0x82c] sm:$0xf0]  ;;  %v7375_v63 = vld [vmem:[#allocation5 + $0x204] sm:$0xf] }
  0xb4   :  { %2502 = vmatpush.bf16.msrb.mxu2 %v5755_v5  ;;  %2516 = vmatpush.bf16.msrb.mxu3 %v6139_v9  ;;  %v5846_v5 = vld [vmem:[#allocation5 + $0x678] sm:$0xf]  ;;  %v5080_v9 = vld [vmem:[#allocation5 + $0xa8] sm:$0xf0] }
  0xb5   :  { %2468 = vmatmul.bf16.vlgmr.msra.gmra.mxu3 %v8090_v60  ;;  %v5847_v14 = vor.u32 %v7524_v6, %v5846_v5  ;;  %v7369_v5 = vld [vmem:[#allocation5 + $0x1cc] sm:$0xf0]  ;;  %v5614_v6 = vld [vmem:[#allocation5 + $0x4a0] sm:$0xf] }
  0xb6   :  { %2475 = vmatpush.bf16.msrb.mxu0 %v6087_v15  ;;  %v5798_v15 = vld [vmem:[#allocation5 + $0x618] sm:$0xf] }
  0xb7   :  { %2489 = vmatpush.bf16.msrb.mxu1 %v5323_v16  ;;  %v7512_v16 = vld [vmem:[#allocation5 + $0x644] sm:$0xf0] }
  0xb8   :  { %2503 = vmatpush.bf16.msrb.mxu2 %v5707_v17  ;;  %2517 = vmatpush.bf16.msrb.mxu3 %v6091_v21  ;;  %v5083_v17 = vor.u32 %v7326_v7, %v5080_v9  ;;  %v7410_v21 = vld [vmem:[#allocation5 + $0x31c] sm:$0xf]  ;;  %v5283_v7 = vor.u32 %v7375_v63, %v5280_v0  ;;  %v5998_v9 = vld [vmem:[#allocation5 + $0x7a0] sm:$0xf]  ;;  %v5040_v63 = vld [vmem:[#allocation5 + $0x50] sm:$0xf0]  ;;  %v8116_v0 = vpop.f32.mrf.mxu2 }
  0xb9   :  { %v5419_v34 = vor.u32 %v7410_v21, %v5416_v23  ;;  %v5950_v21 = vld [vmem:[#allocation5 + $0x740] sm:$0xf]  ;;  %v7351_v23 = vld [vmem:[#allocation5 + $0x144] sm:$0xf] }
  0xba   :  { %2476 = vmatpush.bf16.msrb.mxu0 %v6039_v27  ;;  %v7405_v27 = vld [vmem:[#allocation5 + $0x2ec] sm:$0xf0] }
  0xbb   :  { %2490 = vmatpush.bf16.msrb.mxu1 %v5275_v28  ;;  %v5758_v28 = vld [vmem:[#allocation5 + $0x5c0] sm:$0xf]  ;;  %v5375_v38 = vor.u32 %v7405_v27, %v5374_v26 }
  0xbc   :  { %2504 = vmatpush.bf16.msrb.mxu2 %v5659_v29  ;;  %2518 = vmatpush.bf16.msrb.mxu3 %v6043_v33  ;;  %v5799_v29 = vor.u32 %v7512_v16, %v5798_v15  ;;  %v5035_v33 = vor.u32 %v7314_v19, %v5032_v20  ;;  %v5999_v15 = vor.u32 %v7561_v10, %v5998_v9  ;;  %v5182_v16 = vld [vmem:[#allocation5 + $0x140] sm:$0xf]  ;;  %v7453_v20 = vld [vmem:[#allocation5 + $0x46c] sm:$0xf0]  ;;  %v8120_v9 = vpop.f32.mrf.mxu1 }
  0xbd   :  { %v5235_v19 = vor.u32 %v7363_v11, %v5232_v12  ;;  %v5766_v12 = vld [vmem:[#allocation5 + $0x5c8] sm:$0xf] }
  0xbe   :  { %2477 = vmatpush.bf16.msrb.mxu0 %v5991_v39  ;;  %v5759_v39 = vor.u32 %v7501_v30, %v5758_v28  ;;  %v5134_v28 = vld [vmem:[#allocation5 + $0xe0] sm:$0xf] }
  0xbf   :  { %2491 = vmatpush.bf16.msrb.mxu1 %v5227_v40  ;;  %v6143_v40 = vor.u32 %v7597_v32, %v6142_v31  ;;  %v5518_v30 = vld [vmem:[#allocation5 + $0x3e0] sm:$0xf]  ;;  %v5187_v31 = vor.u32 %v7351_v23, %v5184_v24  ;;  %v7441_v32 = vld [vmem:[#allocation5 + $0x40c] sm:$0xf0]  ;;  %v6096_v23 = vld [vmem:[#allocation5 + $0x890] sm:$0xf0] }
  0xc0   :  { %2505 = vmatpush.bf16.msrb.mxu2 %v5611_v41  ;;  %2519 = vmatpush.bf16.msrb.mxu3 %v5995_v45  ;;  %v5326_v41 = vld [vmem:[#allocation5 + $0x260] sm:$0xf]  ;;  %v7489_v45 = vld [vmem:[#allocation5 + $0x58c] sm:$0xf0]  ;;  %v5334_v24 = vld [vmem:[#allocation5 + $0x268] sm:$0xf] }
  0xc1   :  { %v5327_v50 = vor.u32 %v7393_v42, %v5326_v41  ;;  %v7333_v41 = vld [vmem:[#allocation5 + $0xac] sm:$0xf0]  ;;  %v5470_v42 = vld [vmem:[#allocation5 + $0x380] sm:$0xf] }
  0xc2   :  { %2478 = vmatpush.bf16.msrb.mxu0 %v5943_v51  ;;  %v5711_v51 = vor.u32 %v7489_v45, %v5710_v43  ;;  %v5139_v43 = vor.u32 %v7339_v35, %v5136_v36  ;;  %v5854_v45 = vld [vmem:[#allocation5 + $0x680] sm:$0xf]  ;;  %v6048_v35 = vld [vmem:[#allocation5 + $0x830] sm:$0xf0]  ;;  %v5286_v36 = vld [vmem:[#allocation5 + $0x208] sm:$0xf] }
  0xc3   :  { %2492 = vmatpush.bf16.msrb.mxu1 %v5179_v52  ;;  %v6095_v52 = vor.u32 %v7585_v47, %v6094_v46  ;;  %v7525_v46 = vld [vmem:[#allocation5 + $0x6ac] sm:$0xf0]  ;;  %v7327_v47 = vld [vmem:[#allocation5 + $0x84] sm:$0xf] }
  0xc4   :  { %2506 = vmatpush.bf16.msrb.mxu2 %v5563_v53  ;;  %2520 = vmatpush.bf16.msrb.mxu3 %v5947_v58  ;;  %v5278_v53 = vld [vmem:[#allocation5 + $0x200] sm:$0xf]  ;;  %v7477_v58 = vld [vmem:[#allocation5 + $0x52c] sm:$0xf0] }
  0xc5   :  { %v5279_v1 = vor.u32 %v7381_v54, %v5278_v53  ;;  %v5855_v53 = vor.u32 %v7525_v46, %v5854_v45  ;;  %v5422_v54 = vld [vmem:[#allocation5 + $0x320] sm:$0xf]  ;;  %v7459_v46 = vld [vmem:[#allocation5 + $0x4a4] sm:$0xf] }
  0xc6   :  { %2479 = vmatpush.bf16.msrb.mxu0 %v5895_v2  ;;  %v5663_v2 = vor.u32 %v7477_v58, %v5662_v56  ;;  %v7417_v56 = vld [vmem:[#allocation5 + $0x34c] sm:$0xf0]  ;;  %v5091_v58 = vor.u32 %v7327_v47, %v5088_v48  ;;  %v5616_v47 = vld [vmem:[#allocation5 + $0x4d0] sm:$0xf0]  ;;  %v7555_v48 = vld [vmem:[#allocation5 + $0x7a4] sm:$0xf] }
  0xc7   :  { %2493 = vmatpush.bf16.msrb.mxu1 %v5131_v3  ;;  %v6047_v3 = vor.u32 %v7573_v62, %v6046_v61  ;;  %v7513_v61 = vld [vmem:[#allocation5 + $0x64c] sm:$0xf0]  ;;  %v7315_v62 = vld [vmem:[#allocation5 + $0x24] sm:$0xf]  ;;  %v5423_v10 = vor.u32 %v7417_v56, %v5422_v54  ;;  %v5622_v54 = vld [vmem:[#allocation5 + $0x4a8] sm:$0xf] }
  0xc8   :  { %2507 = vmatpush.bf16.msrb.mxu2 %v5515_v4  ;;  %2521 = vmatpush.bf16.msrb.mxu3 %v5899_v8  ;;  %v5230_v4 = vld [vmem:[#allocation5 + $0x1a0] sm:$0xf]  ;;  %v7465_v8 = vld [vmem:[#allocation5 + $0x4cc] sm:$0xf0]  ;;  %v7466_v56 = vld [vmem:[#allocation5 + $0x4d4] sm:$0xf0] }
  0xc9   :  { %v5231_v13 = vor.u32 %v7369_v5, %v5230_v4  ;;  %v8118_v4 = vpop.f32.mrf.mxu0 }
  0xca   :  { %2480 = vmatpush.bf16.msrb.mxu0 %v5847_v14  ;;  %v5615_v14 = vor.u32 %v7465_v8, %v5614_v6  ;;  %v6144_v6 = vld [vmem:[#allocation5 + $0x8f0] sm:$0xf0]  ;;  %v7406_v8 = vld [vmem:[#allocation5 + $0x2f4] sm:$0xf0] }
  0xcb   :  { %2494 = vmatpush.bf16.msrb.mxu1 %v5083_v17  ;;  %v7357_v17 = vld [vmem:[#allocation5 + $0x16c] sm:$0xf0] }
  0xcc   :  { %2508 = vmatpush.bf16.msrb.mxu2 %v5467_v18  ;;  %2522 = vmatpush.bf16.msrb.mxu3 %v5851_v22  ;;  %v5566_v18 = vld [vmem:[#allocation5 + $0x440] sm:$0xf]  ;;  %v7549_v22 = vld [vmem:[#allocation5 + $0x76c] sm:$0xf0]  ;;  %v5183_v25 = vor.u32 %v7357_v17, %v5182_v16  ;;  %v8122_v16 = vpop.f32.mrf.mxu3 }
  0xcd   :  { %v5567_v26 = vor.u32 %v7453_v20, %v5566_v18  ;;  %v5951_v27 = vor.u32 %v7549_v22, %v5950_v21  ;;  %v5712_v20 = vld [vmem:[#allocation5 + $0x590] sm:$0xf0]  ;;  %v7579_v21 = vld [vmem:[#allocation5 + $0x864] sm:$0xf] }
  0xce   :  { %2481 = vmatpush.bf16.msrb.mxu0 %v5799_v29  ;;  %v7345_v29 = vld [vmem:[#allocation5 + $0x10c] sm:$0xf0] }
  0xcf   :  { %2495 = vmatpush.bf16.msrb.mxu1 %v5035_v33  ;;  %v5902_v33 = vld [vmem:[#allocation5 + $0x6e0] sm:$0xf] }
  0xd0   :  { %2509 = vmatpush.bf16.msrb.mxu2 %v5419_v34  ;;  %2523 = vmatpush.bf16.msrb.mxu3 %v5803_v37  ;;  %v7537_v34 = vld [vmem:[#allocation5 + $0x70c] sm:$0xf0]  ;;  %v5135_v37 = vor.u32 %v7345_v29, %v5134_v28  ;;  %v6099_v29 = vor.u32 %v7579_v21, %v6096_v23  ;;  %v5904_v21 = vld [vmem:[#allocation5 + $0x710] sm:$0xf0]  ;;  %v7346_v23 = vld [vmem:[#allocation5 + $0x114] sm:$0xf0] }
  0xd1   :  { %2482 = vmatmul.bf16.vlgmr.msrb.gmra.mxu0 %v8086_v55 }
  0xd2   :  { %2530 = vmatpush.bf16.msra.mxu0 %v5375_v38  ;;  %2496 = vmatmul.bf16.vlgmr.msrb.gmra.mxu1 %v8088_v59  ;;  %v5519_v38 = vor.u32 %v7441_v32, %v5518_v30  ;;  %v5664_v32 = vld [vmem:[#allocation5 + $0x530] sm:$0xf0] }
  0xd3   :  { %2544 = vmatpush.bf16.msra.mxu1 %v5759_v39  ;;  %2510 = vmatmul.bf16.vlgmr.msrb.gmra.mxu2 %v8090_v60  ;;  %v5903_v39 = vor.u32 %v7537_v34, %v5902_v33  ;;  %v7567_v33 = vld [vmem:[#allocation5 + $0x804] sm:$0xf] }
  0xd4   :  { %2558 = vmatpush.bf16.msra.mxu2 %v6143_v40  ;;  %2572 = vmatpush.bf16.msra.mxu3 %v5379_v44  ;;  %v5086_v40 = vld [vmem:[#allocation5 + $0x80] sm:$0xf]  ;;  %v7429_v44 = vld [vmem:[#allocation5 + $0x3ac] sm:$0xf0] }
  0xd5   :  { %2524 = vmatmul.bf16.vlgmr.msrb.gmra.mxu3 %v8086_v55  ;;  %v5087_v49 = vor.u32 %v7333_v41, %v5086_v40  ;;  %v7478_v40 = vld [vmem:[#allocation5 + $0x534] sm:$0xf0]  ;;  %v8129_v41 = vpop.f32.mrf.mxu0 }
  0xd6   :  { %2531 = vmatpush.bf16.msra.mxu0 %v5327_v50  ;;  %v5038_v50 = vld [vmem:[#allocation5 + $0x20] sm:$0xf] }
  0xd7   :  { %2545 = vmatpush.bf16.msra.mxu1 %v5711_v51  ;;  %v7321_v51 = vld [vmem:[#allocation5 + $0x4c] sm:$0xf0] }
  0xd8   :  { %2559 = vmatpush.bf16.msra.mxu2 %v6095_v52  ;;  %2573 = vmatpush.bf16.msra.mxu3 %v5331_v57  ;;  %v5471_v52 = vor.u32 %v7429_v44, %v5470_v42  ;;  %v5806_v57 = vld [vmem:[#allocation5 + $0x620] sm:$0xf]  ;;  %v5039_v5 = vor.u32 %v7321_v51, %v5038_v50  ;;  %v6051_v44 = vor.u32 %v7567_v33, %v6048_v35  ;;  %v6000_v50 = vld [vmem:[#allocation5 + $0x7d0] sm:$0xf0]  ;;  %v5238_v51 = vld [vmem:[#allocation5 + $0x1a8] sm:$0xf] }
  0xd9   :  { %v5807_v11 = vor.u32 %v7513_v61, %v5806_v57  ;;  %v5619_v57 = vor.u32 %v7459_v46, %v5616_v47  ;;  %v2218_v33 = vadd.f32 %v8120_v9, %v8118_v4  ;;  %v5856_v35 = vld [vmem:[#allocation5 + $0x6b0] sm:$0xf0]  ;;  %v7507_v9 = vld [vmem:[#allocation5 + $0x624] sm:$0xf] }
  0xda   :  { %2532 = vmatpush.bf16.msra.mxu0 %v5279_v1  ;;  %v7495_v1 = vld [vmem:[#allocation5 + $0x5c4] sm:$0xf]  ;;  %v5424_v46 = vld [vmem:[#allocation5 + $0x350] sm:$0xf0] }
  0xdb   :  { %2546 = vmatpush.bf16.msra.mxu1 %v5663_v2  ;;  %v5760_v2 = vld [vmem:[#allocation5 + $0x5f0] sm:$0xf0] }
  0xdc   :  { %2560 = vmatpush.bf16.msra.mxu2 %v6047_v3  ;;  %2574 = vmatpush.bf16.msra.mxu3 %v5283_v7  ;;  %v7591_v3 = vld [vmem:[#allocation5 + $0x8c4] sm:$0xf]  ;;  %v5382_v7 = vld [vmem:[#allocation5 + $0x2c8] sm:$0xf] }
  0xdd   :  { %v6147_v17 = vor.u32 %v7591_v3, %v6144_v6  ;;  %v5383_v18 = vor.u32 %v7406_v8, %v5382_v7  ;;  %v5952_v3 = vld [vmem:[#allocation5 + $0x770] sm:$0xf0]  ;;  %v7358_v6 = vld [vmem:[#allocation5 + $0x174] sm:$0xf0]  ;;  %v5574_v8 = vld [vmem:[#allocation5 + $0x448] sm:$0xf] }
  0xde   :  { %2533 = vmatpush.bf16.msra.mxu0 %v5231_v13  ;;  %v7502_v13 = vld [vmem:[#allocation5 + $0x5f4] sm:$0xf0] }
  0xdf   :  { %2547 = vmatpush.bf16.msra.mxu1 %v5615_v14  ;;  %v5043_v14 = vor.u32 %v7315_v62, %v5040_v63  ;;  %v5767_v22 = vor.u32 %v7502_v13, %v5766_v12  ;;  %v7447_v62 = vld [vmem:[#allocation5 + $0x444] sm:$0xf]  ;;  %v5568_v63 = vld [vmem:[#allocation5 + $0x470] sm:$0xf0] }
  0xe0   :  { %2561 = vmatpush.bf16.msra.mxu2 %v5999_v15  ;;  %2575 = vmatpush.bf16.msra.mxu3 %v5235_v19  ;;  %v5763_v15 = vor.u32 %v7495_v1, %v5760_v2  ;;  %v7483_v19 = vld [vmem:[#allocation5 + $0x564] sm:$0xf]  ;;  %v5623_v2 = vor.u32 %v7466_v56, %v5622_v54  ;;  %v5571_v12 = vor.u32 %v7447_v62, %v5568_v63  ;;  %v7418_v56 = vld [vmem:[#allocation5 + $0x354] sm:$0xf0]  ;;  %v7400_v62 = vld [vmem:[#allocation5 + $0x2cc] sm:$0xf] }
  0xe1   :  { %v5715_v28 = vor.u32 %v7483_v19, %v5712_v20  ;;  %v7543_v1 = vld [vmem:[#allocation5 + $0x744] sm:$0xf] }
  0xe2   :  { %2534 = vmatpush.bf16.msra.mxu0 %v5183_v25  ;;  %v7394_v25 = vld [vmem:[#allocation5 + $0x294] sm:$0xf0]  ;;  %v7531_v19 = vld [vmem:[#allocation5 + $0x6e4] sm:$0xf] }
  0xe3   :  { %2548 = vmatpush.bf16.msra.mxu1 %v5567_v26  ;;  %v5718_v26 = vld [vmem:[#allocation5 + $0x568] sm:$0xf]  ;;  %v5335_v30 = vor.u32 %v7394_v25, %v5334_v24 }
  0xe4   :  { %2562 = vmatpush.bf16.msra.mxu2 %v5951_v27  ;;  %2576 = vmatpush.bf16.msra.mxu3 %v5187_v31  ;;  %v7490_v27 = vld [vmem:[#allocation5 + $0x594] sm:$0xf0]  ;;  %v7471_v31 = vld [vmem:[#allocation5 + $0x504] sm:$0xf]  ;;  %v5526_v25 = vld [vmem:[#allocation5 + $0x3e8] sm:$0xf] }
  0xe5   :  { %v5719_v34 = vor.u32 %v7490_v27, %v5718_v26  ;;  %v5667_v42 = vor.u32 %v7471_v31, %v5664_v32  ;;  %v7442_v26 = vld [vmem:[#allocation5 + $0x414] sm:$0xf0]  ;;  %v5472_v31 = vld [vmem:[#allocation5 + $0x3b0] sm:$0xf0]  ;;  %v7519_v32 = vld [vmem:[#allocation5 + $0x684] sm:$0xf] }
  0xe6   :  { %2535 = vmatpush.bf16.msra.mxu0 %v5135_v37  ;;  %v7382_v37 = vld [vmem:[#allocation5 + $0x234] sm:$0xf0] }
  0xe7   :  { %2549 = vmatpush.bf16.msra.mxu1 %v5519_v38  ;;  %v8125_v38 = vpop.f32.mrf.mxu2  ;;  %v5287_v45 = vor.u32 %v7382_v37, %v5286_v36  ;;  %v5094_v36 = vld [vmem:[#allocation5 + $0x88] sm:$0xf]  ;;  %v7334_v37 = vld [vmem:[#allocation5 + $0xb4] sm:$0xf0] }
  0xe8   :  { %2563 = vmatpush.bf16.msra.mxu2 %v5903_v39  ;;  %2577 = vmatpush.bf16.msra.mxu3 %v5139_v43  ;;  %v5670_v39 = vld [vmem:[#allocation5 + $0x508] sm:$0xf]  ;;  %v8132_v43 = vpop.f32.mrf.mxu1  ;;  %v5095_v4 = vor.u32 %v7334_v37, %v5094_v36 }
  0xea   :  { %2536 = vmatpush.bf16.msra.mxu0 %v5087_v49  ;;  %v5671_v49 = vor.u32 %v7478_v40, %v5670_v39  ;;  %v5478_v39 = vld [vmem:[#allocation5 + $0x388] sm:$0xf]  ;;  %v7430_v40 = vld [vmem:[#allocation5 + $0x3b4] sm:$0xf0] }
  0xeb   :  { %2550 = vmatpush.bf16.msra.mxu1 %v5471_v52  ;;  %v7370_v52 = vld [vmem:[#allocation5 + $0x1d4] sm:$0xf0]  ;;  %v5479_v54 = vor.u32 %v7430_v40, %v5478_v39  ;;  %v6054_v40 = vld [vmem:[#allocation5 + $0x808] sm:$0xf] }
  0xec   :  { %2564 = vmatpush.bf16.msra.mxu2 %v5855_v53  ;;  %2578 = vmatpush.bf16.msra.mxu3 %v5091_v58  ;;  %v8134_v53 = vpop.f32.mrf.mxu3  ;;  %v6003_v58 = vor.u32 %v7555_v48, %v6000_v50  ;;  %v5239_v61 = vor.u32 %v7370_v52, %v5238_v51  ;;  %v5859_v48 = vor.u32 %v7519_v32, %v5856_v35  ;;  %v5046_v50 = vld [vmem:[#allocation5 + $0x28] sm:$0xf] }
  0xed   :  { %v8151_v51 = vadd.f32 %v8116_v0, %v2218_v33  ;;  %v5768_v0 = vld [vmem:[#allocation5 + $0x5f8] sm:$0xf0] }
  0xee   :  { %2537 = vmatpush.bf16.msra.mxu0 %v5039_v5  ;;  %v5190_v5 = vld [vmem:[#allocation5 + $0x148] sm:$0xf] }
  0xef   :  { %2551 = vmatpush.bf16.msra.mxu1 %v5423_v10  ;;  %v8136_v7 = vpop.f32.mrf.mxu2  ;;  %v7454_v10 = vld [vmem:[#allocation5 + $0x474] sm:$0xf0] }
  0xf0   :  { %2565 = vmatpush.bf16.msra.mxu2 %v5807_v11  ;;  %2579 = vmatpush.bf16.msra.mxu3 %v5043_v14  ;;  %v8138_v11 = vpop.f32.mrf.mxu0  ;;  %v8140_v13 = vpop.f32.mrf.mxu1  ;;  %v5955_v14 = vor.u32 %v7543_v1, %v5952_v3  ;;  %v5575_v20 = vor.u32 %v7454_v10, %v5574_v8  ;;  %v7496_v3 = vld [vmem:[#allocation5 + $0x5cc] sm:$0xf] }
  0xf1   :  { %2538 = vmatmul.bf16.vlgmr.msra.gmra.mxu0 %v8088_v59 }
  0xf2   :  { %2586 = vmatpush.bf16.msrb.mxu0 %v5763_v15  ;;  %2552 = vmatmul.bf16.vlgmr.msra.gmra.mxu1 %v8090_v60  ;;  %v5191_v15 = vor.u32 %v7358_v6, %v5190_v5  ;;  %v2260_v5 = vadd.f32 %v8138_v11, %v8122_v16  ;;  %v5336_v11 = vld [vmem:[#allocation5 + $0x298] sm:$0xf0] }
  0xf3   :  { %2600 = vmatpush.bf16.msrb.mxu1 %v6147_v17  ;;  %2566 = vmatmul.bf16.vlgmr.msra.gmra.mxu2 %v8086_v55  ;;  %v7435_v17 = vld [vmem:[#allocation5 + $0x3e4] sm:$0xf] }
  0xf4   :  { %2614 = vmatpush.bf16.msrb.mxu2 %v5383_v18  ;;  %2628 = vmatpush.bf16.msrb.mxu3 %v5767_v22  ;;  %v5520_v18 = vld [vmem:[#allocation5 + $0x410] sm:$0xf0]  ;;  %v5142_v22 = vld [vmem:[#allocation5 + $0xe8] sm:$0xf]  ;;  %v8142_v24 = vpop.f32.mrf.mxu3 }
  0xf5   :  { %2580 = vmatmul.bf16.vlgmr.msra.gmra.mxu3 %v8088_v59  ;;  %v5523_v27 = vor.u32 %v7435_v17, %v5520_v18  ;;  %v2302_v33 = vadd.f32 %v8142_v24, %v8136_v7  ;;  %v5288_v7 = vld [vmem:[#allocation5 + $0x238] sm:$0xf0]  ;;  %v7472_v24 = vld [vmem:[#allocation5 + $0x50c] sm:$0xf] }
  0xf6   :  { %2587 = vmatpush.bf16.msrb.mxu0 %v5715_v28  ;;  %v5907_v28 = vor.u32 %v7531_v19, %v5904_v21  ;;  %v5771_v19 = vor.u32 %v7496_v3, %v5768_v0  ;;  %v7586_v21 = vld [vmem:[#allocation5 + $0x894] sm:$0xf0]  ;;  %v5624_v3 = vld [vmem:[#allocation5 + $0x4d8] sm:$0xf0] }
  0xf7   :  { %2601 = vmatpush.bf16.msrb.mxu1 %v6099_v29  ;;  %v5143_v29 = vor.u32 %v7346_v23, %v5142_v22  ;;  %v8148_v47 = vpop.f32.mrf.mxu2  ;;  %v7388_v22 = vld [vmem:[#allocation5 + $0x26c] sm:$0xf] }
  0xf8   :  { %2615 = vmatpush.bf16.msrb.mxu2 %v5335_v30  ;;  %2629 = vmatpush.bf16.msrb.mxu3 %v5719_v34  ;;  %v7423_v30 = vld [vmem:[#allocation5 + $0x384] sm:$0xf]  ;;  %v5527_v34 = vor.u32 %v7442_v26, %v5526_v25  ;;  %v2261_v52 = vpop.f32.mrf.mxu0  ;;  %v7484_v23 = vld [vmem:[#allocation5 + $0x56c] sm:$0xf]  ;;  %v5720_v25 = vld [vmem:[#allocation5 + $0x598] sm:$0xf0] }
  0xf9   :  { %v8165_v26 = vmul.f32 0.7978846, %v8151_v51  ;;  %v2262_v32 = vadd.f32 %v2261_v52, %v8134_v53  ;;  %v5723_v39 = vor.u32 %v7484_v23, %v5720_v25  ;;  %v7448_v23 = vld [vmem:[#allocation5 + $0x44c] sm:$0xf]  ;;  %v5576_v25 = vld [vmem:[#allocation5 + $0x478] sm:$0xf0] }
  0xfa   :  { %2588 = vmatpush.bf16.msrb.mxu0 %v5667_v42  ;;  %v2220_v42 = vadd.f32 %v8132_v43, %v8129_v41  ;;  %v7322_v41 = vld [vmem:[#allocation5 + $0x54] sm:$0xf0]  ;;  %v5430_v43 = vld [vmem:[#allocation5 + $0x328] sm:$0xf] }
  0xfb   :  { %2602 = vmatpush.bf16.msrb.mxu1 %v6051_v44  ;;  %v5475_v44 = vor.u32 %v7423_v30, %v5472_v31  ;;  %v5047_v10 = vor.u32 %v7322_v41, %v5046_v50  ;;  %v6104_v30 = vld [vmem:[#allocation5 + $0x898] sm:$0xf0] }
  0xfc   :  { %2616 = vmatpush.bf16.msrb.mxu2 %v5287_v45  ;;  %2630 = vmatpush.bf16.msrb.mxu3 %v5671_v49  ;;  %v7411_v45 = vld [vmem:[#allocation5 + $0x324] sm:$0xf]  ;;  %v5808_v49 = vld [vmem:[#allocation5 + $0x650] sm:$0xf0]  ;;  %v8156_v63 = vadd.f32 %v8125_v38, %v2220_v42  ;;  %v8160_v6 = vpop.f32.mrf.mxu3  ;;  %v2698_v38 = vmul.f32 %v8151_v51, %v8151_v51  ;;  %v7574_v42 = vld [vmem:[#allocation5 + $0x834] sm:$0xf0] }
  0xfd   :  { %v5427_v1 = vor.u32 %v7411_v45, %v5424_v46  ;;  %v5811_v8 = vor.u32 %v7507_v9, %v5808_v49  ;;  %v5672_v45 = vld [vmem:[#allocation5 + $0x538] sm:$0xf0] }
  0xfe   :  { %2589 = vmatpush.bf16.msrb.mxu0 %v5619_v57  ;;  %v8153_v57 = vpop.f32.mrf.mxu1  ;;  %v2770_v31 = vmul.f32 0.044715, %v2698_v38  ;;  %v6056_v9 = vld [vmem:[#allocation5 + $0x838] sm:$0xf0]  ;;  %v8185_v49 = vmul.f32 0.7978846, %v8156_v63 }
  0xff   :  { %2603 = vmatpush.bf16.msrb.mxu1 %v6003_v58  ;;  %v6150_v58 = vld [vmem:[#allocation5 + $0x8c8] sm:$0xf]  ;;  %v8177_v37 = vpop.f32.mrf.mxu2  ;;  %v8188_v50 = vadd.f32 %v8153_v57, %v2262_v32  ;;  %v7460_v57 = vld [vmem:[#allocation5 + $0x4ac] sm:$0xf]  ;;  %v5960_v32 = vld [vmem:[#allocation5 + $0x778] sm:$0xf0] }
 0x100   :  { %2617 = vmatpush.bf16.msrb.mxu2 %v5239_v61  ;;  %2631 = vmatpush.bf16.msrb.mxu3 %v5623_v2  ;;  %v7598_v61 = vld [vmem:[#allocation5 + $0x8f4] sm:$0xf0]  ;;  %v5384_v2 = vld [vmem:[#allocation5 + $0x2f8] sm:$0xf0]  ;;  %v8195_v0 = vadd.f32 1.0, %v2770_v31 }
 0x101   :  { %v6151_v17 = vor.u32 %v7598_v61, %v6150_v58  ;;  %v5387_v18 = vor.u32 %v7400_v62, %v5384_v2  ;;  %v6006_v58 = vld [vmem:[#allocation5 + $0x7a8] sm:$0xf]  ;;  %v7562_v61 = vld [vmem:[#allocation5 + $0x7d4] sm:$0xf0]  ;;  %v7364_v62 = vld [vmem:[#allocation5 + $0x1ac] sm:$0xf] }
 0x102   :  { %2590 = vmatpush.bf16.msrb.mxu0 %v5571_v12  ;;  %v7592_v12 = vld [vmem:[#allocation5 + $0x8cc] sm:$0xf]  ;;  %v5240_v2 = vld [vmem:[#allocation5 + $0x1d8] sm:$0xf0] }
 0x103   :  { %2604 = vmatpush.bf16.msrb.mxu1 %v5955_v14  ;;  %v6152_v14 = vld [vmem:[#allocation5 + $0x8f8] sm:$0xf0]  ;;  %v7544_v31 = vld [vmem:[#allocation5 + $0x74c] sm:$0xf] }
 0x104   :  { %2618 = vmatpush.bf16.msrb.mxu2 %v5191_v15  ;;  %2632 = vmatpush.bf16.msrb.mxu3 %v5575_v20  ;;  %v5431_v15 = vor.u32 %v7418_v56, %v5430_v43  ;;  %v6102_v20 = vld [vmem:[#allocation5 + $0x868] sm:$0xf]  ;;  %v6155_v16 = vor.u32 %v7592_v12, %v6152_v14  ;;  %v8193_v41 = vpop.f32.mrf.mxu3  ;;  %v5675_v56 = vor.u32 %v7472_v24, %v5672_v45 }
 0x105   :  { %v6103_v35 = vor.u32 %v7586_v21, %v6102_v20  ;;  %v2711_v14 = vmul.f32 %v8188_v50, %v8188_v50  ;;  %v7550_v20 = vld [vmem:[#allocation5 + $0x774] sm:$0xf0]  ;;  %v7352_v21 = vld [vmem:[#allocation5 + $0x14c] sm:$0xf] }
 0x106   :  { %2591 = vmatpush.bf16.msrb.mxu0 %v5523_v27  ;;  %v2710_v27 = vmul.f32 %v8156_v63, %v8156_v63  ;;  %v8175_v36 = vpop.f32.mrf.mxu1 }
 0x107   :  { %2605 = vmatpush.bf16.msrb.mxu1 %v5907_v28  ;;  %v8170_v28 = vadd.f32 %v8140_v13, %v2260_v5  ;;  %v5339_v13 = vor.u32 %v7388_v22, %v5336_v11  ;;  %v5192_v11 = vld [vmem:[#allocation5 + $0x178] sm:$0xf0]  ;;  %v2344_v24 = vadd.f32 %v8177_v37, %v8175_v36 }
 0x108   :  { %2619 = vmatpush.bf16.msrb.mxu2 %v5143_v29  ;;  %2633 = vmatpush.bf16.msrb.mxu3 %v5527_v34  ;;  %v7580_v29 = vld [vmem:[#allocation5 + $0x86c] sm:$0xf]  ;;  %v2315_v34 = vpop.f32.mrf.mxu0  ;;  %v2782_v46 = vmul.f32 0.044715, %v2710_v27 }
 0x109   :  { %v6107_v53 = vor.u32 %v7580_v29, %v6104_v30  ;;  %v8190_v52 = vadd.f32 %v2315_v34, %v2302_v33  ;;  %v8204_v27 = vmul.f32 0.7978846, %v8170_v28  ;;  %v2345_v30 = vpop.f32.mrf.mxu2  ;;  %v2783_v34 = vmul.f32 0.044715, %v2711_v14  ;;  %v5096_v14 = vld [vmem:[#allocation5 + $0xb8] sm:$0xf0] }
 0x10a   :  { %2592 = vmatpush.bf16.msrb.mxu0 %v5475_v44  ;;  %v7376_v44 = vld [vmem:[#allocation5 + $0x20c] sm:$0xf]  ;;  %v8197_v5 = vadd.f32 1.0, %v2782_v46  ;;  %v5963_v46 = vor.u32 %v7544_v31, %v5960_v32 }
 0x10b   :  { %2606 = vmatpush.bf16.msrb.mxu1 %v5859_v48  ;;  %v2699_v48 = vmul.f32 %v8170_v28, %v8170_v28  ;;  %v5291_v43 = vor.u32 %v7376_v44, %v5288_v7  ;;  %v2700_v38 = vmul.f32 %v8190_v52, %v8190_v52  ;;  %v5910_v44 = vld [vmem:[#allocation5 + $0x6e8] sm:$0xf]  ;;  %v7340_v7 = vld [vmem:[#allocation5 + $0xec] sm:$0xf] }
 0x10c   :  { %2620 = vmatpush.bf16.msrb.mxu2 %v5095_v4  ;;  %2634 = vmatpush.bf16.msrb.mxu3 %v5479_v54  ;;  %v7568_v4 = vld [vmem:[#allocation5 + $0x80c] sm:$0xf]  ;;  %v6055_v54 = vor.u32 %v7574_v42, %v6054_v40  ;;  %v5195_v40 = vor.u32 %v7352_v21, %v5192_v11  ;;  %v5579_v42 = vor.u32 %v7448_v23, %v5576_v25  ;;  %v5864_v21 = vld [vmem:[#allocation5 + $0x6b8] sm:$0xf0]  ;;  %v5814_v11 = vld [vmem:[#allocation5 + $0x628] sm:$0xf] }
 0x10d   :  { %v2771_v12 = vmul.f32 0.044715, %v2699_v48  ;;  %v5144_v48 = vld [vmem:[#allocation5 + $0x118] sm:$0xf0]  ;;  %v7514_v23 = vld [vmem:[#allocation5 + $0x654] sm:$0xf0] }
 0x10e   :  { %2593 = vmatpush.bf16.msrb.mxu0 %v5427_v1  ;;  %v6059_v1 = vor.u32 %v7568_v4, %v6056_v9  ;;  %v2331_v29 = vpop.f32.mrf.mxu1  ;;  %v7436_v4 = vld [vmem:[#allocation5 + $0x3ec] sm:$0xf]  ;;  %v5528_v9 = vld [vmem:[#allocation5 + $0x418] sm:$0xf0]  ;;  %v5147_v37 = vor.u32 %v7340_v7, %v5144_v48  ;;  %v5815_v7 = vor.u32 %v7514_v23, %v5814_v11 }
 0x10f   :  { %2607 = vmatpush.bf16.msrb.mxu1 %v5811_v8  ;;  %v7556_v8 = vld [vmem:[#allocation5 + $0x7ac] sm:$0xf]  ;;  %v8206_v33 = vadd.f32 1.0, %v2771_v12  ;;  %v2346_v45 = vadd.f32 %v2345_v30, %v2331_v29  ;;  %v5048_v30 = vld [vmem:[#allocation5 + $0x58] sm:$0xf0] }
 0x110   :  { %2621 = vmatpush.bf16.msrb.mxu2 %v5047_v10  ;;  %2635 = vmatpush.bf16.msrb.mxu3 %v5431_v15  ;;  %v6008_v10 = vld [vmem:[#allocation5 + $0x7d8] sm:$0xf0]  ;;  %v6007_v15 = vor.u32 %v7562_v61, %v6006_v58  ;;  %v2317_v22 = vpop.f32.mrf.mxu0  ;;  %v2807_v58 = vadd.f32 1.0, %v2783_v34  ;;  %v8216_v61 = vmul.f32 0.7978846, %v8190_v52 }
 0x111   :  { %2594 = vmatmul.bf16.vlgmr.msrb.gmra.mxu0 %v8090_v60  ;;  %v7316_v29 = vld [vmem:[#allocation5 + $0x2c] sm:$0xf] }
 0x112   :  { %2642 = vmatpush.bf16.msra.mxu0 %v6151_v17  ;;  %2608 = vmatmul.bf16.vlgmr.msrb.gmra.mxu1 %v8086_v55  ;;  %v5243_v17 = vor.u32 %v7364_v62, %v5240_v2  ;;  %v5862_v2 = vld [vmem:[#allocation5 + $0x688] sm:$0xf]  ;;  %v7412_v31 = vld [vmem:[#allocation5 + $0x32c] sm:$0xf] }
 0x113   :  { %2656 = vmatpush.bf16.msra.mxu1 %v5387_v18  ;;  %2622 = vmatmul.bf16.vlgmr.msrb.gmra.mxu2 %v8088_v59  ;;  %v5627_v18 = vor.u32 %v7460_v57, %v5624_v3  ;;  %v7526_v57 = vld [vmem:[#allocation5 + $0x6b4] sm:$0xf0]  ;;  %v7328_v3 = vld [vmem:[#allocation5 + $0x8c] sm:$0xf] }
 0x114   :  { %2670 = vmatpush.bf16.msra.mxu2 %v5771_v19  ;;  %2684 = vmatpush.bf16.msra.mxu3 %v6155_v16  ;;  %v5958_v19 = vld [vmem:[#allocation5 + $0x748] sm:$0xf]  ;;  %v6011_v16 = vor.u32 %v7556_v8, %v6008_v10  ;;  %v8221_v8 = vadd.f32 %v8193_v41, %v2344_v24  ;;  %v2830_v41 = vmul.f32 %v8197_v5, %v8185_v49  ;;  %v7645_v24 = vld [vmem:[#allocation7 + $0x170] sm:$0xf0] }
 0x115   :  { %2636 = vmatmul.bf16.vlgmr.msrb.gmra.mxu3 %v8090_v60 }
 0x116   :  { %2643 = vmatpush.bf16.msra.mxu0 %v6103_v35  ;;  %v2772_v35 = vmul.f32 0.044715, %v2700_v38  ;;  %v7424_v38 = vld [vmem:[#allocation5 + $0x38c] sm:$0xf]  ;;  %v2701_v49 = vmul.f32 %v8221_v8, %v8221_v8  ;;  %v8243_v32 = vpop.f32.mrf.mxu1 }
 0x117   :  { %2657 = vmatpush.bf16.msra.mxu1 %v5339_v13  ;;  %v5959_v13 = vor.u32 %v7550_v20, %v5958_v19  ;;  %v7520_v20 = vld [vmem:[#allocation5 + $0x68c] sm:$0xf] }
 0x118   :  { %2671 = vmatpush.bf16.msra.mxu2 %v5723_v39  ;;  %2685 = vmatpush.bf16.msra.mxu3 %v6107_v53  ;;  %v2304_v39 = vadd.f32 %v8160_v6, %v8148_v47  ;;  %v7538_v53 = vld [vmem:[#allocation5 + $0x714] sm:$0xf0]  ;;  %v2359_v47 = vpop.f32.mrf.mxu3  ;;  %v7532_v6 = vld [vmem:[#allocation5 + $0x6ec] sm:$0xf]  ;;  %v8218_v62 = vadd.f32 1.0, %v2772_v35  ;;  %v8230_v19 = vpop.f32.mrf.mxu0  ;;  %v5867_v34 = vor.u32 %v7520_v20, %v5864_v21 }
 0x119   :  { %v5911_v36 = vor.u32 %v7538_v53, %v5910_v44  ;;  %v8223_v10 = vadd.f32 %v2359_v47, %v2346_v45  ;;  %v5432_v35 = vld [vmem:[#allocation5 + $0x358] sm:$0xf0]  ;;  %v6338_v44 = vld [vmem:[#allocation7 + $0x168] sm:$0xf]  ;;  %v2819_v53 = vmul.f32 %v8206_v33, %v8204_v27  ;;  %v6230_v33 = vld [vmem:[#allocation7 + $0x90] sm:$0xf] }
 0x11a   :  { %2644 = vmatpush.bf16.msra.mxu0 %v6055_v54  ;;  %v2759_v54 = vmul.f32 0.7978846, %v8188_v50  ;;  %v6434_v45 = vld [vmem:[#allocation7 + $0x228] sm:$0xf]  ;;  %v5435_v47 = vor.u32 %v7412_v31, %v5432_v35  ;;  %v6518_v21 = vld [vmem:[#allocation7 + $0x2d0] sm:$0xf] }
 0x11b   :  { %2658 = vmatpush.bf16.msra.mxu1 %v5291_v43  ;;  %v8213_v43 = vadd.f32 %v2317_v22, %v2304_v39  ;;  %v8235_v22 = vmul.f32 0.7978846, %v8221_v8  ;;  %v2713_v5 = vmul.f32 %v8223_v10, %v8223_v10  ;;  %v5816_v39 = vld [vmem:[#allocation5 + $0x658] sm:$0xf0]  ;;  %v2761_v23 = vmul.f32 0.7978846, %v8223_v10 }
 0x11c   :  { %2672 = vmatpush.bf16.msra.mxu2 %v5675_v56  ;;  %2686 = vmatpush.bf16.msra.mxu3 %v6059_v1  ;;  %v5912_v56 = vld [vmem:[#allocation5 + $0x718] sm:$0xf0]  ;;  %v5531_v1 = vor.u32 %v7436_v4, %v5528_v9  ;;  %v2831_v48 = vmul.f32 %v2807_v58, %v2759_v54  ;;  %v5051_v9 = vor.u32 %v7316_v29, %v5048_v30  ;;  %v6218_v30 = vld [vmem:[#allocation7 + $0x78] sm:$0xf]  ;;  %v7615_v31 = vld [vmem:[#allocation7 + $0x80] sm:$0xf0] }
 0x11d   :  { %v5915_v12 = vor.u32 %v7532_v6, %v5912_v56  ;;  %v6530_v6 = vld [vmem:[#allocation7 + $0x2e8] sm:$0xf]  ;;  %v7693_v56 = vld [vmem:[#allocation7 + $0x2f0] sm:$0xf0]  ;;  %v7642_v58 = vld [vmem:[#allocation7 + $0x158] sm:$0xf0] }
 0x11e   :  { %2645 = vmatpush.bf16.msra.mxu0 %v6007_v15  ;;  %v5480_v15 = vld [vmem:[#allocation5 + $0x3b8] sm:$0xf0]  ;;  %v6531_v54 = vor.u32 %v7693_v56, %v6530_v6 }
 0x11f   :  { %2659 = vmatpush.bf16.msra.mxu1 %v5243_v17  ;;  %v2818_v17 = vmul.f32 %v8195_v0, %v8165_v26  ;;  %v2712_v26 = vmul.f32 %v8213_v43, %v8213_v43  ;;  %v5099_v0 = vor.u32 %v7328_v3, %v5096_v14  ;;  %v5483_v25 = vor.u32 %v7424_v38, %v5480_v15  ;;  %v7618_v3 = vld [vmem:[#allocation7 + $0x98] sm:$0xf0]  ;;  %v6422_v14 = vld [vmem:[#allocation7 + $0x210] sm:$0xf] }
 0x120   :  { %2673 = vmatpush.bf16.msra.mxu2 %v5627_v18  ;;  %2687 = vmatpush.bf16.msra.mxu3 %v6011_v16  ;;  %v8228_v18 = vmul.f32 0.7978846, %v8213_v43  ;;  %v5863_v16 = vor.u32 %v7526_v57, %v5862_v2  ;;  %v6339_v57 = vor.u32 %v7645_v24, %v6338_v44  ;;  %v7666_v38 = vld [vmem:[#allocation7 + $0x218] sm:$0xf0]  ;;  %v8247_v20 = vpop.f32.mrf.mxu0  ;;  %v8259_v44 = vmul.f32 0.5, %v8156_v63 }
 0x121   :  { %7897 = vtanh.f32 %v2818_v17  ;;  %v2784_v4 = vmul.f32 0.044715, %v2712_v26  ;;  %v6423_v29 = vor.u32 %v7666_v38, %v6422_v14  ;;  %v6219_v63 = vor.u32 %v7615_v31, %v6218_v30  ;;  %v6290_v14 = vld [vmem:[#allocation7 + $0x108] sm:$0xf] }
 0x122   :  { %2646 = vmatpush.bf16.msra.mxu0 %v5959_v13  ;;  %v7508_v13 = vld [vmem:[#allocation5 + $0x62c] sm:$0xf]  ;;  %7899 = vtanh.f32 %v2830_v41  ;;  %v7690_v41 = vld [vmem:[#allocation7 + $0x2d8] sm:$0xf0] }
 0x123   :  { %2660 = vmatpush.bf16.msra.mxu1 %v5195_v40  ;;  %v6242_v40 = vld [vmem:[#allocation7 + $0xa8] sm:$0xf]  ;;  %7901 = vtanh.f32 %v2819_v53  ;;  %v2808_v17 = vadd.f32 1.0, %v2784_v4  ;;  %v6519_v35 = vor.u32 %v7690_v41, %v6518_v21  ;;  %v6206_v4 = vld [vmem:[#allocation7 + $0x60] sm:$0xf] }
 0x124   :  { %2674 = vmatpush.bf16.msra.mxu2 %v5579_v42  ;;  %2688 = vmatpush.bf16.msra.mxu3 %v5963_v46  ;;  %v7621_v42 = vld [vmem:[#allocation7 + $0xb0] sm:$0xf0]  ;;  %7903 = vtanh.f32 %v2831_v48  ;;  %v6386_v21 = vld [vmem:[#allocation7 + $0x1c8] sm:$0xf] }
 0x125   :  { %v7669_v46 = vld [vmem:[#allocation7 + $0x230] sm:$0xf0]  ;;  %v6243_v2 = vor.u32 %v7621_v42, %v6242_v40  ;;  %v7663_v40 = vld [vmem:[#allocation7 + $0x200] sm:$0xf0]  ;;  %v8256_v42 = vmul.f32 0.5, %v8151_v51  ;;  %v2832_v53 = vmul.f32 %v2808_v17, %v8228_v18  ;;  %v2386_v51 = vadd.f32 %v8243_v32, %v8230_v19 }
 0x126   :  { %2647 = vmatpush.bf16.msra.mxu0 %v5911_v36  ;;  %v2773_v36 = vmul.f32 0.044715, %v2701_v49  ;;  %v6435_v27 = vor.u32 %v7669_v46, %v6434_v45  ;;  %v6314_v49 = vld [vmem:[#allocation7 + $0x138] sm:$0xf]  ;;  %v7636_v19 = vld [vmem:[#allocation7 + $0x128] sm:$0xf0] }
 0x127   :  { %2661 = vmatpush.bf16.msra.mxu1 %v5147_v37  ;;  %v2785_v37 = vmul.f32 0.044715, %v2713_v5  ;;  %v7898_v15 = vpop.eup %7897  ;;  %v2820_v5 = vmul.f32 %v8218_v62, %v8216_v61  ;;  %v6506_v61 = vld [vmem:[#allocation7 + $0x2b8] sm:$0xf]  ;;  %v7687_v62 = vld [vmem:[#allocation7 + $0x2c0] sm:$0xf0] }
 0x128   :  { %2675 = vmatpush.bf16.msra.mxu2 %v5531_v1  ;;  %2689 = vmatpush.bf16.msra.mxu3 %v5915_v12  ;;  %v5819_v1 = vor.u32 %v7508_v13, %v5816_v39  ;;  %v6326_v12 = vld [vmem:[#allocation7 + $0x150] sm:$0xf]  ;;  %v2797_v11 = vadd.f32 1.0, %v2773_v36  ;;  %v7639_v13 = vld [vmem:[#allocation7 + $0x140] sm:$0xf0]  ;;  %v8264_v45 = vadd.f32 1.0, %v7898_v15  ;;  %v6507_v56 = vor.u32 %v7687_v62, %v6506_v61  ;;  %v8272_v36 = vpop.f32.mrf.mxu3 }
 0x129   :  { %v2809_v26 = vadd.f32 1.0, %v2785_v37  ;;  %v6410_v39 = vld [vmem:[#allocation7 + $0x1f8] sm:$0xf]  ;;  %7905 = vtanh.f32 %v2820_v5  ;;  %v7660_v32 = vld [vmem:[#allocation7 + $0x1e8] sm:$0xf0]  ;;  %v8275_v37 = vmul.f32 0.5, %v8170_v28 }
 0x12a   :  { %2648 = vmatpush.bf16.msra.mxu0 %v5863_v16  ;;  %v7900_v16 = vpop.eup %7899  ;;  %v2821_v48 = vmul.f32 %v2797_v11, %v8235_v22  ;;  %v8278_v22 = vmul.f32 0.5, %v8188_v50  ;;  %7907 = vtanh.f32 %v2832_v53  ;;  %v6194_v50 = vld [vmem:[#allocation7 + $0x48] sm:$0xf]  ;;  %v7633_v17 = vld [vmem:[#allocation7 + $0x110] sm:$0xf0]  ;;  %v8294_v11 = vmul.f32 0.5, %v8213_v43 }
 0x12b   :  { %2662 = vmatpush.bf16.msra.mxu1 %v5099_v0  ;;  %v6231_v0 = vor.u32 %v7618_v3, %v6230_v33  ;;  %v7902_v24 = vpop.eup %7901  ;;  %v8266_v46 = vadd.f32 1.0, %v7900_v16  ;;  %v2833_v6 = vmul.f32 %v2809_v26, %v2761_v23  ;;  %v7657_v41 = vld [vmem:[#allocation7 + $0x1d0] sm:$0xf0]  ;;  %v8291_v16 = vmul.f32 0.5, %v8190_v52  ;;  %v6482_v23 = vld [vmem:[#allocation7 + $0x288] sm:$0xf] }
 0x12c   :  { %2676 = vmatpush.bf16.msra.mxu2 %v5483_v25  ;;  %2690 = vmatpush.bf16.msra.mxu3 %v5867_v34  ;;  %v6327_v25 = vor.u32 %v7642_v58, %v6326_v12  ;;  %v8252_v34 = vpop.f32.mrf.mxu1  ;;  %v7904_v18 = vpop.eup %7903  ;;  %7909 = vtanh.f32 %v2821_v48  ;;  %v7609_v58 = vld [vmem:[#allocation7 + $0x50] sm:$0xf0]  ;;  %v6291_v43 = vor.u32 %v7633_v17, %v6290_v14  ;;  %v6387_v5 = vor.u32 %v7657_v41, %v6386_v21  ;;  %v6374_v53 = vld [vmem:[#allocation7 + $0x1b0] sm:$0xf]  ;;  %v6158_v41 = vld [vmem:[#allocation7] sm:$0xf] }
 0x12d   :  { %v8284_v33 = vadd.f32 1.0, %v7904_v18  ;;  %7911 = vtanh.f32 %v2833_v6  ;;  %v7681_v26 = vld [vmem:[#allocation7 + $0x290] sm:$0xf0]  ;;  %v2388_v30 = vadd.f32 %v8252_v34, %v8247_v20  ;;  %v6195_v31 = vor.u32 %v7609_v58, %v6194_v50  ;;  %v6470_v34 = vld [vmem:[#allocation7 + $0x270] sm:$0xf] }
 0x12e   :  { %2649 = vmatpush.bf16.msra.mxu0 %v5815_v7  ;;  %v2399_v7 = vpop.f32.mrf.mxu2  ;;  %v8306_v20 = vmul.f32 0.5, %v8223_v10  ;;  %v6170_v6 = vld [vmem:[#allocation7 + $0x18] sm:$0xf]  ;;  %v7675_v50 = vld [vmem:[#allocation7 + $0x260] sm:$0xf0] }
 0x12f   :  { %2663 = vmatpush.bf16.msra.mxu1 %v5051_v9  ;;  %v7612_v9 = vld [vmem:[#allocation7 + $0x68] sm:$0xf0]  ;;  %v8286_v3 = vadd.f32 %v2399_v7, %v2386_v51  ;;  %v7654_v7 = vld [vmem:[#allocation7 + $0x1b8] sm:$0xf0]  ;;  %v6266_v10 = vld [vmem:[#allocation7 + $0xd8] sm:$0xf] }
 0x130   :  { %2677 = vmatpush.bf16.msra.mxu2 %v5435_v47  ;;  %2691 = vmatpush.bf16.msra.mxu3 %v5819_v1  ;;  %v6302_v47 = vld [vmem:[#allocation7 + $0x120] sm:$0xf]  ;;  %v8280_v1 = vpop.f32.mrf.mxu0  ;;  %v6207_v12 = vor.u32 %v7612_v9, %v6206_v4 }
 0x131   :  { %2650 = vmatmul.bf16.vlgmr.msra.gmra.mxu0 %v8086_v55  ;;  %v6303_v28 = vor.u32 %v7636_v19, %v6302_v47  ;;  %v6375_v47 = vor.u32 %v7654_v7, %v6374_v53  ;;  %v8313_v58 = vmul.f32 0.7978846, %v8286_v3 }
 0x132   :  { %4462 = vmatpush.bf16.msrb.mxu0 %v6243_v2  ;;  %2664 = vmatmul.bf16.vlgmr.msra.gmra.mxu1 %v8088_v59  ;;  %v6315_v59 = vor.u32 %v7639_v13, %v6314_v49  ;;  %v6494_v2 = vld [vmem:[#allocation7 + $0x2a0] sm:$0xf]  ;;  %v7606_v13 = vld [vmem:[#allocation7 + $0x38] sm:$0xf0] }
 0x133   :  { %4476 = vmatpush.bf16.msrb.mxu1 %v6339_v57  ;;  %2678 = vmatmul.bf16.vlgmr.msra.gmra.mxu2 %v8090_v60  ;;  %v6411_v60 = vor.u32 %v7663_v40, %v6410_v39  ;;  %v7684_v57 = vld [vmem:[#allocation7 + $0x2a8] sm:$0xf0]  ;;  %v6278_v39 = vld [vmem:[#allocation7 + $0xf0] sm:$0xf]  ;;  %v7630_v40 = vld [vmem:[#allocation7 + $0xf8] sm:$0xf0] }
 0x134   :  { %4490 = vmatpush.bf16.msrb.mxu2 %v6435_v27  ;;  %4504 = vmatpush.bf16.msrb.mxu3 %v6531_v54  ;;  %v8282_v27 = vadd.f32 1.0, %v7902_v24  ;;  %v6495_v38 = vor.u32 %v7684_v57, %v6494_v2  ;;  %v8288_v15 = vpop.f32.mrf.mxu1  ;;  %v7678_v24 = vld [vmem:[#allocation7 + $0x278] sm:$0xf0]  ;;  %v6279_v9 = vor.u32 %v7630_v40, %v6278_v39  ;;  %v7651_v2 = vld [vmem:[#allocation7 + $0x1a0] sm:$0xf0]  ;;  %v2903_v40 = vmul.f32 %v8284_v33, %v8278_v22 }
 0x135   :  { %2692 = vmatmul.bf16.vlgmr.msra.gmra.mxu3 %v8086_v55  ;;  %v6398_v55 = vld [vmem:[#allocation7 + $0x1e0] sm:$0xf]  ;;  %v6471_v19 = vor.u32 %v7678_v24, %v6470_v34  ;;  %v7672_v39 = vld [vmem:[#allocation7 + $0x248] sm:$0xf0]  ;;  %v7741_v34 = vld [vmem:[#allocation7 + $0x470] sm:$0xf0] }
 0x136   :  { %4463 = vmatpush.bf16.msrb.mxu0 %v6231_v0  ;;  %v6399_v54 = vor.u32 %v7660_v32, %v6398_v55  ;;  %v7906_v0 = vpop.eup %7905  ;;  %v2401_v52 = vpop.f32.mrf.mxu2  ;;  %v7627_v55 = vld [vmem:[#allocation7 + $0xe0] sm:$0xf0]  ;;  %v6362_v32 = vld [vmem:[#allocation7 + $0x198] sm:$0xf] }
 0x137   :  { %4477 = vmatpush.bf16.msrb.mxu1 %v6327_v25  ;;  %v8297_v25 = vmul.f32 0.5, %v8221_v8  ;;  %v7908_v49 = vpop.eup %7907  ;;  %v6483_v8 = vor.u32 %v7681_v26, %v6482_v23  ;;  %v8303_v62 = vadd.f32 1.0, %v7906_v0  ;;  %v8310_v48 = vadd.f32 %v2401_v52, %v2388_v30  ;;  %v6254_v30 = vld [vmem:[#allocation7 + $0xc0] sm:$0xf] }
 0x138   :  { %4491 = vmatpush.bf16.msrb.mxu2 %v6423_v29  ;;  %4505 = vmatpush.bf16.msrb.mxu3 %v6519_v35  ;;  %v2702_v29 = vmul.f32 %v8286_v3, %v8286_v3  ;;  %v6182_v35 = vld [vmem:[#allocation7 + $0x30] sm:$0xf]  ;;  %v7910_v61 = vpop.eup %7909  ;;  %v2428_v23 = vadd.f32 %v8280_v1, %v8272_v36  ;;  %v6267_v26 = vor.u32 %v7627_v55, %v6266_v10  ;;  %v6350_v52 = vld [vmem:[#allocation7 + $0x180] sm:$0xf]  ;;  %v7717_v36 = vld [vmem:[#allocation7 + $0x3b0] sm:$0xf0] }
 0x139   :  { %v7912_v51 = vpop.eup %7911  ;;  %v6183_v4 = vor.u32 %v7606_v13, %v6182_v35  ;;  %v2869_v57 = vadd.f32 1.0, %v7910_v61  ;;  %v6363_v0 = vor.u32 %v7651_v2, %v6362_v32  ;;  %v2890_v35 = vmul.f32 %v8264_v45, %v8256_v42  ;;  %v6722_v61 = vld [vmem:[#allocation7 + $0x468] sm:$0xf]  ;;  %v7714_v10 = vld [vmem:[#allocation7 + $0x398] sm:$0xf0] }
 0x13a   :  { %4464 = vmatpush.bf16.msrb.mxu0 %v6219_v63  ;;  %v8308_v63 = vadd.f32 1.0, %v7908_v49  ;;  %v2774_v18 = vmul.f32 0.044715, %v2702_v29  ;;  %v7600_v29 = vld [vmem:[#allocation7 + $0x8] sm:$0xf0]  ;;  %v2902_v1 = vmul.f32 %v8266_v46, %v8259_v44  ;;  %v8331_v45 = vadd.f32 %v8288_v15, %v2428_v23 }
 0x13b   :  { %4478 = vmatpush.bf16.msrb.mxu1 %v6315_v59  ;;  %v2415_v59 = vpop.f32.mrf.mxu3  ;;  %v6159_v7 = vor.u32 %v7600_v29, %v6158_v41  ;;  %v2762_v42 = vmul.f32 0.7978846, %v8310_v48  ;;  %v2891_v44 = vmul.f32 %v8282_v27, %v8275_v37  ;;  %v7789_v37 = vld [vmem:[#allocation7 + $0x5f0] sm:$0xf0]  ;;  %v2892_v27 = vmul.f32 %v8303_v62, %v8291_v16  ;;  %v6710_v55 = vld [vmem:[#allocation7 + $0x450] sm:$0xf] }
 0x13c   :  { %4492 = vmatpush.bf16.msrb.mxu2 %v6411_v60  ;;  %4506 = vmatpush.bf16.msrb.mxu3 %v6507_v56  ;;  %v2429_v60 = vpop.f32.mrf.mxu0  ;;  %v7603_v56 = vld [vmem:[#allocation7 + $0x20] sm:$0xf0]  ;;  %v8315_v14 = vadd.f32 1.0, %v2774_v18  ;;  %v2443_v17 = vpop.f32.mrf.mxu1  ;;  %v2904_v46 = vmul.f32 %v8308_v63, %v8294_v11  ;;  %v8343_v63 = vpack.c.bf16 %v2902_v1, %v2890_v35  ;;  %v7738_v32 = vld [vmem:[#allocation7 + $0x458] sm:$0xf0] }
 0x13d   :  { %v6171_v21 = vor.u32 %v7603_v56, %v6170_v6  ;;  %v6723_v56 = vor.u32 %v7741_v34, %v6722_v61  ;;  %v6602_v2 = vld [vmem:[#allocation7 + $0x378] sm:$0xf]  ;;  %v7711_v62 = vld [vmem:[#allocation7 + $0x380] sm:$0xf0]  ;;  %v6711_v41 = vor.u32 %v7738_v32, %v6710_v55  ;;  %v6902_v23 = vld [vmem:[#allocation7 + $0x5d0] sm:$0xf] }
 0x13e   :  { %4465 = vmatpush.bf16.msrb.mxu0 %v6207_v12  ;;  %v2881_v12 = vadd.f32 1.0, %v7912_v51  ;;  %v2455_v24 = vpop.f32.mrf.mxu2  ;;  %v6698_v29 = vld [vmem:[#allocation7 + $0x438] sm:$0xf]  ;;  %v7708_v35 = vld [vmem:[#allocation7 + $0x368] sm:$0xf0]  ;;  %v2726_v55 = vmul.f32 0.5, %v8286_v3 }
 0x13f   :  { %4479 = vmatpush.bf16.msrb.mxu1 %v6303_v28  ;;  %v2430_v28 = vadd.f32 %v2429_v60, %v2415_v59  ;;  %v6614_v60 = vld [vmem:[#allocation7 + $0x390] sm:$0xf]  ;;  %v6686_v61 = vld [vmem:[#allocation7 + $0x420] sm:$0xf]  ;;  %v7732_v34 = vld [vmem:[#allocation7 + $0x428] sm:$0xf0] }
 0x140   :  { %4493 = vmatpush.bf16.msrb.mxu2 %v6399_v54  ;;  %4507 = vmatpush.bf16.msrb.mxu3 %v6495_v38  ;;  %v6458_v54 = vld [vmem:[#allocation7 + $0x258] sm:$0xf]  ;;  %v2714_v38 = vmul.f32 %v8310_v48, %v8310_v48  ;;  %v2905_v15 = vmul.f32 %v2881_v12, %v8306_v20  ;;  %v8347_v20 = vpack.c.bf16 %v2903_v40, %v2891_v44  ;;  %v8369_v32 = vmul.f32 0.5, %v8310_v48  ;;  %v6662_v3 = vld [vmem:[#allocation7 + $0x3f0] sm:$0xf] }
 0x141   :  { %v6459_v49 = vor.u32 %v7675_v50, %v6458_v54  ;;  %v8323_v13 = vadd.f32 %v2443_v17, %v2430_v28  ;;  %v8349_v12 = vpack.c.bf16 %v2904_v46, %v2892_v27  ;;  %v6615_v16 = vor.u32 %v7714_v10, %v6614_v60  ;;  %v6806_v28 = vld [vmem:[#allocation7 + $0x510] sm:$0xf]  ;;  %v7762_v54 = vld [vmem:[#allocation7 + $0x518] sm:$0xf0]  ;;  %v7756_v60 = vld [vmem:[#allocation7 + $0x4e8] sm:$0xf0] }
 0x142   :  { %4466 = vmatpush.bf16.msrb.mxu0 %v6195_v31  ;;  %v7624_v31 = vld [vmem:[#allocation7 + $0xc8] sm:$0xf0]  ;;  %v2786_v53 = vmul.f32 0.044715, %v2714_v38  ;;  %v2822_v38 = vmul.f32 %v8315_v14, %v8313_v58  ;;  %v6590_v58 = vld [vmem:[#allocation7 + $0x360] sm:$0xf]  ;;  %v6807_v14 = vor.u32 %v7762_v54, %v6806_v28 }
 0x143   :  { %4480 = vmatpush.bf16.msrb.mxu1 %v6291_v43  ;;  %v7648_v43 = vld [vmem:[#allocation7 + $0x188] sm:$0xf0]  ;;  %v2469_v51 = vpop.f32.mrf.mxu3  ;;  %v6255_v18 = vor.u32 %v7624_v31, %v6254_v30  ;;  %v2715_v6 = vmul.f32 %v8323_v13, %v8323_v13  ;;  %v7735_v30 = vld [vmem:[#allocation7 + $0x440] sm:$0xf0]  ;;  %v6591_v46 = vor.u32 %v7708_v35, %v6590_v58  ;;  %v7777_v48 = vld [vmem:[#allocation7 + $0x590] sm:$0xf0] }
 0x144   :  { %4494 = vmatpush.bf16.msrb.mxu2 %v6387_v5  ;;  %4508 = vmatpush.bf16.msrb.mxu3 %v6483_v8  ;;  %v6446_v5 = vld [vmem:[#allocation7 + $0x240] sm:$0xf]  ;;  %v6626_v8 = vld [vmem:[#allocation7 + $0x3a8] sm:$0xf]  ;;  %v6351_v59 = vor.u32 %v7648_v43, %v6350_v52  ;;  %v2810_v11 = vadd.f32 1.0, %v2786_v53  ;;  %v6603_v52 = vor.u32 %v7711_v62, %v6602_v2  ;;  %7913 = vtanh.f32 %v2822_v38 }
 0x145   :  { %v6447_v22 = vor.u32 %v7672_v39, %v6446_v5  ;;  %v6627_v33 = vor.u32 %v7717_v36, %v6626_v8  ;;  %v2787_v17 = vmul.f32 0.044715, %v2715_v6  ;;  %v6794_v39 = vld [vmem:[#allocation7 + $0x4f8] sm:$0xf]  ;;  %v7759_v8 = vld [vmem:[#allocation7 + $0x500] sm:$0xf0]  ;;  %v6699_v40 = vor.u32 %v7735_v30, %v6698_v29 }
 0x146   :  { %4467 = vmatpush.bf16.msrb.mxu0 %v6183_v4  ;;  %v6818_v4 = vld [vmem:[#allocation7 + $0x528] sm:$0xf]  ;;  %v8359_v43 = vpop.f32.mrf.mxu2  ;;  %v6890_v53 = vld [vmem:[#allocation7 + $0x5b8] sm:$0xf]  ;;  %v6878_v6 = vld [vmem:[#allocation7 + $0x5a0] sm:$0xf] }
 0x147   :  { %4481 = vmatpush.bf16.msrb.mxu1 %v6279_v9  ;;  %v7765_v9 = vld [vmem:[#allocation7 + $0x530] sm:$0xf0]  ;;  %v2811_v1 = vadd.f32 1.0, %v2787_v17  ;;  %v6566_v2 = vld [vmem:[#allocation7 + $0x330] sm:$0xf] }
 0x148   :  { %4495 = vmatpush.bf16.msrb.mxu2 %v6375_v47  ;;  %4509 = vmatpush.bf16.msrb.mxu3 %v6471_v19  ;;  %v2893_v47 = vmul.f32 %v2869_v57, %v8297_v25  ;;  %v6914_v19 = vld [vmem:[#allocation7 + $0x5e8] sm:$0xf]  ;;  %v2703_v25 = vmul.f32 %v8331_v45, %v8331_v45  ;;  %v6819_v57 = vor.u32 %v7765_v9, %v6818_v4  ;;  %v7753_v38 = vld [vmem:[#allocation7 + $0x4d0] sm:$0xf0] }
 0x149   :  { %v6915_v50 = vor.u32 %v7789_v37, %v6914_v19  ;;  %v6674_v19 = vld [vmem:[#allocation7 + $0x408] sm:$0xf]  ;;  %v7729_v37 = vld [vmem:[#allocation7 + $0x410] sm:$0xf0] }
 0x14a   :  { %4468 = vmatpush.bf16.msrb.mxu0 %v6171_v21  ;;  %v8354_v21 = vpack.c.bf16 %v2905_v15, %v2893_v47  ;;  %v2775_v31 = vmul.f32 0.044715, %v2703_v25  ;;  %v6687_v47 = vor.u32 %v7732_v34, %v6686_v61  ;;  %v7705_v15 = vld [vmem:[#allocation7 + $0x350] sm:$0xf0]  ;;  %v7699_v61 = vld [vmem:[#allocation7 + $0x320] sm:$0xf0] }
 0x14b   :  { %4482 = vmatpush.bf16.msrb.mxu1 %v6267_v26  ;;  %v7786_v26 = vld [vmem:[#allocation7 + $0x5d8] sm:$0xf0]  ;;  %v2471_v5 = vpop.f32.mrf.mxu3  ;;  %v6854_v34 = vld [vmem:[#allocation7 + $0x570] sm:$0xf] }
 0x14c   :  { %4496 = vmatpush.bf16.msrb.mxu2 %v6363_v0  ;;  %4510 = vmatpush.bf16.msrb.mxu3 %v6459_v49  ;;  %v2834_v0 = vmul.f32 %v2810_v11, %v2762_v42  ;;  %v2470_v49 = vadd.f32 %v2469_v51, %v2455_v24  ;;  %v6903_v36 = vor.u32 %v7786_v26, %v6902_v23  ;;  %v2751_v24 = vmul.f32 0.7978846, %v8331_v45  ;;  %v7914_v11 = vpop.eup %7913  ;;  %v6866_v23 = vld [vmem:[#allocation7 + $0x588] sm:$0xf] }
 0x14d   :  { %v2799_v51 = vadd.f32 1.0, %v2775_v31  ;;  %v2763_v42 = vmul.f32 0.7978846, %v8323_v13  ;;  %v2870_v26 = vadd.f32 1.0, %v7914_v11 }
 0x14e   :  { %4469 = vmatpush.bf16.msrb.mxu0 %v6159_v7  ;;  %v7783_v7 = vld [vmem:[#allocation7 + $0x5c0] sm:$0xf0]  ;;  %7915 = vtanh.f32 %v2834_v0  ;;  %v2472_v0 = vadd.f32 %v2471_v5, %v8359_v43  ;;  %v6867_v43 = vor.u32 %v7777_v48, %v6866_v23  ;;  %v2739_v23 = vmul.f32 0.5, %v8323_v13 }
 0x14f   :  { %4483 = vmatpush.bf16.msrb.mxu1 %v6255_v18  ;;  %v2483_v18 = vpop.f32.mrf.mxu0  ;;  %v6891_v4 = vor.u32 %v7783_v7, %v6890_v53  ;;  %v2835_v9 = vmul.f32 %v2811_v1, %v2763_v42  ;;  %v2497_v27 = vpop.f32.mrf.mxu1  ;;  %v2823_v25 = vmul.f32 %v2799_v51, %v2751_v24  ;;  %v6554_v1 = vld [vmem:[#allocation7 + $0x318] sm:$0xf]  ;;  %v7750_v53 = vld [vmem:[#allocation7 + $0x4b8] sm:$0xf0] }
 0x150   :  { %4497 = vmatpush.bf16.msrb.mxu2 %v6351_v59  ;;  %4511 = vmatpush.bf16.msrb.mxu3 %v6447_v22  ;;  %v6795_v59 = vor.u32 %v7759_v8, %v6794_v39  ;;  %v8363_v44 = vadd.f32 %v2483_v18, %v2470_v49  ;;  %v6578_v22 = vld [vmem:[#allocation7 + $0x348] sm:$0xf]  ;;  %v7774_v24 = vld [vmem:[#allocation7 + $0x578] sm:$0xf0]  ;;  %v6650_v18 = vld [vmem:[#allocation7 + $0x3d8] sm:$0xf] }
 0x151   :  { %4470 = vmatmul.bf16.vlgmr.msrb.gmra.mxu0 %v8343_v63  ;;  %v6579_v54 = vor.u32 %v7705_v15, %v6578_v22  ;;  %7917 = vtanh.f32 %v2835_v9  ;;  %v6746_v9 = vld [vmem:[#allocation7 + $0x498] sm:$0xf]  ;;  %v6855_v11 = vor.u32 %v7774_v24, %v6854_v34 }
 0x152   :  { %4518 = vmatpush.bf16.msra.mxu0 %v6627_v33  ;;  %4484 = vmatmul.bf16.vlgmr.msrb.gmra.mxu1 %v8347_v20  ;;  %v6782_v33 = vld [vmem:[#allocation7 + $0x4e0] sm:$0xf]  ;;  %v2704_v10 = vmul.f32 %v8363_v44, %v8363_v44  ;;  %v2752_v29 = vmul.f32 0.7978846, %v8363_v44  ;;  %7919 = vtanh.f32 %v2823_v25  ;;  %v6842_v25 = vld [vmem:[#allocation7 + $0x558] sm:$0xf] }
 0x153   :  { %4532 = vmatpush.bf16.msra.mxu1 %v6723_v56  ;;  %4498 = vmatmul.bf16.vlgmr.msrb.gmra.mxu2 %v8349_v12  ;;  %v7780_v56 = vld [vmem:[#allocation7 + $0x5a8] sm:$0xf0] }
 0x154   :  { %4512 = vmatmul.bf16.vlgmr.msrb.gmra.mxu3 %v8354_v21  ;;  %4546 = vmatpush.bf16.msra.mxu2 %v6819_v57  ;;  %v7702_v57 = vld [vmem:[#allocation7 + $0x338] sm:$0xf0]  ;;  %v7916_v62 = vpop.eup %7915  ;;  %v2776_v28 = vmul.f32 0.044715, %v2704_v10  ;;  %v6879_v17 = vor.u32 %v7780_v56, %v6878_v6  ;;  %v6555_v6 = vor.u32 %v7699_v61, %v6554_v1  ;;  %v8385_v10 = vld [vmem:[#allocation7 + $0x3c0] sm:$0xf] }
 0x155   :  { %4560 = vmatpush.bf16.msra.mxu3 %v6915_v50  ;;  %v6770_v50 = vld [vmem:[#allocation7 + $0x4c8] sm:$0xf]  ;;  %v2882_v49 = vadd.f32 1.0, %v7916_v62  ;;  %v6830_v1 = vld [vmem:[#allocation7 + $0x540] sm:$0xf] }
 0x156   :  { %4519 = vmatpush.bf16.msra.mxu0 %v6615_v16  ;;  %v6783_v16 = vor.u32 %v7756_v60, %v6782_v33  ;;  %v2800_v30 = vadd.f32 1.0, %v2776_v28  ;;  %v2511_v31 = vpop.f32.mrf.mxu2  ;;  %v6771_v39 = vor.u32 %v7753_v38, %v6770_v50  ;;  %v8381_v33 = vld [vmem:[#allocation7 + $0x300] sm:$0xf]  ;;  %v8383_v60 = vld [vmem:[#allocation7 + $0x308] sm:$0xf0] }
 0x157   :  { %4533 = vmatpush.bf16.msra.mxu1 %v6711_v41  ;;  %v6675_v41 = vor.u32 %v7729_v37, %v6674_v19  ;;  %v2485_v35 = vpop.f32.mrf.mxu0  ;;  %v2499_v56 = vpop.f32.mrf.mxu1  ;;  %v8387_v19 = vld [vmem:[#allocation7 + $0x3c8] sm:$0xf0]  ;;  %v8389_v37 = vld [vmem:[#allocation7 + $0x6a8] sm:$0xf]  ;;  %v7771_v28 = vld [vmem:[#allocation7 + $0x560] sm:$0xf0] }
 0x158   :  { %4547 = vmatpush.bf16.msra.mxu2 %v6807_v14  ;;  %v2525_v58 = vpop.f32.mrf.mxu3  ;;  %v7726_v14 = vld [vmem:[#allocation7 + $0x3f8] sm:$0xf0]  ;;  %v8373_v8 = vadd.f32 %v2485_v35, %v2472_v0  ;;  %v2824_v51 = vmul.f32 %v2800_v30, %v2752_v29  ;;  %v7106_v0 = vld [vmem:[#allocation7 + $0x768] sm:$0xf]  ;;  %v7837_v29 = vld [vmem:[#allocation7 + $0x770] sm:$0xf0]  ;;  %v6639_v13 = vor.u32 %v8387_v19, %v8385_v10 }
 0x159   :  { %4561 = vmatpush.bf16.msra.mxu3 %v6903_v36  ;;  %v6567_v36 = vor.u32 %v7702_v57, %v6566_v2  ;;  %v6663_v7 = vor.u32 %v7726_v14, %v6662_v3  ;;  %v2906_v57 = vmul.f32 %v2882_v49, %v8369_v32  ;;  %v7813_v3 = vld [vmem:[#allocation7 + $0x6b0] sm:$0xf0]  ;;  %v6734_v14 = vld [vmem:[#allocation7 + $0x480] sm:$0xf]  ;;  %v7744_v49 = vld [vmem:[#allocation7 + $0x488] sm:$0xf0]  ;;  %v7107_v34 = vor.u32 %v7837_v29, %v7106_v0 }
 0x15a   :  { %4520 = vmatpush.bf16.msra.mxu0 %v6603_v52  ;;  %v2512_v52 = vadd.f32 %v2511_v31, %v2497_v27  ;;  %v2716_v42 = vmul.f32 %v8373_v8, %v8373_v8  ;;  %v7747_v27 = vld [vmem:[#allocation7 + $0x4a0] sm:$0xf0]  ;;  %7921 = vtanh.f32 %v2824_v51  ;;  %v2764_v50 = vmul.f32 0.7978846, %v8373_v8  ;;  %v7810_v61 = vld [vmem:[#allocation7 + $0x698] sm:$0xf0] }
 0x15b   :  { %4534 = vmatpush.bf16.msra.mxu1 %v6699_v40  ;;  %v6758_v40 = vld [vmem:[#allocation7 + $0x4b0] sm:$0xf]  ;;  %v6747_v32 = vor.u32 %v7747_v27, %v6746_v9  ;;  %v6735_v51 = vor.u32 %v7744_v49, %v6734_v14  ;;  %v7825_v14 = vld [vmem:[#allocation7 + $0x710] sm:$0xf0] }
 0x15c   :  { %4548 = vmatpush.bf16.msra.mxu2 %v6795_v59  ;;  %v8375_v5 = vadd.f32 %v2525_v58, %v2512_v52  ;;  %v7723_v59 = vld [vmem:[#allocation7 + $0x3e0] sm:$0xf0]  ;;  %v2788_v15 = vmul.f32 0.044715, %v2716_v42  ;;  %v6543_v58 = vor.u32 %v8383_v60, %v8381_v33  ;;  %v6843_v52 = vor.u32 %v7771_v28, %v6842_v25  ;;  %v7094_v42 = vld [vmem:[#allocation7 + $0x750] sm:$0xf] }
 0x15d   :  { %4562 = vmatpush.bf16.msra.mxu3 %v6891_v4  ;;  %v6759_v4 = vor.u32 %v7750_v53, %v6758_v40  ;;  %v6651_v62 = vor.u32 %v7723_v59, %v6650_v18  ;;  %v7768_v40 = vld [vmem:[#allocation7 + $0x548] sm:$0xf0]  ;;  %v2727_v53 = vmul.f32 0.5, %v8331_v45  ;;  %v7834_v18 = vld [vmem:[#allocation7 + $0x758] sm:$0xf0]  ;;  %v2728_v25 = vmul.f32 0.5, %v8363_v44 }
 0x15e   :  { %4521 = vmatpush.bf16.msra.mxu0 %v6591_v46  ;;  %v7918_v46 = vpop.eup %7917  ;;  %v2705_v22 = vmul.f32 %v8375_v5, %v8375_v5  ;;  %v2812_v38 = vadd.f32 1.0, %v2788_v15  ;;  %v6986_v33 = vld [vmem:[#allocation7 + $0x678] sm:$0xf]  ;;  %v6831_v45 = vor.u32 %v7768_v40, %v6830_v1  ;;  %v7807_v15 = vld [vmem:[#allocation7 + $0x680] sm:$0xf0] }
 0x15f   :  { %4535 = vmatpush.bf16.msra.mxu1 %v6687_v47  ;;  %v2894_v47 = vmul.f32 %v2870_v26, %v2726_v55  ;;  %v7920_v2 = vpop.eup %7919  ;;  %v6962_v44 = vld [vmem:[#allocation7 + $0x648] sm:$0xf]  ;;  %v6950_v1 = vld [vmem:[#allocation7 + $0x630] sm:$0xf] }
 0x160   :  { %4549 = vmatpush.bf16.msra.mxu2 %v6783_v16  ;;  %v2753_v16 = vmul.f32 0.7978846, %v8375_v5  ;;  %v2777_v55 = vmul.f32 0.044715, %v2705_v22  ;;  %v2871_v30 = vadd.f32 1.0, %v7920_v2  ;;  %v2836_v31 = vmul.f32 %v2812_v38, %v2764_v50  ;;  %v7922_v59 = vpop.eup %7921 }
 0x161   :  { %4563 = vmatpush.bf16.msra.mxu3 %v6879_v17  ;;  %v2513_v17 = vpop.f32.mrf.mxu2  ;;  %v8405_v22 = vpack.c.bf16 %v2906_v57, %v2894_v47  ;;  %v2872_v10 = vadd.f32 1.0, %v7922_v59  ;;  %v7082_v47 = vld [vmem:[#allocation7 + $0x738] sm:$0xf]  ;;  %v2740_v2 = vmul.f32 0.5, %v8373_v8  ;;  %v2729_v8 = vmul.f32 0.5, %v8375_v5 }
 0x162   :  { %4522 = vmatpush.bf16.msra.mxu0 %v6579_v54  ;;  %v2883_v54 = vadd.f32 1.0, %v7918_v46  ;;  %v2801_v48 = vadd.f32 1.0, %v2777_v55  ;;  %v2514_v26 = vadd.f32 %v2513_v17, %v2499_v56  ;;  %7923 = vtanh.f32 %v2836_v31  ;;  %v6974_v55 = vld [vmem:[#allocation7 + $0x660] sm:$0xf]  ;;  %v7861_v31 = vld [vmem:[#allocation7 + $0x830] sm:$0xf0] }
 0x163   :  { %4536 = vmatpush.bf16.msra.mxu1 %v6675_v41  ;;  %v2527_v41 = vpop.f32.mrf.mxu3  ;;  %v2895_v46 = vmul.f32 %v2871_v30, %v2727_v53  ;;  %v7095_v56 = vor.u32 %v7834_v18, %v7094_v42  ;;  %v2896_v50 = vmul.f32 %v2872_v10, %v2728_v25  ;;  %v7070_v17 = vld [vmem:[#allocation7 + $0x720] sm:$0xf]  ;;  %v7202_v30 = vld [vmem:[#allocation7 + $0x828] sm:$0xf]  ;;  %v7798_v5 = vld [vmem:[#allocation7 + $0x638] sm:$0xf0] }
 0x164   :  { %4550 = vmatpush.bf16.msra.mxu2 %v6771_v39  ;;  %v2825_v35 = vmul.f32 %v2801_v48, %v2753_v16  ;;  %v8397_v39 = vadd.f32 %v2527_v41, %v2514_v26  ;;  %v7828_v41 = vld [vmem:[#allocation7 + $0x728] sm:$0xf0]  ;;  %v7801_v48 = vld [vmem:[#allocation7 + $0x650] sm:$0xf0]  ;;  %v7203_v49 = vor.u32 %v7861_v31, %v7202_v30 }
 0x165   :  { %4564 = vmatpush.bf16.msra.mxu3 %v6867_v43  ;;  %v2907_v43 = vmul.f32 %v2883_v54, %v2739_v23  ;;  %v7071_v29 = vor.u32 %v7828_v41, %v7070_v17  ;;  %v7644_v31 = vld [vmem:[#allocation7 + $0x16c] sm:$0xf] }
 0x166   :  { %4523 = vmatpush.bf16.msra.mxu0 %v6567_v36  ;;  %v7011_v36 = vor.u32 %v7813_v3, %v8389_v37  ;;  %v2717_v24 = vmul.f32 %v8397_v39, %v8397_v39  ;;  %7925 = vtanh.f32 %v2825_v35  ;;  %v2765_v60 = vmul.f32 0.7978846, %v8397_v39  ;;  %v7831_v37 = vld [vmem:[#allocation7 + $0x740] sm:$0xf0] }
 0x167   :  { %4537 = vmatpush.bf16.msra.mxu1 %v6663_v7  ;;  %v6998_v7 = vld [vmem:[#allocation7 + $0x690] sm:$0xf]  ;;  %v7083_v28 = vor.u32 %v7831_v37, %v7082_v47  ;;  %v7178_v47 = vld [vmem:[#allocation7 + $0x7f8] sm:$0xf]  ;;  %v7855_v37 = vld [vmem:[#allocation7 + $0x800] sm:$0xf0] }
 0x168   :  { %4551 = vmatpush.bf16.msra.mxu2 %v6759_v4  ;;  %v2789_v4 = vmul.f32 0.044715, %v2717_v24  ;;  %v6999_v9 = vor.u32 %v7810_v61, %v6998_v7  ;;  %v7924_v27 = vpop.eup %7923  ;;  %v7190_v7 = vld [vmem:[#allocation7 + $0x810] sm:$0xf]  ;;  %v7858_v61 = vld [vmem:[#allocation7 + $0x818] sm:$0xf0] }
 0x169   :  { %4565 = vmatpush.bf16.msra.mxu3 %v6855_v11  ;;  %v6987_v11 = vor.u32 %v7807_v15, %v6986_v33  ;;  %v2884_v57 = vadd.f32 1.0, %v7924_v27  ;;  %v7046_v24 = vld [vmem:[#allocation7 + $0x6f0] sm:$0xf]  ;;  %v7191_v42 = vor.u32 %v7858_v61, %v7190_v7  ;;  %v7795_v33 = vld [vmem:[#allocation7 + $0x620] sm:$0xf0] }
 0x16a   :  { %4524 = vmatpush.bf16.msra.mxu0 %v6555_v6  ;;  %v8408_v6 = vpack.c.bf16 %v2907_v43, %v2895_v46  ;;  %v2813_v19 = vadd.f32 1.0, %v2789_v4  ;;  %v6938_v46 = vld [vmem:[#allocation7 + $0x618] sm:$0xf]  ;;  %v7298_v27 = vld [vmem:[#allocation7 + $0x8e8] sm:$0xf] }
 0x16b   :  { %4538 = vmatpush.bf16.msra.mxu1 %v6651_v62  ;;  %v7804_v62 = vld [vmem:[#allocation7 + $0x668] sm:$0xf0]  ;;  %v2908_v38 = vmul.f32 %v2884_v57, %v2740_v2  ;;  %v6926_v57 = vld [vmem:[#allocation7 + $0x600] sm:$0xf]  ;;  %v7274_v7 = vld [vmem:[#allocation7 + $0x8b8] sm:$0xf] }
 0x16c   :  { %4552 = vmatpush.bf16.msra.mxu2 %v6747_v32  ;;  %v2837_v16 = vmul.f32 %v2813_v19, %v2765_v60  ;;  %v7926_v54 = vpop.eup %7925  ;;  %v6975_v3 = vor.u32 %v7804_v62, %v6974_v55  ;;  %v7819_v19 = vld [vmem:[#allocation7 + $0x6e0] sm:$0xf0]  ;;  %v7179_v55 = vor.u32 %v7855_v37, %v7178_v47  ;;  %v7638_v37 = vld [vmem:[#allocation7 + $0x13c] sm:$0xf] }
 0x16d   :  { %4566 = vmatpush.bf16.msra.mxu3 %v6843_v52  ;;  %v8414_v23 = vpack.c.bf16 %v2908_v38, %v2896_v50  ;;  %v2873_v26 = vadd.f32 1.0, %v7926_v54  ;;  %v2741_v52 = vmul.f32 0.5, %v8397_v39  ;;  %v6951_v39 = vor.u32 %v7798_v5, %v6950_v1  ;;  %v7620_v54 = vld [vmem:[#allocation7 + $0xac] sm:$0xf]  ;;  %v6244_v50 = vld [vmem:[#allocation7 + $0xb4] sm:$0xf0] }
 0x16e   :  { %4525 = vmatpush.bf16.msra.mxu0 %v6543_v58  ;;  %7927 = vtanh.f32 %v2837_v16  ;;  %v2539_v32 = vpop.f32.mrf.mxu0  ;;  %v7058_v58 = vld [vmem:[#allocation7 + $0x708] sm:$0xf]  ;;  %v7792_v16 = vld [vmem:[#allocation7 + $0x608] sm:$0xf0]  ;;  %v7022_v38 = vld [vmem:[#allocation7 + $0x6c0] sm:$0xf] }
 0x16f   :  { %4539 = vmatpush.bf16.msra.mxu1 %v6639_v13  ;;  %v2553_v0 = vpop.f32.mrf.mxu1  ;;  %v2897_v40 = vmul.f32 %v2873_v26, %v2729_v8  ;;  %v7059_v43 = vor.u32 %v7825_v14, %v7058_v58  ;;  %v7816_v8 = vld [vmem:[#allocation7 + $0x6c8] sm:$0xf0]  ;;  %v6340_v58 = vld [vmem:[#allocation7 + $0x174] sm:$0xf0]  ;;  %v7641_v5 = vld [vmem:[#allocation7 + $0x154] sm:$0xf] }
 0x170   :  { %4553 = vmatpush.bf16.msra.mxu2 %v6735_v51  ;;  %v2554_v35 = vadd.f32 %v2553_v0, %v2539_v32  ;;  %v7822_v51 = vld [vmem:[#allocation7 + $0x6f8] sm:$0xf0]  ;;  %v7286_v32 = vld [vmem:[#allocation7 + $0x8d0] sm:$0xf]  ;;  %v7023_v1 = vor.u32 %v7816_v8, %v7022_v38  ;;  %v7879_v61 = vld [vmem:[#allocation7 + $0x8c0] sm:$0xf0] }
 0x171   :  { %4526 = vmatmul.bf16.vlgmr.msra.gmra.mxu0 %v8405_v22  ;;  %4567 = vmatpush.bf16.msra.mxu3 %v6831_v45  ;;  %v7034_v45 = vld [vmem:[#allocation7 + $0x6d8] sm:$0xf]  ;;  %v7047_v10 = vor.u32 %v7822_v51, %v7046_v24  ;;  %v7882_v0 = vld [vmem:[#allocation7 + $0x8d8] sm:$0xf0]  ;;  %v6328_v51 = vld [vmem:[#allocation7 + $0x15c] sm:$0xf0] }
 0x172   :  { %4574 = vmatpush.bf16.msrb.mxu0 %v7011_v36  ;;  %4540 = vmatmul.bf16.vlgmr.msra.gmra.mxu1 %v8408_v6  ;;  %v6963_v36 = vor.u32 %v7801_v48, %v6962_v44  ;;  %v7035_v41 = vor.u32 %v7819_v19, %v7034_v45  ;;  %v7852_v44 = vld [vmem:[#allocation7 + $0x7e8] sm:$0xf0]  ;;  %v7287_v14 = vor.u32 %v7882_v0, %v7286_v32  ;;  %v7142_v45 = vld [vmem:[#allocation7 + $0x7b0] sm:$0xf]  ;;  %v7873_v38 = vld [vmem:[#allocation7 + $0x890] sm:$0xf0] }
 0x173   :  { %4588 = vmatpush.bf16.msrb.mxu1 %v7107_v34  ;;  %4554 = vmatmul.bf16.vlgmr.msra.gmra.mxu2 %v8414_v23  ;;  %v7876_v19 = vld [vmem:[#allocation7 + $0x8a8] sm:$0xf0]  ;;  %v6196_v0 = vld [vmem:[#allocation7 + $0x54] sm:$0xf0] }
 0x174   :  { %v7928_v13 = vpop.eup %7927  ;;  %4602 = vmatpush.bf16.msrb.mxu2 %v7203_v49  ;;  %v6927_v49 = vor.u32 %v7792_v16, %v6926_v57  ;;  %v7130_v57 = vld [vmem:[#allocation7 + $0x798] sm:$0xf]  ;;  %v7843_v16 = vld [vmem:[#allocation7 + $0x7a0] sm:$0xf0]  ;;  %v7608_v32 = vld [vmem:[#allocation7 + $0x4c] sm:$0xf] }
 0x175   :  { %v2885_v53 = vadd.f32 1.0, %v7928_v13  ;;  %v6247_v13 = vor.u32 %v7620_v54, %v6244_v50  ;;  %v7131_v50 = vor.u32 %v7843_v16, %v7130_v57  ;;  %v7626_v16 = vld [vmem:[#allocation7 + $0xdc] sm:$0xf] }
 0x176   :  { %4575 = vmatpush.bf16.msrb.mxu0 %v6999_v9  ;;  %v2567_v34 = vpop.f32.mrf.mxu2  ;;  %v2541_v15 = vpop.f32.mrf.mxu0 }
 0x177   :  { %4589 = vmatpush.bf16.msrb.mxu1 %v7095_v56  ;;  %v2909_v18 = vmul.f32 %v2885_v53, %v2741_v52  ;;  %v8419_v59 = vadd.f32 %v2567_v34, %v2554_v35  ;;  %v2555_v56 = vpop.f32.mrf.mxu1  ;;  %v7617_v52 = vld [vmem:[#allocation7 + $0x94] sm:$0xf]  ;;  %v6343_v53 = vor.u32 %v7644_v31, %v6340_v58  ;;  %v7118_v31 = vld [vmem:[#allocation7 + $0x780] sm:$0xf]  ;;  %v7840_v58 = vld [vmem:[#allocation7 + $0x788] sm:$0xf0] }
 0x178   :  { %4603 = vmatpush.bf16.msrb.mxu2 %v7191_v42  ;;  %v2556_v2 = vadd.f32 %v2555_v56, %v2541_v15  ;;  %v6331_v15 = vor.u32 %v7641_v5, %v6328_v51  ;;  %v6199_v51 = vor.u32 %v7608_v32, %v6196_v0  ;;  %v6532_v32 = vld [vmem:[#allocation7 + $0x2f4] sm:$0xf0]  ;;  %v7599_v0 = vld [vmem:[#allocation7 + $0x4] sm:$0xf] }
 0x179   :  { %v2706_v60 = vmul.f32 %v8419_v59, %v8419_v59  ;;  %v2754_v4 = vmul.f32 0.7978846, %v8419_v59  ;;  %v8424_v9 = vpack.c.bf16 %v2909_v18, %v2897_v40  ;;  %v7154_v40 = vld [vmem:[#allocation7 + $0x7c8] sm:$0xf]  ;;  %v7275_v18 = vor.u32 %v7879_v61, %v7274_v7 }
 0x17a   :  { %4576 = vmatpush.bf16.msrb.mxu0 %v6987_v11  ;;  %v7885_v11 = vld [vmem:[#allocation7 + $0x8f0] sm:$0xf0] }
 0x17b   :  { %4590 = vmatpush.bf16.msrb.mxu1 %v7083_v28  ;;  %v2778_v25 = vmul.f32 0.044715, %v2706_v60  ;;  %4568 = vmatmul.bf16.vlgmr.msra.gmra.mxu3 %v8424_v9  ;;  %v7299_v62 = vor.u32 %v7885_v11, %v7298_v27  ;;  %v6939_v28 = vor.u32 %v7795_v33, %v6938_v46  ;;  %v7846_v60 = vld [vmem:[#allocation7 + $0x7b8] sm:$0xf0]  ;;  %v6316_v27 = vld [vmem:[#allocation7 + $0x144] sm:$0xf0] }
 0x17c   :  { %4604 = vmatpush.bf16.msrb.mxu2 %v7179_v55  ;;  %v7143_v56 = vor.u32 %v7846_v60, %v7142_v45  ;;  %v7250_v55 = vld [vmem:[#allocation7 + $0x888] sm:$0xf]  ;;  %v6319_v54 = vor.u32 %v7638_v37, %v6316_v27  ;;  %v7867_v45 = vld [vmem:[#allocation7 + $0x860] sm:$0xf0]  ;;  %v7665_v60 = vld [vmem:[#allocation7 + $0x214] sm:$0xf] }
 0x17d   :  { %v2802_v17 = vadd.f32 1.0, %v2778_v25  ;;  %4616 = vmatpush.bf16.msrb.mxu3 %v7299_v62  ;;  %v7611_v62 = vld [vmem:[#allocation7 + $0x64] sm:$0xf]  ;;  %v7602_v37 = vld [vmem:[#allocation7 + $0x1c] sm:$0xf] }
 0x17e   :  { %4577 = vmatpush.bf16.msrb.mxu0 %v6975_v3  ;;  %v7166_v3 = vld [vmem:[#allocation7 + $0x7e0] sm:$0xf]  ;;  %v2569_v48 = vpop.f32.mrf.mxu2  ;;  %v6172_v27 = vld [vmem:[#allocation7 + $0x24] sm:$0xf0] }
 0x17f   :  { %4591 = vmatpush.bf16.msrb.mxu1 %v7071_v29  ;;  %v7167_v26 = vor.u32 %v7852_v44, %v7166_v3  ;;  %v2826_v29 = vmul.f32 %v2802_v17, %v2754_v4  ;;  %v8427_v30 = vadd.f32 %v2569_v48, %v2556_v2  ;;  %v6220_v4 = vld [vmem:[#allocation7 + $0x84] sm:$0xf0]  ;;  %v7635_v17 = vld [vmem:[#allocation7 + $0x124] sm:$0xf]  ;;  %v7251_v3 = vor.u32 %v7873_v38, %v7250_v55  ;;  %v7864_v38 = vld [vmem:[#allocation7 + $0x848] sm:$0xf0] }
 0x180   :  { %v2730_v44 = vmul.f32 0.5, %v8419_v59  ;;  %v6268_v55 = vld [vmem:[#allocation7 + $0xe4] sm:$0xf0] }
 0x181   :  { %v2718_v35 = vmul.f32 %v8427_v30, %v8427_v30  ;;  %4605 = vmatpush.bf16.msrb.mxu2 %v7167_v26  ;;  %7929 = vtanh.f32 %v2826_v29  ;;  %4617 = vmatpush.bf16.msrb.mxu3 %v7287_v14  ;;  %v2766_v34 = vmul.f32 0.7978846, %v8427_v30  ;;  %v2742_v8 = vmul.f32 0.5, %v8427_v30  ;;  %v2581_v26 = vpop.f32.mrf.mxu3  ;;  %v7238_v14 = vld [vmem:[#allocation7 + $0x870] sm:$0xf] }
 0x182   :  { %4578 = vmatpush.bf16.msrb.mxu0 %v6963_v36  ;;  %v6232_v36 = vld [vmem:[#allocation7 + $0x9c] sm:$0xf0]  ;;  %v7632_v30 = vld [vmem:[#allocation7 + $0x10c] sm:$0xf] }
 0x183   :  { %4592 = vmatpush.bf16.msrb.mxu1 %v7059_v43  ;;  %v7849_v43 = vld [vmem:[#allocation7 + $0x7d0] sm:$0xf0]  ;;  %v2790_v24 = vmul.f32 0.044715, %v2718_v35  ;;  %v6235_v33 = vor.u32 %v7617_v52, %v6232_v36  ;;  %v7119_v35 = vor.u32 %v7840_v58, %v7118_v31  ;;  %v7668_v36 = vld [vmem:[#allocation7 + $0x22c] sm:$0xf] }
 0x184   :  { %v7155_v42 = vor.u32 %v7849_v43, %v7154_v40 }
 0x185   :  { %v2814_v46 = vadd.f32 1.0, %v2790_v24  ;;  %4618 = vmatpush.bf16.msrb.mxu3 %v7275_v18  ;;  %v6184_v18 = vld [vmem:[#allocation7 + $0x3c] sm:$0xf0] }
 0x186   :  { %4579 = vmatpush.bf16.msrb.mxu0 %v6951_v39  ;;  %v7614_v39 = vld [vmem:[#allocation7 + $0x7c] sm:$0xf]  ;;  %4606 = vmatpush.bf16.msrb.mxu2 %v7155_v42  ;;  %v7605_v42 = vld [vmem:[#allocation7 + $0x34] sm:$0xf] }
 0x187   :  { %4593 = vmatpush.bf16.msrb.mxu1 %v7047_v10  ;;  %v7262_v10 = vld [vmem:[#allocation7 + $0x8a0] sm:$0xf]  ;;  %v2838_v47 = vmul.f32 %v2814_v46, %v2766_v34  ;;  %v7930_v25 = vpop.eup %7929  ;;  %v6223_v2 = vor.u32 %v7614_v39, %v6220_v4  ;;  %v7226_v39 = vld [vmem:[#allocation7 + $0x858] sm:$0xf]  ;;  %v6187_v57 = vor.u32 %v7605_v42, %v6184_v18  ;;  %v7713_v42 = vld [vmem:[#allocation7 + $0x394] sm:$0xf] }
 0x188   :  { %v7263_v11 = vor.u32 %v7876_v19, %v7262_v10  ;;  %v2874_v48 = vadd.f32 1.0, %v7930_v25  ;;  %v6424_v4 = vld [vmem:[#allocation7 + $0x21c] sm:$0xf0]  ;;  %v7227_v19 = vor.u32 %v7867_v45, %v7226_v39  ;;  %v7656_v45 = vld [vmem:[#allocation7 + $0x1cc] sm:$0xf] }
 0x189   :  { %7931 = vtanh.f32 %v2838_v47  ;;  %v6280_v10 = vld [vmem:[#allocation7 + $0xfc] sm:$0xf0] }
 0x18a   :  { %4580 = vmatpush.bf16.msrb.mxu0 %v6939_v28  ;;  %v6208_v28 = vld [vmem:[#allocation7 + $0x6c] sm:$0xf0]  ;;  %4607 = vmatpush.bf16.msrb.mxu2 %v7143_v56  ;;  %v2898_v61 = vmul.f32 %v2874_v48, %v2730_v44  ;;  %v7629_v56 = vld [vmem:[#allocation7 + $0xf4] sm:$0xf]  ;;  %v6616_v18 = vld [vmem:[#allocation7 + $0x39c] sm:$0xf0] }
 0x18b   :  { %4594 = vmatpush.bf16.msrb.mxu1 %v7035_v41  ;;  %v6304_v41 = vld [vmem:[#allocation7 + $0x12c] sm:$0xf0]  ;;  %4619 = vmatpush.bf16.msrb.mxu3 %v7263_v11  ;;  %v6211_v29 = vor.u32 %v7611_v62, %v6208_v28  ;;  %v6427_v11 = vor.u32 %v7665_v60, %v6424_v4  ;;  %v7214_v62 = vld [vmem:[#allocation7 + $0x840] sm:$0xf]  ;;  %v2583_v28 = vpop.f32.mrf.mxu3  ;;  %v6388_v60 = vld [vmem:[#allocation7 + $0x1d4] sm:$0xf0] }
 0x18c   :  { %v6307_v52 = vor.u32 %v7635_v17, %v6304_v41  ;;  %v7662_v17 = vld [vmem:[#allocation7 + $0x1fc] sm:$0xf]  ;;  %v6412_v41 = vld [vmem:[#allocation7 + $0x204] sm:$0xf0] }
 0x18e   :  { %4581 = vmatpush.bf16.msrb.mxu0 %v6927_v49  ;;  %v2595_v49 = vpop.f32.mrf.mxu0  ;;  %4608 = vmatpush.bf16.msrb.mxu2 %v7131_v50  ;;  %v6283_v50 = vor.u32 %v7629_v56, %v6280_v10  ;;  %v7686_v56 = vld [vmem:[#allocation7 + $0x2bc] sm:$0xf]  ;;  %v6508_v10 = vld [vmem:[#allocation7 + $0x2c4] sm:$0xf0] }
 0x18f   :  { %4595 = vmatpush.bf16.msrb.mxu1 %v7023_v1  ;;  %v6436_v1 = vld [vmem:[#allocation7 + $0x234] sm:$0xf0]  ;;  %v7932_v59 = vpop.eup %7931  ;;  %v2596_v5 = vadd.f32 %v2595_v49, %v2581_v26  ;;  %v2609_v40 = vpop.f32.mrf.mxu1  ;;  %4620 = vmatpush.bf16.msrb.mxu3 %v7251_v3  ;;  %v7692_v26 = vld [vmem:[#allocation7 + $0x2ec] sm:$0xf]  ;;  %v6160_v49 = vld [vmem:[#allocation7 + $0xc] sm:$0xf0] }
 0x190   :  { %v6439_v7 = vor.u32 %v7668_v36, %v6436_v1  ;;  %v2886_v34 = vadd.f32 1.0, %v7932_v59  ;;  %v6535_v31 = vor.u32 %v7692_v26, %v6532_v32  ;;  %v7659_v36 = vld [vmem:[#allocation7 + $0x1e4] sm:$0xf]  ;;  %v6400_v1 = vld [vmem:[#allocation7 + $0x1ec] sm:$0xf0] }
 0x191   :  { %v8434_v24 = vadd.f32 %v2609_v40, %v2596_v5  ;;  %v7689_v59 = vld [vmem:[#allocation7 + $0x2d4] sm:$0xf]  ;;  %v6484_v32 = vld [vmem:[#allocation7 + $0x294] sm:$0xf0] }
 0x192   :  { %4630 = vmatpush.bf16.msra.mxu0 %v6247_v13  ;;  %v7870_v13 = vld [vmem:[#allocation7 + $0x878] sm:$0xf0]  ;;  %v2910_v46 = vmul.f32 %v2886_v34, %v2742_v8  ;;  %4609 = vmatpush.bf16.msrb.mxu2 %v7119_v35  ;;  %v7215_v8 = vor.u32 %v7864_v38, %v7214_v62  ;;  %v6628_v35 = vld [vmem:[#allocation7 + $0x3b4] sm:$0xf0] }
 0x193   :  { %4644 = vmatpush.bf16.msra.mxu1 %v6343_v53  ;;  %v6292_v53 = vld [vmem:[#allocation7 + $0x114] sm:$0xf0]  ;;  %v7239_v43 = vor.u32 %v7870_v13, %v7238_v14  ;;  %v2755_v25 = vmul.f32 0.7978846, %v8434_v24  ;;  %v6175_v14 = vor.u32 %v7602_v37, %v6172_v27  ;;  %v6271_v13 = vor.u32 %v7626_v16, %v6268_v55  ;;  %v6376_v16 = vld [vmem:[#allocation7 + $0x1bc] sm:$0xf0] }
 0x194   :  { %v8438_v47 = vpack.c.bf16 %v2910_v46, %v2898_v61  ;;  %v6604_v55 = vld [vmem:[#allocation7 + $0x384] sm:$0xf0] }
 0x195   :  { %4621 = vmatpush.bf16.msrb.mxu3 %v7239_v43  ;;  %v6520_v43 = vld [vmem:[#allocation7 + $0x2dc] sm:$0xf0] }
 0x196   :  { %4631 = vmatpush.bf16.msra.mxu0 %v6235_v33  ;;  %v6295_v33 = vor.u32 %v7632_v30, %v6292_v53  ;;  %4658 = vmatpush.bf16.msra.mxu2 %v6439_v7  ;;  %v7623_v30 = vld [vmem:[#allocation7 + $0xc4] sm:$0xf]  ;;  %v6256_v53 = vld [vmem:[#allocation7 + $0xcc] sm:$0xf0]  ;;  %v6403_v7 = vor.u32 %v7659_v36, %v6400_v1  ;;  %v6523_v61 = vor.u32 %v7689_v59, %v6520_v43  ;;  %v2623_v27 = vpop.f32.mrf.mxu2 }
 0x197   :  { %4645 = vmatpush.bf16.msra.mxu1 %v6331_v15  ;;  %v2707_v15 = vmul.f32 %v8434_v24, %v8434_v24  ;;  %4582 = vmatmul.bf16.vlgmr.msrb.gmra.mxu0 %v8438_v47  ;;  %v2611_v48 = vpop.f32.mrf.mxu1  ;;  %v7647_v59 = vld [vmem:[#allocation7 + $0x184] sm:$0xf] }
 0x199   :  { %4622 = vmatpush.bf16.msrb.mxu3 %v7227_v19  ;;  %v6511_v19 = vor.u32 %v7686_v56, %v6508_v10  ;;  %v7701_v10 = vld [vmem:[#allocation7 + $0x334] sm:$0xf] }
 0x19a   :  { %4632 = vmatpush.bf16.msra.mxu0 %v6223_v2  ;;  %v2779_v2 = vmul.f32 0.044715, %v2707_v15  ;;  %4659 = vmatpush.bf16.msra.mxu2 %v6427_v11  ;;  %v6391_v15 = vor.u32 %v7656_v45, %v6388_v60  ;;  %v2637_v11 = vpop.f32.mrf.mxu3  ;;  %v6712_v60 = vld [vmem:[#allocation7 + $0x45c] sm:$0xf0] }
 0x19b   :  { %4646 = vmatpush.bf16.msra.mxu1 %v6319_v54  ;;  %v2597_v54 = vpop.f32.mrf.mxu0 }
 0x19c   :  { %v2803_v3 = vadd.f32 1.0, %v2779_v2  ;;  %v2598_v44 = vadd.f32 %v2597_v54, %v2583_v28  ;;  %v7710_v2 = vld [vmem:[#allocation7 + $0x37c] sm:$0xf]  ;;  %v7683_v28 = vld [vmem:[#allocation7 + $0x2a4] sm:$0xf] }
 0x19d   :  { %4623 = vmatpush.bf16.msrb.mxu3 %v7215_v8  ;;  %v6496_v54 = vld [vmem:[#allocation7 + $0x2ac] sm:$0xf0] }
 0x19e   :  { %4633 = vmatpush.bf16.msra.mxu0 %v6211_v29  ;;  %v6415_v29 = vor.u32 %v7662_v17, %v6412_v41  ;;  %v8442_v58 = vadd.f32 %v2611_v48, %v2598_v44  ;;  %v2827_v5 = vmul.f32 %v2803_v3, %v2755_v25  ;;  %v6619_v25 = vor.u32 %v7713_v42, %v6616_v18  ;;  %v7650_v41 = vld [vmem:[#allocation7 + $0x19c] sm:$0xf]  ;;  %v6364_v3 = vld [vmem:[#allocation7 + $0x1a4] sm:$0xf0]  ;;  %v7680_v44 = vld [vmem:[#allocation7 + $0x28c] sm:$0xf] }
 0x19f   :  { %4647 = vmatpush.bf16.msra.mxu1 %v6307_v52  ;;  %v7716_v52 = vld [vmem:[#allocation7 + $0x3ac] sm:$0xf]  ;;  %v6607_v17 = vor.u32 %v7710_v2, %v6604_v55  ;;  %v7707_v48 = vld [vmem:[#allocation7 + $0x364] sm:$0xf]  ;;  %v6592_v8 = vld [vmem:[#allocation7 + $0x36c] sm:$0xf0]  ;;  %v6367_v26 = vor.u32 %v7650_v41, %v6364_v3 }
 0x1a0   :  { %v2719_v40 = vmul.f32 %v8442_v58, %v8442_v58  ;;  %4660 = vmatpush.bf16.msra.mxu2 %v6415_v29  ;;  %v2767_v39 = vmul.f32 0.7978846, %v8442_v58  ;;  %v6631_v46 = vor.u32 %v7716_v52, %v6628_v35  ;;  %7933 = vtanh.f32 %v2827_v5  ;;  %v7740_v52 = vld [vmem:[#allocation7 + $0x46c] sm:$0xf]  ;;  %v6724_v35 = vld [vmem:[#allocation7 + $0x474] sm:$0xf0] }
 0x1a1   :  { %4672 = vmatpush.bf16.msra.mxu3 %v6535_v31  ;;  %v6487_v29 = vor.u32 %v7680_v44, %v6484_v32  ;;  %v6595_v1 = vor.u32 %v7707_v48, %v6592_v8  ;;  %v6352_v5 = vld [vmem:[#allocation7 + $0x18c] sm:$0xf0]  ;;  %v7698_v2 = vld [vmem:[#allocation7 + $0x31c] sm:$0xf]  ;;  %v6700_v55 = vld [vmem:[#allocation7 + $0x444] sm:$0xf0] }
 0x1a2   :  { %4634 = vmatpush.bf16.msra.mxu0 %v6199_v51  ;;  %v2791_v34 = vmul.f32 0.044715, %v2719_v40  ;;  %v6163_v51 = vor.u32 %v7599_v0, %v6160_v49  ;;  %v7704_v49 = vld [vmem:[#allocation7 + $0x34c] sm:$0xf]  ;;  %v2638_v40 = vadd.f32 %v2637_v11, %v2623_v27  ;;  %v6355_v43 = vor.u32 %v7647_v59, %v6352_v5  ;;  %v7012_v59 = vld [vmem:[#allocation7 + $0x6b4] sm:$0xf0] }
 0x1a3   :  { %4648 = vmatpush.bf16.msra.mxu1 %v6295_v33  ;;  %v6259_v33 = vor.u32 %v7623_v30, %v6256_v53  ;;  %v2625_v30 = vpop.f32.mrf.mxu2  ;;  %v6580_v53 = vld [vmem:[#allocation7 + $0x354] sm:$0xf0] }
 0x1a4   :  { %v2815_v4 = vadd.f32 1.0, %v2791_v34  ;;  %4661 = vmatpush.bf16.msra.mxu2 %v6403_v7  ;;  %v7677_v7 = vld [vmem:[#allocation7 + $0x274] sm:$0xf]  ;;  %v6583_v45 = vor.u32 %v7704_v49, %v6580_v53 }
 0x1a5   :  { %4673 = vmatpush.bf16.msra.mxu3 %v6523_v61  ;;  %v6472_v61 = vld [vmem:[#allocation7 + $0x27c] sm:$0xf0] }
 0x1a6   :  { %4635 = vmatpush.bf16.msra.mxu0 %v6187_v57  ;;  %v2839_v37 = vmul.f32 %v2815_v4, %v2767_v39  ;;  %v7653_v57 = vld [vmem:[#allocation7 + $0x1b4] sm:$0xf]  ;;  %v7934_v38 = vpop.eup %7933  ;;  %v6475_v18 = vor.u32 %v7677_v7, %v6472_v61  ;;  %v7674_v4 = vld [vmem:[#allocation7 + $0x25c] sm:$0xf]  ;;  %v6676_v7 = vld [vmem:[#allocation7 + $0x414] sm:$0xf0] }
 0x1a7   :  { %4649 = vmatpush.bf16.msra.mxu1 %v6283_v50  ;;  %v6379_v62 = vor.u32 %v7653_v57, %v6376_v16  ;;  %v6499_v50 = vor.u32 %v7683_v28, %v6496_v54  ;;  %v2875_v0 = vadd.f32 1.0, %v7934_v38  ;;  %v7734_v16 = vld [vmem:[#allocation7 + $0x43c] sm:$0xf]  ;;  %v6556_v38 = vld [vmem:[#allocation7 + $0x324] sm:$0xf0] }
 0x1a8   :  { %7935 = vtanh.f32 %v2839_v37  ;;  %4662 = vmatpush.bf16.msra.mxu2 %v6391_v15  ;;  %v6460_v15 = vld [vmem:[#allocation7 + $0x264] sm:$0xf0]  ;;  %v6703_v32 = vor.u32 %v7734_v16, %v6700_v55 }
 0x1a9   :  { %4674 = vmatpush.bf16.msra.mxu3 %v6511_v19  ;;  %v6568_v19 = vld [vmem:[#allocation7 + $0x33c] sm:$0xf0]  ;;  %v6463_v37 = vor.u32 %v7674_v4, %v6460_v15 }
 0x1aa   :  { %4636 = vmatpush.bf16.msra.mxu0 %v6175_v14  ;;  %v2731_v14 = vmul.f32 0.5, %v8434_v24  ;;  %v2639_v24 = vpop.f32.mrf.mxu3  ;;  %v6571_v57 = vor.u32 %v7701_v10, %v6568_v19  ;;  %v7725_v19 = vld [vmem:[#allocation7 + $0x3f4] sm:$0xf] }
 0x1ab   :  { %4650 = vmatpush.bf16.msra.mxu1 %v6271_v13  ;;  %v2743_v13 = vmul.f32 0.5, %v8442_v58  ;;  %v6727_v58 = vor.u32 %v7740_v52, %v6724_v35  ;;  %v2640_v28 = vadd.f32 %v2639_v24, %v2625_v30  ;;  %v7695_v35 = vld [vmem:[#allocation7 + $0x304] sm:$0xf] }
 0x1ac   :  { %4663 = vmatpush.bf16.msra.mxu2 %v6379_v62  ;;  %v2899_v34 = vmul.f32 %v2875_v0, %v2731_v14  ;;  %v7671_v62 = vld [vmem:[#allocation7 + $0x244] sm:$0xf]  ;;  %v6688_v14 = vld [vmem:[#allocation7 + $0x42c] sm:$0xf0] }
 0x1ad   :  { %4675 = vmatpush.bf16.msra.mxu3 %v6499_v50 }
 0x1ae   :  { %4637 = vmatpush.bf16.msra.mxu0 %v6163_v51  ;;  %v7936_v31 = vpop.eup %7935  ;;  %v2651_v42 = vpop.f32.mrf.mxu0 }
 0x1af   :  { %4651 = vmatpush.bf16.msra.mxu1 %v6259_v33  ;;  %v2887_v36 = vadd.f32 1.0, %v7936_v31  ;;  %v8450_v39 = vadd.f32 %v2651_v42, %v2638_v40  ;;  %v2665_v11 = vpop.f32.mrf.mxu1  ;;  %v7731_v31 = vld [vmem:[#allocation7 + $0x424] sm:$0xf] }
 0x1b0   :  { %4664 = vmatpush.bf16.msra.mxu2 %v6367_v26  ;;  %v6691_v40 = vor.u32 %v7731_v31, %v6688_v14  ;;  %v7719_v31 = vld [vmem:[#allocation7 + $0x3c4] sm:$0xf] }
 0x1b1   :  { %4638 = vmatmul.bf16.vlgmr.msra.gmra.mxu0 %v8343_v63  ;;  %v2911_v51 = vmul.f32 %v2887_v36, %v2743_v13  ;;  %4676 = vmatpush.bf16.msra.mxu3 %v6487_v29  ;;  %v2708_v56 = vmul.f32 %v8450_v39, %v8450_v39  ;;  %v2756_v8 = vmul.f32 0.7978846, %v8450_v39  ;;  %v6559_v29 = vor.u32 %v7698_v2, %v6556_v38  ;;  %v6544_v13 = vld [vmem:[#allocation7 + $0x30c] sm:$0xf0]  ;;  %v7806_v2 = vld [vmem:[#allocation7 + $0x67c] sm:$0xf] }
 0x1b2   :  { %4686 = vmatpush.bf16.msrb.mxu0 %v6631_v46  ;;  %v7737_v46 = vld [vmem:[#allocation7 + $0x454] sm:$0xf]  ;;  %v6547_v53 = vor.u32 %v7695_v35, %v6544_v13  ;;  %v7803_v38 = vld [vmem:[#allocation7 + $0x664] sm:$0xf]  ;;  %v2732_v14 = vmul.f32 0.5, %v8450_v39 }
 0x1b3   :  { %v8452_v33 = vpack.c.bf16 %v2911_v51, %v2899_v34  ;;  %v2780_v27 = vmul.f32 0.044715, %v2708_v56  ;;  %v6640_v13 = vld [vmem:[#allocation7 + $0x3cc] sm:$0xf0] }
 0x1b4   :  { %4665 = vmatpush.bf16.msra.mxu2 %v6355_v43  ;;  %v7728_v43 = vld [vmem:[#allocation7 + $0x40c] sm:$0xf] }
 0x1b5   :  { %4596 = vmatmul.bf16.vlgmr.msrb.gmra.mxu1 %v8452_v33  ;;  %4677 = vmatpush.bf16.msra.mxu3 %v6475_v18  ;;  %v2804_v54 = vadd.f32 1.0, %v2780_v27  ;;  %v6679_v15 = vor.u32 %v7728_v43, %v6676_v7  ;;  %v6643_v7 = vor.u32 %v7719_v31, %v6640_v13  ;;  %v7791_v31 = vld [vmem:[#allocation7 + $0x604] sm:$0xf] }
 0x1b6   :  { %4687 = vmatpush.bf16.msrb.mxu0 %v6619_v25  ;;  %4700 = vmatpush.bf16.msrb.mxu1 %v6727_v58  ;;  %v6715_v25 = vor.u32 %v7737_v46, %v6712_v60  ;;  %v2679_v50 = vpop.f32.mrf.mxu2  ;;  %v2653_v44 = vpop.f32.mrf.mxu0  ;;  %v7809_v46 = vld [vmem:[#allocation7 + $0x694] sm:$0xf] }
 0x1b7   :  { %v2680_v41 = vadd.f32 %v2679_v50, %v2665_v11  ;;  %v8458_v26 = vadd.f32 %v2653_v44, %v2640_v28  ;;  %v2828_v49 = vmul.f32 %v2804_v54, %v2756_v8  ;;  %v2667_v51 = vpop.f32.mrf.mxu1  ;;  %v7722_v28 = vld [vmem:[#allocation7 + $0x3dc] sm:$0xf]  ;;  %v6652_v54 = vld [vmem:[#allocation7 + $0x3e4] sm:$0xf0]  ;;  %v6976_v44 = vld [vmem:[#allocation7 + $0x66c] sm:$0xf0] }
 0x1b8   :  { %v2693_v3 = vpop.f32.mrf.mxu3  ;;  %v6655_v8 = vor.u32 %v7722_v28, %v6652_v54  ;;  %v6940_v28 = vld [vmem:[#allocation7 + $0x624] sm:$0xf0] }
 0x1b9   :  { %4678 = vmatpush.bf16.msra.mxu3 %v6463_v37  ;;  %v8460_v0 = vadd.f32 %v2693_v3, %v2680_v41  ;;  %v2720_v52 = vmul.f32 %v8458_v26, %v8458_v26  ;;  %7937 = vtanh.f32 %v2828_v49  ;;  %v2768_v61 = vmul.f32 0.7978846, %v8458_v26  ;;  %v6664_v37 = vld [vmem:[#allocation7 + $0x3fc] sm:$0xf0] }
 0x1ba   :  { %4688 = vmatpush.bf16.msrb.mxu0 %v6607_v17  ;;  %v6448_v17 = vld [vmem:[#allocation7 + $0x24c] sm:$0xf0]  ;;  %4701 = vmatpush.bf16.msrb.mxu1 %v6715_v25  ;;  %v6667_v55 = vor.u32 %v7725_v19, %v6664_v37  ;;  %v2744_v49 = vmul.f32 0.5, %v8458_v26  ;;  %v7761_v26 = vld [vmem:[#allocation7 + $0x514] sm:$0xf] }
 0x1bb   :  { %v6451_v48 = vor.u32 %v7671_v62, %v6448_v17  ;;  %v2709_v36 = vmul.f32 %v8460_v0, %v8460_v0  ;;  %v2792_v5 = vmul.f32 0.044715, %v2720_v52  ;;  %v2757_v56 = vmul.f32 0.7978846, %v8460_v0  ;;  %v7788_v37 = vld [vmem:[#allocation7 + $0x5ec] sm:$0xf] }
 0x1bd   :  { %4679 = vmatpush.bf16.msra.mxu3 %v6451_v48  ;;  %v2781_v30 = vmul.f32 0.044715, %v2709_v36  ;;  %v2816_v34 = vadd.f32 1.0, %v2792_v5  ;;  %v6979_v36 = vor.u32 %v7803_v38, %v6976_v44  ;;  %v6784_v44 = vld [vmem:[#allocation7 + $0x4ec] sm:$0xf0] }
 0x1be   :  { %4689 = vmatpush.bf16.msrb.mxu0 %v6595_v1  ;;  %v7812_v1 = vld [vmem:[#allocation7 + $0x6ac] sm:$0xf]  ;;  %4702 = vmatpush.bf16.msrb.mxu1 %v6703_v32  ;;  %v2681_v24 = vpop.f32.mrf.mxu2 }
 0x1bf   :  { %v7015_v42 = vor.u32 %v7812_v1, %v7012_v59  ;;  %v2805_v18 = vadd.f32 1.0, %v2781_v30  ;;  %v2682_v58 = vadd.f32 %v2681_v24, %v2667_v51  ;;  %v2840_v60 = vmul.f32 %v2816_v34, %v2768_v61  ;;  %v7938_v16 = vpop.eup %7937  ;;  %v7764_v32 = vld [vmem:[#allocation7 + $0x52c] sm:$0xf]  ;;  %v7108_v59 = vld [vmem:[#allocation7 + $0x774] sm:$0xf0] }
 0x1c0   :  { %v2695_v4 = vpop.f32.mrf.mxu3  ;;  %v2876_v17 = vadd.f32 1.0, %v7938_v16  ;;  %v7836_v1 = vld [vmem:[#allocation7 + $0x76c] sm:$0xf]  ;;  %v6808_v51 = vld [vmem:[#allocation7 + $0x51c] sm:$0xf0] }
 0x1c1   :  { %v8468_v10 = vadd.f32 %v2695_v4, %v2682_v58  ;;  %7939 = vtanh.f32 %v2840_v60  ;;  %v2829_v11 = vmul.f32 %v2805_v18, %v2757_v56  ;;  %v7800_v30 = vld [vmem:[#allocation7 + $0x64c] sm:$0xf]  ;;  %v7111_v39 = vor.u32 %v7836_v1, %v7108_v59  ;;  %v7096_v18 = vld [vmem:[#allocation7 + $0x75c] sm:$0xf0]  ;;  %v7797_v58 = vld [vmem:[#allocation7 + $0x634] sm:$0xf] }
 0x1c2   :  { %4690 = vmatpush.bf16.msrb.mxu0 %v6583_v45  ;;  %v7000_v45 = vld [vmem:[#allocation7 + $0x69c] sm:$0xf0]  ;;  %4703 = vmatpush.bf16.msrb.mxu1 %v6691_v40  ;;  %v2900_v5 = vmul.f32 %v2876_v17, %v2732_v14  ;;  %v6811_v60 = vor.u32 %v7761_v26, %v6808_v51  ;;  %v7758_v4 = vld [vmem:[#allocation7 + $0x4fc] sm:$0xf]  ;;  %v6928_v14 = vld [vmem:[#allocation7 + $0x60c] sm:$0xf0] }
 0x1c3   :  { %v7003_v27 = vor.u32 %v7809_v46, %v7000_v45  ;;  %v2721_v25 = vmul.f32 %v8468_v10, %v8468_v10  ;;  %7941 = vtanh.f32 %v2829_v11  ;;  %v2769_v41 = vmul.f32 0.7978846, %v8468_v10  ;;  %v6952_v46 = vld [vmem:[#allocation7 + $0x63c] sm:$0xf0]  ;;  %v7830_v11 = vld [vmem:[#allocation7 + $0x73c] sm:$0xf] }
 0x1c4   :  { %v6955_v16 = vor.u32 %v7797_v58, %v6952_v46  ;;  %v7752_v1 = vld [vmem:[#allocation7 + $0x4cc] sm:$0xf]  ;;  %v6772_v59 = vld [vmem:[#allocation7 + $0x4d4] sm:$0xf0]  ;;  %v7619_v26 = vld [vmem:[#allocation7 + $0xa0] sm:$0xf0] }
 0x1c5   :  { %4652 = vmatmul.bf16.vlgmr.msra.gmra.mxu1 %v8347_v20  ;;  %v2793_v62 = vmul.f32 0.044715, %v2721_v25  ;;  %v2733_v25 = vmul.f32 0.5, %v8460_v0  ;;  %v7785_v0 = vld [vmem:[#allocation7 + $0x5d4] sm:$0xf] }
 0x1c6   :  { %4691 = vmatpush.bf16.msrb.mxu0 %v6571_v57  ;;  %v6988_v57 = vld [vmem:[#allocation7 + $0x684] sm:$0xf0]  ;;  %4704 = vmatpush.bf16.msrb.mxu1 %v6679_v15  ;;  %v7779_v58 = vld [vmem:[#allocation7 + $0x5a4] sm:$0xf]  ;;  %v6880_v46 = vld [vmem:[#allocation7 + $0x5ac] sm:$0xf0] }
 0x1c7   :  { %v6991_v50 = vor.u32 %v7806_v2, %v6988_v57  ;;  %v2817_v3 = vadd.f32 1.0, %v2793_v62  ;;  %v7940_v48 = vpop.eup %7939  ;;  %v6796_v15 = vld [vmem:[#allocation7 + $0x504] sm:$0xf0]  ;;  %v2745_v2 = vmul.f32 0.5, %v8468_v10  ;;  %v7794_v62 = vld [vmem:[#allocation7 + $0x61c] sm:$0xf] }
 0x1c8   :  { %v2888_v52 = vadd.f32 1.0, %v7940_v48  ;;  %v6799_v38 = vor.u32 %v7758_v4, %v6796_v15  ;;  %v6943_v48 = vor.u32 %v7794_v62, %v6940_v28  ;;  %v7048_v4 = vld [vmem:[#allocation7 + $0x6fc] sm:$0xf0]  ;;  %v7036_v62 = vld [vmem:[#allocation7 + $0x6e4] sm:$0xf0] }
 0x1c9   :  { %v2841_v35 = vmul.f32 %v2817_v3, %v2769_v41  ;;  %v7942_v61 = vpop.eup %7941  ;;  %v7755_v3 = vld [vmem:[#allocation7 + $0x4e4] sm:$0xf] }
 0x1ca   :  { %4692 = vmatpush.bf16.msrb.mxu0 %v6559_v29  ;;  %4705 = vmatpush.bf16.msrb.mxu1 %v6667_v55  ;;  %v6820_v29 = vld [vmem:[#allocation7 + $0x534] sm:$0xf0]  ;;  %v2912_v40 = vmul.f32 %v2888_v52, %v2744_v49  ;;  %v2877_v45 = vadd.f32 1.0, %v7942_v61  ;;  %v7084_v55 = vld [vmem:[#allocation7 + $0x744] sm:$0xf0]  ;;  %v6787_v49 = vor.u32 %v7755_v3, %v6784_v44  ;;  %v6775_v61 = vor.u32 %v7752_v1, %v6772_v59 }
 0x1cb   :  { %7943 = vtanh.f32 %v2841_v35  ;;  %v6823_v43 = vor.u32 %v7764_v32, %v6820_v29  ;;  %v7087_v41 = vor.u32 %v7830_v11, %v7084_v55  ;;  %v7827_v32 = vld [vmem:[#allocation7 + $0x724] sm:$0xf]  ;;  %v7072_v29 = vld [vmem:[#allocation7 + $0x72c] sm:$0xf0]  ;;  %v7622_v35 = vld [vmem:[#allocation7 + $0xb8] sm:$0xf0] }
 0x1cc   :  { %v8477_v34 = vpack.c.bf16 %v2912_v40, %v2900_v5  ;;  %v2901_v54 = vmul.f32 %v2877_v45, %v2733_v25  ;;  %v6250_v52 = vld [vmem:[#allocation7 + $0xb0] sm:$0xf]  ;;  %v6931_v5 = vor.u32 %v7791_v31, %v6928_v14  ;;  %v7782_v40 = vld [vmem:[#allocation7 + $0x5bc] sm:$0xf]  ;;  %v6748_v11 = vld [vmem:[#allocation7 + $0x4a4] sm:$0xf0] }
 0x1cd   :  { %v7818_v55 = vld [vmem:[#allocation7 + $0x6dc] sm:$0xf]  ;;  %v7773_v3 = vld [vmem:[#allocation7 + $0x574] sm:$0xf]  ;;  %v7024_v31 = vld [vmem:[#allocation7 + $0x6cc] sm:$0xf0] }
 0x1ce   :  { %4693 = vmatpush.bf16.msrb.mxu0 %v6547_v53  ;;  %v6964_v53 = vld [vmem:[#allocation7 + $0x654] sm:$0xf0]  ;;  %4706 = vmatpush.bf16.msrb.mxu1 %v6655_v8  ;;  %v6904_v8 = vld [vmem:[#allocation7 + $0x5dc] sm:$0xf0]  ;;  %v7039_v44 = vor.u32 %v7818_v55, %v7036_v62  ;;  %v6202_v14 = vld [vmem:[#allocation7 + $0x50] sm:$0xf] }
 0x1cf   :  { %v6967_v24 = vor.u32 %v7800_v30, %v6964_v53  ;;  %4610 = vmatmul.bf16.vlgmr.msrb.gmra.mxu2 %v8477_v34  ;;  %v6907_v13 = vor.u32 %v7785_v0, %v6904_v8  ;;  %v6892_v30 = vld [vmem:[#allocation7 + $0x5c4] sm:$0xf0]  ;;  %v6251_v53 = vor.u32 %v7622_v35, %v6250_v52  ;;  %v6856_v0 = vld [vmem:[#allocation7 + $0x57c] sm:$0xf0]  ;;  %v7204_v8 = vld [vmem:[#allocation7 + $0x834] sm:$0xf0] }
 0x1d0   :  { %4714 = vmatpush.bf16.msrb.mxu2 %v6823_v43  ;;  %v7824_v43 = vld [vmem:[#allocation7 + $0x70c] sm:$0xf]  ;;  %v6895_v51 = vor.u32 %v7782_v40, %v6892_v30  ;;  %v7610_v52 = vld [vmem:[#allocation7 + $0x58] sm:$0xf0]  ;;  %v6346_v35 = vld [vmem:[#allocation7 + $0x170] sm:$0xf] }
 0x1d1   :  { %4694 = vmatmul.bf16.vlgmr.msrb.gmra.mxu0 %v8405_v22  ;;  %v7944_v56 = vpop.eup %7943  ;;  %v6844_v40 = vld [vmem:[#allocation7 + $0x564] sm:$0xf0]  ;;  %v6203_v30 = vor.u32 %v7610_v52, %v6202_v14  ;;  %v7168_v55 = vld [vmem:[#allocation7 + $0x7ec] sm:$0xf0]  ;;  %v7156_v14 = vld [vmem:[#allocation7 + $0x7d4] sm:$0xf0] }
 0x1d2   :  { %4742 = vmatpush.bf16.msra.mxu0 %v7015_v42  ;;  %v7833_v42 = vld [vmem:[#allocation7 + $0x754] sm:$0xf]  ;;  %4707 = vmatpush.bf16.msrb.mxu1 %v6643_v7  ;;  %v2889_v57 = vadd.f32 1.0, %v7944_v56  ;;  %v7060_v7 = vld [vmem:[#allocation7 + $0x714] sm:$0xf0] }
 0x1d3   :  { %v7099_v19 = vor.u32 %v7833_v42, %v7096_v18  ;;  %v6760_v42 = vld [vmem:[#allocation7 + $0x4bc] sm:$0xf0]  ;;  %v7063_v18 = vor.u32 %v7824_v43, %v7060_v7  ;;  %v7857_v43 = vld [vmem:[#allocation7 + $0x814] sm:$0xf]  ;;  %v7276_v52 = vld [vmem:[#allocation7 + $0x8c4] sm:$0xf0] }
 0x1d4   :  { %4715 = vmatpush.bf16.msrb.mxu2 %v6811_v60  ;;  %v7821_v60 = vld [vmem:[#allocation7 + $0x6f4] sm:$0xf]  ;;  %v6226_v56 = vld [vmem:[#allocation7 + $0x80] sm:$0xf] }
 0x1d5   :  { %4708 = vmatmul.bf16.vlgmr.msrb.gmra.mxu1 %v8408_v6  ;;  %v7051_v25 = vor.u32 %v7821_v60, %v7048_v4  ;;  %v7192_v7 = vld [vmem:[#allocation7 + $0x81c] sm:$0xf0] }
 0x1d6   :  { %4743 = vmatpush.bf16.msra.mxu0 %v7003_v27  ;;  %4756 = vmatpush.bf16.msra.mxu1 %v7111_v39  ;;  %v6916_v27 = vld [vmem:[#allocation7 + $0x5f4] sm:$0xf0] }
 0x1d7   :  { %v6919_v17 = vor.u32 %v7788_v37, %v6916_v27  ;;  %v6238_v39 = vld [vmem:[#allocation7 + $0x98] sm:$0xf]  ;;  %v6883_v37 = vor.u32 %v7779_v58, %v6880_v46  ;;  %v7746_v27 = vld [vmem:[#allocation7 + $0x49c] sm:$0xf]  ;;  %v6832_v58 = vld [vmem:[#allocation7 + $0x54c] sm:$0xf0] }
 0x1d8   :  { %4716 = vmatpush.bf16.msrb.mxu2 %v6799_v38  ;;  %v6239_v45 = vor.u32 %v7619_v26, %v6238_v39  ;;  %v6751_v28 = vor.u32 %v7746_v27, %v6748_v11  ;;  %v7607_v39 = vld [vmem:[#allocation7 + $0x40] sm:$0xf0]  ;;  %v6334_v26 = vld [vmem:[#allocation7 + $0x158] sm:$0xf]  ;;  %v7854_v46 = vld [vmem:[#allocation7 + $0x7fc] sm:$0xf] }
 0x1d9   :  { %v6322_v27 = vld [vmem:[#allocation7 + $0x140] sm:$0xf]  ;;  %v7640_v11 = vld [vmem:[#allocation7 + $0x148] sm:$0xf0] }
 0x1da   :  { %4744 = vmatpush.bf16.msra.mxu0 %v6991_v50  ;;  %v2913_v50 = vmul.f32 %v2889_v57, %v2745_v2  ;;  %4757 = vmatpush.bf16.msra.mxu1 %v7099_v19  ;;  %v7616_v19 = vld [vmem:[#allocation7 + $0x88] sm:$0xf0]  ;;  %v6868_v57 = vld [vmem:[#allocation7 + $0x594] sm:$0xf0] }
 0x1db   :  { %v7776_v2 = vld [vmem:[#allocation7 + $0x58c] sm:$0xf] }
 0x1dc   :  { %v8483_v10 = vpack.c.bf16 %v2913_v50, %v2901_v54  ;;  %4717 = vmatpush.bf16.msrb.mxu2 %v6787_v49  ;;  %v6214_v54 = vld [vmem:[#allocation7 + $0x68] sm:$0xf]  ;;  %v7613_v50 = vld [vmem:[#allocation7 + $0x70] sm:$0xf0]  ;;  %v6871_v38 = vor.u32 %v7776_v2, %v6868_v57 }
 0x1de   :  { %4745 = vmatpush.bf16.msra.mxu0 %v6979_v36  ;;  %4624 = vmatmul.bf16.vlgmr.msrb.gmra.mxu3 %v8483_v10  ;;  %v7075_v36 = vor.u32 %v7827_v32, %v7072_v29  ;;  %v6215_v32 = vor.u32 %v7613_v50, %v6214_v54  ;;  %v7815_v29 = vld [vmem:[#allocation7 + $0x6c4] sm:$0xf]  ;;  %v7881_v54 = vld [vmem:[#allocation7 + $0x8d4] sm:$0xf]  ;;  %v7288_v50 = vld [vmem:[#allocation7 + $0x8dc] sm:$0xf0] }
 0x1df   :  { %4728 = vmatpush.bf16.msrb.mxu3 %v6919_v17  ;;  %4758 = vmatpush.bf16.msra.mxu1 %v7087_v41  ;;  %v7743_v17 = vld [vmem:[#allocation7 + $0x484] sm:$0xf]  ;;  %v6736_v41 = vld [vmem:[#allocation7 + $0x48c] sm:$0xf0]  ;;  %v7027_v59 = vor.u32 %v7815_v29, %v7024_v31 }
 0x1e0   :  { %4666 = vmatmul.bf16.vlgmr.msra.gmra.mxu2 %v8349_v12  ;;  %v6739_v49 = vor.u32 %v7743_v17, %v6736_v41  ;;  %v7601_v17 = vld [vmem:[#allocation7 + $0x10] sm:$0xf0]  ;;  %v6310_v41 = vld [vmem:[#allocation7 + $0x128] sm:$0xf] }
 0x1e1   :  { %4718 = vmatpush.bf16.msrb.mxu2 %v6775_v61  ;;  %v6190_v61 = vld [vmem:[#allocation7 + $0x38] sm:$0xf] }
 0x1e2   :  { %4746 = vmatpush.bf16.msra.mxu0 %v6967_v24  ;;  %v7749_v24 = vld [vmem:[#allocation7 + $0x4b4] sm:$0xf]  ;;  %v6191_v60 = vor.u32 %v7607_v39, %v6190_v61  ;;  %v7264_v61 = vld [vmem:[#allocation7 + $0x8ac] sm:$0xf0] }
 0x1e3   :  { %4729 = vmatpush.bf16.msrb.mxu3 %v6907_v13  ;;  %4759 = vmatpush.bf16.msra.mxu1 %v7075_v36  ;;  %v6763_v15 = vor.u32 %v7749_v24, %v6760_v42  ;;  %v7646_v13 = vld [vmem:[#allocation7 + $0x178] sm:$0xf0]  ;;  %v6859_v36 = vor.u32 %v7773_v3, %v6856_v0  ;;  %v7767_v42 = vld [vmem:[#allocation7 + $0x544] sm:$0xf]  ;;  %v7637_v3 = vld [vmem:[#allocation7 + $0x130] sm:$0xf0] }
 0x1e4   :  { %v7718_v0 = vld [vmem:[#allocation7 + $0x3b8] sm:$0xf0]  ;;  %v6311_v31 = vor.u32 %v7637_v3, %v6310_v41  ;;  %v6586_v41 = vld [vmem:[#allocation7 + $0x350] sm:$0xf] }
 0x1e5   :  { %4719 = vmatpush.bf16.msrb.mxu2 %v6763_v15  ;;  %v7884_v15 = vld [vmem:[#allocation7 + $0x8ec] sm:$0xf]  ;;  %v7706_v3 = vld [vmem:[#allocation7 + $0x358] sm:$0xf0] }
 0x1e6   :  { %4747 = vmatpush.bf16.msra.mxu0 %v6955_v16  ;;  %v6227_v16 = vor.u32 %v7616_v19, %v6226_v56  ;;  %v7300_v56 = vld [vmem:[#allocation7 + $0x8f4] sm:$0xf0]  ;;  %v6178_v19 = vld [vmem:[#allocation7 + $0x20] sm:$0xf] }
 0x1e7   :  { %4730 = vmatpush.bf16.msrb.mxu3 %v6895_v51  ;;  %4760 = vmatpush.bf16.msra.mxu1 %v7063_v18  ;;  %v7643_v51 = vld [vmem:[#allocation7 + $0x160] sm:$0xf0]  ;;  %v7195_v18 = vor.u32 %v7857_v43, %v7192_v7  ;;  %v7303_v57 = vor.u32 %v7884_v15, %v7300_v56  ;;  %v7144_v43 = vld [vmem:[#allocation7 + $0x7bc] sm:$0xf0]  ;;  %v7252_v15 = vld [vmem:[#allocation7 + $0x894] sm:$0xf0] }
 0x1e8   :  { %v6335_v4 = vor.u32 %v7643_v51, %v6334_v26  ;;  %v7875_v7 = vld [vmem:[#allocation7 + $0x8a4] sm:$0xf]  ;;  %v6286_v26 = vld [vmem:[#allocation7 + $0xf8] sm:$0xf] }
 0x1e9   :  { %4720 = vmatpush.bf16.msrb.mxu2 %v6751_v28  ;;  %v6323_v28 = vor.u32 %v7640_v11, %v6322_v27  ;;  %v7631_v51 = vld [vmem:[#allocation7 + $0x100] sm:$0xf0]  ;;  %v6598_v27 = vld [vmem:[#allocation7 + $0x368] sm:$0xf]  ;;  %v7709_v11 = vld [vmem:[#allocation7 + $0x370] sm:$0xf0] }
 0x1ea   :  { %4748 = vmatpush.bf16.msra.mxu0 %v6943_v48  ;;  %v7860_v48 = vld [vmem:[#allocation7 + $0x82c] sm:$0xf] }
 0x1eb   :  { %4731 = vmatpush.bf16.msrb.mxu3 %v6883_v37  ;;  %4761 = vmatpush.bf16.msra.mxu1 %v7051_v25  ;;  %v7207_v1 = vor.u32 %v7860_v48, %v7204_v8  ;;  %v7604_v37 = vld [vmem:[#allocation7 + $0x28] sm:$0xf0]  ;;  %v6835_v25 = vor.u32 %v7767_v42, %v6832_v58  ;;  %v7291_v8 = vor.u32 %v7881_v54, %v7288_v50  ;;  %v7670_v54 = vld [vmem:[#allocation7 + $0x238] sm:$0xf0] }
 0x1ec   :  { %v6179_v62 = vor.u32 %v7604_v37, %v6178_v19  ;;  %v7712_v42 = vld [vmem:[#allocation7 + $0x388] sm:$0xf0]  ;;  %v7267_v58 = vor.u32 %v7875_v7, %v7264_v61  ;;  %v6274_v19 = vld [vmem:[#allocation7 + $0xe0] sm:$0xf]  ;;  %v6599_v50 = vor.u32 %v7709_v11, %v6598_v27  ;;  %v6526_v27 = vld [vmem:[#allocation7 + $0x2d8] sm:$0xf] }
 0x1ed   :  { %4721 = vmatpush.bf16.msrb.mxu2 %v6739_v49  ;;  %v7878_v49 = vld [vmem:[#allocation7 + $0x8bc] sm:$0xf]  ;;  %v7628_v37 = vld [vmem:[#allocation7 + $0xe8] sm:$0xf0]  ;;  %v6418_v7 = vld [vmem:[#allocation7 + $0x200] sm:$0xf] }
 0x1ee   :  { %4749 = vmatpush.bf16.msra.mxu0 %v6931_v5  ;;  %4680 = vmatmul.bf16.vlgmr.msra.gmra.mxu3 %v8354_v21  ;;  %v7770_v5 = vld [vmem:[#allocation7 + $0x55c] sm:$0xf]  ;;  %v7664_v61 = vld [vmem:[#allocation7 + $0x208] sm:$0xf0]  ;;  %v7691_v11 = vld [vmem:[#allocation7 + $0x2e0] sm:$0xf0] }
 0x1ef   :  { %4732 = vmatpush.bf16.msrb.mxu3 %v6871_v38  ;;  %4762 = vmatpush.bf16.msra.mxu1 %v7039_v44  ;;  %v6847_v24 = vor.u32 %v7770_v5, %v6844_v40  ;;  %v6166_v38 = vld [vmem:[#allocation7 + $0x8] sm:$0xf]  ;;  %v6634_v44 = vld [vmem:[#allocation7 + $0x3b0] sm:$0xf]  ;;  %v7279_v40 = vor.u32 %v7878_v49, %v7276_v52  ;;  %v6587_v49 = vor.u32 %v7706_v3, %v6586_v41  ;;  %v7688_v41 = vld [vmem:[#allocation7 + $0x2c8] sm:$0xf0] }
 0x1f0   :  { %4722 = vmatmul.bf16.vlgmr.msrb.gmra.mxu2 %v8414_v23  ;;  %v6167_v29 = vor.u32 %v7601_v17, %v6166_v38  ;;  %v6262_v38 = vld [vmem:[#allocation7 + $0xc8] sm:$0xf]  ;;  %v7625_v17 = vld [vmem:[#allocation7 + $0xd0] sm:$0xf0] }
 0x1f1   :  { %4750 = vmatmul.bf16.vlgmr.msra.gmra.mxu0 %v8438_v47  ;;  %4770 = vmatpush.bf16.msra.mxu2 %v7207_v1  ;;  %v6622_v1 = vld [vmem:[#allocation7 + $0x398] sm:$0xf] }
 0x1f2   :  { %4798 = vmatpush.bf16.msrb.mxu0 %v6251_v53  ;;  %v6347_v53 = vor.u32 %v7646_v13, %v6346_v35  ;;  %v6635_v35 = vor.u32 %v7718_v0, %v6634_v44  ;;  %v6298_v13 = vld [vmem:[#allocation7 + $0x110] sm:$0xf]  ;;  %v7742_v0 = vld [vmem:[#allocation7 + $0x478] sm:$0xf0] }
 0x1f3   :  { %4733 = vmatpush.bf16.msrb.mxu3 %v6859_v36  ;;  %4763 = vmatpush.bf16.msra.mxu1 %v7027_v59  ;;  %v7634_v36 = vld [vmem:[#allocation7 + $0x118] sm:$0xf0]  ;;  %v7715_v59 = vld [vmem:[#allocation7 + $0x3a0] sm:$0xf0]  ;;  %v6730_v44 = vld [vmem:[#allocation7 + $0x470] sm:$0xf] }
 0x1f4   :  { %v6623_v39 = vor.u32 %v7715_v59, %v6622_v1  ;;  %v6731_v52 = vor.u32 %v7742_v0, %v6730_v44  ;;  %v7703_v1 = vld [vmem:[#allocation7 + $0x340] sm:$0xf0]  ;;  %v6718_v59 = vld [vmem:[#allocation7 + $0x458] sm:$0xf]  ;;  %v6682_v44 = vld [vmem:[#allocation7 + $0x410] sm:$0xf] }
 0x1f5   :  { %4771 = vmatpush.bf16.msra.mxu2 %v7195_v18  ;;  %v7730_v0 = vld [vmem:[#allocation7 + $0x418] sm:$0xf0] }
 0x1f6   :  { %4799 = vmatpush.bf16.msrb.mxu0 %v6239_v45  ;;  %v7180_v45 = vld [vmem:[#allocation7 + $0x804] sm:$0xf0]  ;;  %4764 = vmatmul.bf16.vlgmr.msra.gmra.mxu1 %v8452_v33 }
 0x1f7   :  { %4812 = vmatpush.bf16.msrb.mxu1 %v6347_v53  ;;  %4734 = vmatpush.bf16.msrb.mxu3 %v6847_v24  ;;  %v7183_v2 = vor.u32 %v7854_v46, %v7180_v45  ;;  %v6299_v53 = vor.u32 %v7634_v36, %v6298_v13  ;;  %v6610_v24 = vld [vmem:[#allocation7 + $0x380] sm:$0xf]  ;;  %v7842_v46 = vld [vmem:[#allocation7 + $0x79c] sm:$0xf]  ;;  %v6287_v45 = vor.u32 %v7631_v51, %v6286_v26  ;;  %v7667_v13 = vld [vmem:[#allocation7 + $0x220] sm:$0xf0] }
 0x1f8   :  { %v6611_v56 = vor.u32 %v7712_v42, %v6610_v24  ;;  %v6574_v36 = vld [vmem:[#allocation7 + $0x338] sm:$0xf]  ;;  %v6538_v51 = vld [vmem:[#allocation7 + $0x2f0] sm:$0xf]  ;;  %v7694_v24 = vld [vmem:[#allocation7 + $0x2f8] sm:$0xf0] }
 0x1f9   :  { %4772 = vmatpush.bf16.msra.mxu2 %v7183_v2  ;;  %v6562_v42 = vld [vmem:[#allocation7 + $0x320] sm:$0xf] }
 0x1fa   :  { %4800 = vmatpush.bf16.msrb.mxu0 %v6227_v16  ;;  %v7851_v16 = vld [vmem:[#allocation7 + $0x7e4] sm:$0xf] }
 0x1fb   :  { %4813 = vmatpush.bf16.msrb.mxu1 %v6335_v4  ;;  %4735 = vmatpush.bf16.msrb.mxu3 %v6835_v25  ;;  %v7171_v48 = vor.u32 %v7851_v16, %v7168_v55  ;;  %v7872_v4 = vld [vmem:[#allocation7 + $0x88c] sm:$0xf]  ;;  %v7120_v16 = vld [vmem:[#allocation7 + $0x78c] sm:$0xf0]  ;;  %v7869_v55 = vld [vmem:[#allocation7 + $0x874] sm:$0xf] }
 0x1fc   :  { %v7255_v2 = vor.u32 %v7872_v4, %v7252_v15  ;;  %v6539_v4 = vor.u32 %v7694_v24, %v6538_v51  ;;  %v6406_v15 = vld [vmem:[#allocation7 + $0x1e8] sm:$0xf]  ;;  %v6658_v51 = vld [vmem:[#allocation7 + $0x3e0] sm:$0xf]  ;;  %v7724_v24 = vld [vmem:[#allocation7 + $0x3e8] sm:$0xf0] }
 0x1fd   :  { %4773 = vmatpush.bf16.msra.mxu2 %v7171_v48 }
 0x1fe   :  { %4801 = vmatpush.bf16.msrb.mxu0 %v6215_v32  ;;  %v7848_v32 = vld [vmem:[#allocation7 + $0x7cc] sm:$0xf]  ;;  %4736 = vmatmul.bf16.vlgmr.msrb.gmra.mxu3 %v8424_v9 }
 0x1ff   :  { %4784 = vmatpush.bf16.msra.mxu3 %v7303_v57  ;;  %4814 = vmatpush.bf16.msrb.mxu1 %v6323_v28  ;;  %v7159_v5 = vor.u32 %v7848_v32, %v7156_v14  ;;  %v7839_v57 = vld [vmem:[#allocation7 + $0x784] sm:$0xf]  ;;  %v6442_v28 = vld [vmem:[#allocation7 + $0x230] sm:$0xf]  ;;  %v7228_v14 = vld [vmem:[#allocation7 + $0x864] sm:$0xf0] }
 0x200   :  { %v7123_v48 = vor.u32 %v7839_v57, %v7120_v16  ;;  %v6443_v32 = vor.u32 %v7670_v54, %v6442_v28  ;;  %v6694_v57 = vld [vmem:[#allocation7 + $0x428] sm:$0xf]  ;;  %v7733_v16 = vld [vmem:[#allocation7 + $0x430] sm:$0xf0]  ;;  %v6394_v28 = vld [vmem:[#allocation7 + $0x1d0] sm:$0xf] }
 0x201   :  { %4774 = vmatpush.bf16.msra.mxu2 %v7159_v5  ;;  %v7739_v5 = vld [vmem:[#allocation7 + $0x460] sm:$0xf0] }
 0x202   :  { %4802 = vmatpush.bf16.msrb.mxu0 %v6203_v30  ;;  %v7845_v30 = vld [vmem:[#allocation7 + $0x7b4] sm:$0xf]  ;;  %v6719_v26 = vor.u32 %v7739_v5, %v6718_v59  ;;  %v6994_v59 = vld [vmem:[#allocation7 + $0x680] sm:$0xf]  ;;  %v7808_v5 = vld [vmem:[#allocation7 + $0x688] sm:$0xf0] }
 0x203   :  { %4785 = vmatpush.bf16.msra.mxu3 %v7291_v8  ;;  %4815 = vmatpush.bf16.msrb.mxu1 %v6311_v31  ;;  %v7147_v18 = vor.u32 %v7845_v30, %v7144_v43  ;;  %v7866_v31 = vld [vmem:[#allocation7 + $0x85c] sm:$0xf]  ;;  %v7863_v30 = vld [vmem:[#allocation7 + $0x844] sm:$0xf]  ;;  %v7216_v43 = vld [vmem:[#allocation7 + $0x84c] sm:$0xf0] }
 0x205   :  { %4775 = vmatpush.bf16.msra.mxu2 %v7147_v18  ;;  %v7700_v18 = vld [vmem:[#allocation7 + $0x328] sm:$0xf0] }
 0x206   :  { %4803 = vmatpush.bf16.msrb.mxu0 %v6191_v60  ;;  %v7132_v60 = vld [vmem:[#allocation7 + $0x7a4] sm:$0xf0] }
 0x207   :  { %4786 = vmatpush.bf16.msra.mxu3 %v7279_v40  ;;  %4816 = vmatpush.bf16.msrb.mxu1 %v6299_v53  ;;  %v7135_v25 = vor.u32 %v7842_v46, %v7132_v60  ;;  %v7231_v40 = vor.u32 %v7866_v31, %v7228_v14  ;;  %v7736_v46 = vld [vmem:[#allocation7 + $0x448] sm:$0xf0]  ;;  %v6419_v60 = vor.u32 %v7664_v61, %v6418_v7  ;;  %v6382_v31 = vld [vmem:[#allocation7 + $0x1b8] sm:$0xf]  ;;  %v6490_v61 = vld [vmem:[#allocation7 + $0x290] sm:$0xf] }
 0x208   :  { %v6683_v14 = vor.u32 %v7730_v0, %v6682_v44  ;;  %v7652_v7 = vld [vmem:[#allocation7 + $0x1a8] sm:$0xf0]  ;;  %v7799_v44 = vld [vmem:[#allocation7 + $0x640] sm:$0xf0]  ;;  %v7102_v0 = vld [vmem:[#allocation7 + $0x758] sm:$0xf] }
 0x209   :  { %4776 = vmatpush.bf16.msra.mxu2 %v7135_v25  ;;  %v6550_v25 = vld [vmem:[#allocation7 + $0x308] sm:$0xf] }
 0x20a   :  { %4804 = vmatpush.bf16.msrb.mxu0 %v6179_v62  ;;  %v7240_v62 = vld [vmem:[#allocation7 + $0x87c] sm:$0xf0] }
 0x20b   :  { %4787 = vmatpush.bf16.msra.mxu3 %v7267_v58  ;;  %4817 = vmatpush.bf16.msrb.mxu1 %v6287_v45  ;;  %v7243_v8 = vor.u32 %v7869_v55, %v7240_v62  ;;  %v6706_v58 = vld [vmem:[#allocation7 + $0x440] sm:$0xf]  ;;  %v7219_v45 = vor.u32 %v7863_v30, %v7216_v43  ;;  %v7018_v55 = vld [vmem:[#allocation7 + $0x6b0] sm:$0xf]  ;;  %v6527_v62 = vor.u32 %v7691_v11, %v6526_v27  ;;  %v6646_v27 = vld [vmem:[#allocation7 + $0x3c8] sm:$0xf] }
 0x20c   :  { %v7721_v11 = vld [vmem:[#allocation7 + $0x3d0] sm:$0xf0] }
 0x20d   :  { %4777 = vmatpush.bf16.msra.mxu2 %v7123_v48  ;;  %v7006_v48 = vld [vmem:[#allocation7 + $0x698] sm:$0xf] }
 0x20e   :  { %4805 = vmatpush.bf16.msrb.mxu0 %v6167_v29  ;;  %v6263_v29 = vor.u32 %v7625_v17, %v6262_v38  ;;  %v7658_v38 = vld [vmem:[#allocation7 + $0x1d8] sm:$0xf0]  ;;  %v6514_v17 = vld [vmem:[#allocation7 + $0x2c0] sm:$0xf] }
 0x20f   :  { %4788 = vmatpush.bf16.msra.mxu3 %v7255_v2  ;;  %v7697_v2 = vld [vmem:[#allocation7 + $0x310] sm:$0xf0] }
 0x210   :  { %4778 = vmatmul.bf16.vlgmr.msra.gmra.mxu2 %v8477_v34  ;;  %v6551_v54 = vor.u32 %v7697_v2, %v6550_v25  ;;  %v6970_v25 = vld [vmem:[#allocation7 + $0x650] sm:$0xf]  ;;  %v7802_v2 = vld [vmem:[#allocation7 + $0x658] sm:$0xf0] }
 0x211   :  { %4806 = vmatmul.bf16.vlgmr.msrb.gmra.mxu0 %v8343_v63  ;;  %v6275_v63 = vor.u32 %v7628_v37, %v6274_v19  ;;  %4826 = vmatpush.bf16.msrb.mxu2 %v6443_v32  ;;  %v6563_v19 = vor.u32 %v7700_v18, %v6562_v42  ;;  %v6707_v37 = vor.u32 %v7736_v46, %v6706_v58  ;;  %v6982_v42 = vld [vmem:[#allocation7 + $0x668] sm:$0xf]  ;;  %v7805_v18 = vld [vmem:[#allocation7 + $0x670] sm:$0xf0] }
 0x212   :  { %4854 = vmatpush.bf16.msra.mxu0 %v6635_v35  ;;  %v6430_v35 = vld [vmem:[#allocation7 + $0x218] sm:$0xf]  ;;  %v6395_v32 = vor.u32 %v7658_v38, %v6394_v28  ;;  %v6466_v28 = vld [vmem:[#allocation7 + $0x260] sm:$0xf] }
 0x213   :  { %4818 = vmatpush.bf16.msrb.mxu1 %v6275_v63  ;;  %4789 = vmatpush.bf16.msra.mxu3 %v7243_v8  ;;  %v6431_v53 = vor.u32 %v7667_v13, %v6430_v35  ;;  %v7814_v63 = vld [vmem:[#allocation7 + $0x6b8] sm:$0xf0]  ;;  %v7811_v8 = vld [vmem:[#allocation7 + $0x6a0] sm:$0xf0]  ;;  %v7685_v35 = vld [vmem:[#allocation7 + $0x2b0] sm:$0xf0] }
 0x214   :  { %v7019_v3 = vor.u32 %v7814_v63, %v7018_v55  ;;  %v7007_v13 = vor.u32 %v7811_v8, %v7006_v48  ;;  %v7835_v48 = vld [vmem:[#allocation7 + $0x760] sm:$0xf0] }
 0x215   :  { %4827 = vmatpush.bf16.msrb.mxu2 %v6431_v53  ;;  %v6370_v53 = vld [vmem:[#allocation7 + $0x1a0] sm:$0xf] }
 0x216   :  { %4855 = vmatpush.bf16.msra.mxu0 %v6623_v39  ;;  %v6575_v39 = vor.u32 %v7703_v1, %v6574_v36  ;;  %v6670_v36 = vld [vmem:[#allocation7 + $0x3f8] sm:$0xf]  ;;  %v7727_v1 = vld [vmem:[#allocation7 + $0x400] sm:$0xf0]  ;;  %v6371_v58 = vor.u32 %v7652_v7, %v6370_v53  ;;  %v6790_v7 = vld [vmem:[#allocation7 + $0x4e8] sm:$0xf] }
 0x217   :  { %4819 = vmatpush.bf16.msrb.mxu1 %v6263_v29  ;;  %4790 = vmatpush.bf16.msra.mxu3 %v7231_v40  ;;  %v6515_v29 = vor.u32 %v7688_v41, %v6514_v17  ;;  %v6671_v43 = vor.u32 %v7727_v1, %v6670_v36  ;;  %v6814_v17 = vld [vmem:[#allocation7 + $0x518] sm:$0xf]  ;;  %v7763_v41 = vld [vmem:[#allocation7 + $0x520] sm:$0xf0]  ;;  %v7790_v36 = vld [vmem:[#allocation7 + $0x5f8] sm:$0xf0] }
 0x218   :  { %v6946_v1 = vld [vmem:[#allocation7 + $0x620] sm:$0xf] }
 0x219   :  { %4828 = vmatpush.bf16.msrb.mxu2 %v6419_v60  ;;  %v7649_v60 = vld [vmem:[#allocation7 + $0x190] sm:$0xf0] }
 0x21a   :  { %4856 = vmatpush.bf16.msra.mxu0 %v6611_v56  ;;  %4820 = vmatmul.bf16.vlgmr.msrb.gmra.mxu1 %v8347_v20  ;;  %v7661_v56 = vld [vmem:[#allocation7 + $0x1f0] sm:$0xf0] }
 0x21b   :  { %4868 = vmatpush.bf16.msra.mxu1 %v6731_v52  ;;  %4791 = vmatpush.bf16.msra.mxu3 %v7219_v45  ;;  %v6407_v20 = vor.u32 %v7661_v56, %v6406_v15  ;;  %v6502_v52 = vld [vmem:[#allocation7 + $0x2a8] sm:$0xf]  ;;  %v7679_v15 = vld [vmem:[#allocation7 + $0x280] sm:$0xf0]  ;;  %v6826_v56 = vld [vmem:[#allocation7 + $0x530] sm:$0xf] }
 0x21c   :  { %v6503_v30 = vor.u32 %v7685_v35, %v6502_v52  ;;  %v6358_v45 = vld [vmem:[#allocation7 + $0x188] sm:$0xf]  ;;  %v7103_v35 = vor.u32 %v7835_v48, %v7102_v0  ;;  %v7748_v0 = vld [vmem:[#allocation7 + $0x4a8] sm:$0xf0]  ;;  %v6874_v48 = vld [vmem:[#allocation7 + $0x590] sm:$0xf] }
 0x21d   :  { %4829 = vmatpush.bf16.msrb.mxu2 %v6407_v20  ;;  %v6359_v55 = vor.u32 %v7649_v60, %v6358_v45  ;;  %v8501_v45 = vpop.f32.mrf.mxu1 }
 0x21e   :  { %4857 = vmatpush.bf16.msra.mxu0 %v6599_v50  ;;  %v6695_v50 = vor.u32 %v7733_v16, %v6694_v57  ;;  %4792 = vmatmul.bf16.vlgmr.msra.gmra.mxu3 %v8483_v10  ;;  %v7114_v57 = vld [vmem:[#allocation7 + $0x770] sm:$0xf]  ;;  %v7838_v16 = vld [vmem:[#allocation7 + $0x778] sm:$0xf0] }
 0x21f   :  { %4869 = vmatpush.bf16.msra.mxu1 %v6719_v26  ;;  %4840 = vmatpush.bf16.msrb.mxu3 %v6539_v4  ;;  %v6995_v26 = vor.u32 %v7808_v5, %v6994_v59  ;;  %v6478_v4 = vld [vmem:[#allocation7 + $0x278] sm:$0xf]  ;;  %v7115_v38 = vor.u32 %v7838_v16, %v7114_v57  ;;  %v7796_v59 = vld [vmem:[#allocation7 + $0x628] sm:$0xf0]  ;;  %v7090_v5 = vld [vmem:[#allocation7 + $0x740] sm:$0xf] }
 0x220   :  { %v6479_v63 = vor.u32 %v7679_v15, %v6478_v4  ;;  %v6778_v4 = vld [vmem:[#allocation7 + $0x4d0] sm:$0xf]  ;;  %v6766_v16 = vld [vmem:[#allocation7 + $0x4b8] sm:$0xf] }
 0x221   :  { %4830 = vmatpush.bf16.msrb.mxu2 %v6395_v32  ;;  %v6454_v32 = vld [vmem:[#allocation7 + $0x248] sm:$0xf] }
 0x222   :  { %4858 = vmatpush.bf16.msra.mxu0 %v6587_v49  ;;  %v7655_v49 = vld [vmem:[#allocation7 + $0x1c0] sm:$0xf0] }
 0x223   :  { %4870 = vmatpush.bf16.msra.mxu1 %v6707_v37  ;;  %4841 = vmatpush.bf16.msrb.mxu3 %v6527_v62  ;;  %v6383_v40 = vor.u32 %v7655_v49, %v6382_v31  ;;  %v6983_v37 = vor.u32 %v7805_v18, %v6982_v42  ;;  %v6647_v62 = vor.u32 %v7721_v11, %v6646_v27  ;;  %v7673_v31 = vld [vmem:[#allocation7 + $0x250] sm:$0xf0]  ;;  %v7760_v49 = vld [vmem:[#allocation7 + $0x508] sm:$0xf0]  ;;  %v6934_v42 = vld [vmem:[#allocation7 + $0x608] sm:$0xf] }
 0x224   :  { %v7793_v18 = vld [vmem:[#allocation7 + $0x610] sm:$0xf0]  ;;  %v7784_v27 = vld [vmem:[#allocation7 + $0x5c8] sm:$0xf0]  ;;  %v7066_v11 = vld [vmem:[#allocation7 + $0x710] sm:$0xf] }
 0x225   :  { %4831 = vmatpush.bf16.msrb.mxu2 %v6383_v40  ;;  %v7832_v40 = vld [vmem:[#allocation7 + $0x748] sm:$0xf0]  ;;  %v6935_v15 = vor.u32 %v7793_v18, %v6934_v42  ;;  %v7198_v42 = vld [vmem:[#allocation7 + $0x818] sm:$0xf]  ;;  %v7859_v18 = vld [vmem:[#allocation7 + $0x820] sm:$0xf0] }
 0x226   :  { %4859 = vmatpush.bf16.msra.mxu0 %v6575_v39  ;;  %v7682_v39 = vld [vmem:[#allocation7 + $0x298] sm:$0xf0] }
 0x227   :  { %4871 = vmatpush.bf16.msra.mxu1 %v6695_v50  ;;  %4842 = vmatpush.bf16.msrb.mxu3 %v6515_v29  ;;  %v6491_v46 = vor.u32 %v7682_v39, %v6490_v61  ;;  %v6971_v50 = vor.u32 %v7802_v2, %v6970_v25  ;;  %v6815_v29 = vor.u32 %v7763_v41, %v6814_v17  ;;  %v7757_v61 = vld [vmem:[#allocation7 + $0x4f0] sm:$0xf0]  ;;  %v8499_v39 = vpop.f32.mrf.mxu0  ;;  %v7826_v25 = vld [vmem:[#allocation7 + $0x718] sm:$0xf0]  ;;  %v6754_v41 = vld [vmem:[#allocation7 + $0x4a0] sm:$0xf] }
 0x229   :  { %4832 = vmatpush.bf16.msrb.mxu2 %v6371_v58  ;;  %v7078_v58 = vld [vmem:[#allocation7 + $0x728] sm:$0xf] }
 0x22a   :  { %4860 = vmatpush.bf16.msra.mxu0 %v6563_v19  ;;  %v7766_v19 = vld [vmem:[#allocation7 + $0x538] sm:$0xf0] }
 0x22b   :  { %4872 = vmatpush.bf16.msra.mxu1 %v6683_v14  ;;  %4843 = vmatpush.bf16.msrb.mxu3 %v6503_v30  ;;  %v6827_v20 = vor.u32 %v7766_v19, %v6826_v56  ;;  %v6802_v14 = vld [vmem:[#allocation7 + $0x500] sm:$0xf]  ;;  %v6455_v30 = vor.u32 %v7673_v31, %v6454_v32  ;;  %v7754_v19 = vld [vmem:[#allocation7 + $0x4d8] sm:$0xf0] }
 0x22c   :  { %v6803_v53 = vor.u32 %v7760_v49, %v6802_v14  ;;  %v6779_v2 = vor.u32 %v7754_v19, %v6778_v4  ;;  %v7042_v32 = vld [vmem:[#allocation7 + $0x6e0] sm:$0xf]  ;;  %v6755_v14 = vor.u32 %v7748_v0, %v6754_v41  ;;  %v6838_v4 = vld [vmem:[#allocation7 + $0x548] sm:$0xf] }
 0x22d   :  { %4833 = vmatpush.bf16.msrb.mxu2 %v6359_v55  ;;  %v7067_v55 = vor.u32 %v7826_v25, %v7066_v11  ;;  %v7886_v11 = vld [vmem:[#allocation7 + $0x8f8] sm:$0xf0]  ;;  %v7282_v0 = vld [vmem:[#allocation7 + $0x8c0] sm:$0xf] }
 0x22e   :  { %4861 = vmatpush.bf16.msra.mxu0 %v6551_v54  ;;  %v7676_v54 = vld [vmem:[#allocation7 + $0x268] sm:$0xf0] }
 0x22f   :  { %4873 = vmatpush.bf16.msra.mxu1 %v6671_v43  ;;  %4844 = vmatpush.bf16.msrb.mxu3 %v6491_v46  ;;  %v6467_v8 = vor.u32 %v7676_v54, %v6466_v28  ;;  %v7829_v46 = vld [vmem:[#allocation7 + $0x730] sm:$0xf0]  ;;  %v7054_v28 = vld [vmem:[#allocation7 + $0x6f8] sm:$0xf]  ;;  %v7823_v54 = vld [vmem:[#allocation7 + $0x700] sm:$0xf0] }
 0x230   :  { %4834 = vmatmul.bf16.vlgmr.msrb.gmra.mxu2 %v8349_v12  ;;  %v7787_v12 = vld [vmem:[#allocation7 + $0x5e0] sm:$0xf0]  ;;  %v7079_v56 = vor.u32 %v7829_v46, %v7078_v58  ;;  %v4486_v46 = vadd.f32 %v8501_v45, %v8499_v39 }
 0x231   :  { %4862 = vmatmul.bf16.vlgmr.msra.gmra.mxu0 %v8405_v22  ;;  %v6659_v22 = vor.u32 %v7724_v24, %v6658_v51  ;;  %4882 = vmatpush.bf16.msra.mxu2 %v6827_v20  ;;  %v7091_v51 = vor.u32 %v7832_v40, %v7090_v5  ;;  %v6910_v24 = vld [vmem:[#allocation7 + $0x5d8] sm:$0xf]  ;;  %v6886_v20 = vld [vmem:[#allocation7 + $0x5a8] sm:$0xf]  ;;  %v7817_v40 = vld [vmem:[#allocation7 + $0x6d0] sm:$0xf0] }
 0x232   :  { %4910 = vmatpush.bf16.msrb.mxu0 %v7019_v3  ;;  %v6958_v3 = vld [vmem:[#allocation7 + $0x638] sm:$0xf]  ;;  %v6911_v60 = vor.u32 %v7787_v12, %v6910_v24  ;;  %v7030_v5 = vld [vmem:[#allocation7 + $0x6c8] sm:$0xf]  ;;  %v6850_v24 = vld [vmem:[#allocation7 + $0x560] sm:$0xf] }
 0x233   :  { %4874 = vmatpush.bf16.msra.mxu1 %v6659_v22  ;;  %4845 = vmatpush.bf16.msrb.mxu3 %v6479_v63  ;;  %v6959_v52 = vor.u32 %v7799_v44, %v6958_v3  ;;  %v8503_v22 = vpop.f32.mrf.mxu2  ;;  %v7751_v63 = vld [vmem:[#allocation7 + $0x4c0] sm:$0xf0]  ;;  %v8510_v3 = vpop.f32.mrf.mxu1  ;;  %v7055_v44 = vor.u32 %v7823_v54, %v7054_v28  ;;  %v7772_v12 = vld [vmem:[#allocation7 + $0x568] sm:$0xf0] }
 0x234   :  { %v4500_v19 = vadd.f32 %v8503_v22, %v4486_v46  ;;  %v7883_v22 = vld [vmem:[#allocation7 + $0x8e0] sm:$0xf0] }
 0x235   :  { %4883 = vmatpush.bf16.msra.mxu2 %v6815_v29  ;;  %v7820_v29 = vld [vmem:[#allocation7 + $0x6e8] sm:$0xf0]  ;;  %v7871_v46 = vld [vmem:[#allocation7 + $0x880] sm:$0xf0] }
 0x236   :  { %4911 = vmatpush.bf16.msrb.mxu0 %v7007_v13  ;;  %v6922_v13 = vld [vmem:[#allocation7 + $0x5f0] sm:$0xf] }
 0x237   :  { %4875 = vmatpush.bf16.msra.mxu1 %v6647_v62  ;;  %4846 = vmatpush.bf16.msrb.mxu3 %v6467_v8  ;;  %v6923_v43 = vor.u32 %v7790_v36, %v6922_v13  ;;  %v7781_v62 = vld [vmem:[#allocation7 + $0x5b0] sm:$0xf0]  ;;  %v7778_v8 = vld [vmem:[#allocation7 + $0x598] sm:$0xf0]  ;;  %v7043_v13 = vor.u32 %v7820_v29, %v7042_v32  ;;  %v6862_v36 = vld [vmem:[#allocation7 + $0x578] sm:$0xf] }
 0x238   :  { %v6887_v17 = vor.u32 %v7781_v62, %v6886_v20  ;;  %v6875_v49 = vor.u32 %v7778_v8, %v6874_v48  ;;  %v7294_v20 = vld [vmem:[#allocation7 + $0x8d8] sm:$0xf] }
 0x239   :  { %4884 = vmatpush.bf16.msra.mxu2 %v6803_v53  ;;  %v7150_v32 = vld [vmem:[#allocation7 + $0x7b8] sm:$0xf] }
 0x23a   :  { %4912 = vmatpush.bf16.msrb.mxu0 %v6995_v26  ;;  %4876 = vmatmul.bf16.vlgmr.msra.gmra.mxu1 %v8408_v6  ;;  %v6947_v26 = vor.u32 %v7796_v59, %v6946_v1  ;;  %v6791_v6 = vor.u32 %v7757_v61, %v6790_v7  ;;  %v7775_v1 = vld [vmem:[#allocation7 + $0x580] sm:$0xf0]  ;;  %v7862_v59 = vld [vmem:[#allocation7 + $0x838] sm:$0xf0] }
 0x23b   :  { %4924 = vmatpush.bf16.msrb.mxu1 %v7115_v38  ;;  %4847 = vmatpush.bf16.msrb.mxu3 %v6455_v30  ;;  %v8508_v38 = vpop.f32.mrf.mxu0  ;;  %v8513_v31 = vpop.f32.mrf.mxu2 }
 0x23c   :  { %v4541_v61 = vpop.f32.mrf.mxu1  ;;  %v4488_v28 = vadd.f32 %v8510_v3, %v8508_v38 }
 0x23d   :  { %4885 = vmatpush.bf16.msra.mxu2 %v6791_v6  ;;  %v6851_v6 = vor.u32 %v7772_v12, %v6850_v24  ;;  %v7126_v24 = vld [vmem:[#allocation7 + $0x788] sm:$0xf] }
 0x23e   :  { %4913 = vmatpush.bf16.msrb.mxu0 %v6983_v37  ;;  %v6898_v37 = vld [vmem:[#allocation7 + $0x5c0] sm:$0xf]  ;;  %4848 = vmatmul.bf16.vlgmr.msrb.gmra.mxu3 %v8354_v21  ;;  %v6767_v21 = vor.u32 %v7751_v63, %v6766_v16  ;;  %v7174_v16 = vld [vmem:[#allocation7 + $0x7e8] sm:$0xf]  ;;  %v7853_v63 = vld [vmem:[#allocation7 + $0x7f0] sm:$0xf0]  ;;  %v4502_v41 = vadd.f32 %v8513_v31, %v4488_v28 }
 0x23f   :  { %4925 = vmatpush.bf16.msrb.mxu1 %v7103_v35  ;;  %4896 = vmatpush.bf16.msra.mxu3 %v6923_v43  ;;  %v6899_v57 = vor.u32 %v7784_v27, %v6898_v37  ;;  %v7745_v35 = vld [vmem:[#allocation7 + $0x490] sm:$0xf0]  ;;  %v6863_v43 = vor.u32 %v7775_v1, %v6862_v36  ;;  %v7856_v37 = vld [vmem:[#allocation7 + $0x808] sm:$0xf0]  ;;  %v7306_v27 = vld [vmem:[#allocation7 + $0x8f0] sm:$0xf] }
 0x241   :  { %4886 = vmatpush.bf16.msra.mxu2 %v6779_v2 }
 0x242   :  { %4914 = vmatpush.bf16.msrb.mxu0 %v6971_v50  ;;  %v8506_v50 = vpop.f32.mrf.mxu3 }
 0x243   :  { %4926 = vmatpush.bf16.msrb.mxu1 %v7091_v51  ;;  %4897 = vmatpush.bf16.msra.mxu3 %v6911_v60  ;;  %v4527_v30 = vpop.f32.mrf.mxu0  ;;  %v7031_v51 = vor.u32 %v7817_v40, %v7030_v5  ;;  %v4555_v58 = vpop.f32.mrf.mxu2  ;;  %v7199_v60 = vor.u32 %v7859_v18, %v7198_v42  ;;  %v7138_v5 = vld [vmem:[#allocation7 + $0x7a0] sm:$0xf]  ;;  %v7841_v18 = vld [vmem:[#allocation7 + $0x790] sm:$0xf0] }
 0x244   :  { %v4543_v62 = vpop.f32.mrf.mxu1 }
 0x245   :  { %4887 = vmatpush.bf16.msra.mxu2 %v6767_v21  ;;  %v7295_v21 = vor.u32 %v7883_v22, %v7294_v20 }
 0x246   :  { %4915 = vmatpush.bf16.msrb.mxu0 %v6959_v52  ;;  %v6742_v52 = vld [vmem:[#allocation7 + $0x488] sm:$0xf] }
 0x247   :  { %4927 = vmatpush.bf16.msrb.mxu1 %v7079_v56  ;;  %4898 = vmatpush.bf16.msra.mxu3 %v6899_v57  ;;  %v6743_v53 = vor.u32 %v7745_v35, %v6742_v52  ;;  %v7186_v56 = vld [vmem:[#allocation7 + $0x800] sm:$0xf]  ;;  %v7307_v57 = vor.u32 %v7886_v11, %v7306_v27  ;;  %v7270_v52 = vld [vmem:[#allocation7 + $0x8a8] sm:$0xf]  ;;  %v7877_v35 = vld [vmem:[#allocation7 + $0x8b0] sm:$0xf0] }
 0x248   :  { %v7187_v2 = vor.u32 %v7856_v37, %v7186_v56  ;;  %v7234_v11 = vld [vmem:[#allocation7 + $0x860] sm:$0xf] }
 0x249   :  { %4888 = vmatpush.bf16.msra.mxu2 %v6755_v14 }
 0x24a   :  { %4916 = vmatpush.bf16.msrb.mxu0 %v6947_v26  ;;  %v4515_v7 = vpop.f32.mrf.mxu3 }
 0x24b   :  { %4928 = vmatpush.bf16.msrb.mxu1 %v7067_v55  ;;  %4899 = vmatpush.bf16.msra.mxu3 %v6887_v17  ;;  %v4529_v45 = vpop.f32.mrf.mxu0  ;;  %v4514_v55 = vadd.f32 %v8506_v50, %v4500_v19  ;;  %v4557_v54 = vpop.f32.mrf.mxu2  ;;  %v7162_v17 = vld [vmem:[#allocation7 + $0x7d0] sm:$0xf]  ;;  %v7880_v50 = vld [vmem:[#allocation7 + $0x8c8] sm:$0xf0]  ;;  %v4516_v29 = vadd.f32 %v4515_v7, %v4502_v41  ;;  %v7127_v19 = vor.u32 %v7841_v18, %v7126_v24 }
 0x24c   :  { %v7283_v3 = vor.u32 %v7880_v50, %v7282_v0  ;;  %v4597_v36 = vpop.f32.mrf.mxu1 }
 0x24d   :  { %4889 = vmatpush.bf16.msra.mxu2 %v6743_v53  ;;  %v4530_v31 = vadd.f32 %v4529_v45, %v4516_v29  ;;  %v7258_v53 = vld [vmem:[#allocation7 + $0x890] sm:$0xf] }
 0x24e   :  { %4917 = vmatpush.bf16.msrb.mxu0 %v6935_v15  ;;  %v7769_v15 = vld [vmem:[#allocation7 + $0x550] sm:$0xf0] }
 0x24f   :  { %4929 = vmatpush.bf16.msrb.mxu1 %v7055_v44  ;;  %4900 = vmatpush.bf16.msra.mxu3 %v6875_v49  ;;  %v6839_v39 = vor.u32 %v7769_v15, %v6838_v4  ;;  %v7850_v44 = vld [vmem:[#allocation7 + $0x7d8] sm:$0xf0]  ;;  %v7847_v49 = vld [vmem:[#allocation7 + $0x7c0] sm:$0xf0] }
 0x250   :  { %4890 = vmatmul.bf16.vlgmr.msra.gmra.mxu2 %v8414_v23  ;;  %v4528_v23 = vadd.f32 %v4527_v30, %v4514_v55  ;;  %v7163_v38 = vor.u32 %v7850_v44, %v7162_v17  ;;  %v7844_v30 = vld [vmem:[#allocation7 + $0x7a8] sm:$0xf0]  ;;  %v7865_v55 = vld [vmem:[#allocation7 + $0x850] sm:$0xf0] }
 0x251   :  { %4918 = vmatmul.bf16.vlgmr.msrb.gmra.mxu0 %v8438_v47  ;;  %v7210_v47 = vld [vmem:[#allocation7 + $0x830] sm:$0xf] }
 0x252   :  { %v7211_v26 = vor.u32 %v7862_v59, %v7210_v47  ;;  %v4569_v25 = vpop.f32.mrf.mxu3  ;;  %v4542_v48 = vadd.f32 %v4541_v61, %v4528_v23  ;;  %v7271_v59 = vor.u32 %v7877_v35, %v7270_v52  ;;  %v4544_v61 = vadd.f32 %v4543_v62, %v4530_v31 }
 0x253   :  { %4930 = vmatpush.bf16.msrb.mxu1 %v7043_v13  ;;  %4901 = vmatpush.bf16.msra.mxu3 %v6863_v43  ;;  %v4583_v8 = vpop.f32.mrf.mxu0  ;;  %v4611_v47 = vpop.f32.mrf.mxu2  ;;  %v7874_v43 = vld [vmem:[#allocation7 + $0x898] sm:$0xf0] }
 0x254   :  { %4938 = vmatpush.bf16.msrb.mxu2 %v7211_v26  ;;  %v4556_v14 = vadd.f32 %v4555_v58, %v4542_v48  ;;  %v7139_v26 = vor.u32 %v7844_v30, %v7138_v5  ;;  %v4558_v12 = vadd.f32 %v4557_v54, %v4544_v61  ;;  %v7246_v58 = vld [vmem:[#allocation7 + $0x878] sm:$0xf]  ;;  %v4599_v56 = vpop.f32.mrf.mxu1 }
 0x255   :  { %v7247_v37 = vor.u32 %v7871_v46, %v7246_v58 }
 0x256   :  { %v4570_v1 = vadd.f32 %v4569_v25, %v4556_v14 }
 0x257   :  { %4931 = vmatpush.bf16.msrb.mxu1 %v7031_v51  ;;  %4902 = vmatpush.bf16.msra.mxu3 %v6851_v6  ;;  %v7259_v51 = vor.u32 %v7874_v43, %v7258_v53 }
 0x258   :  { %4939 = vmatpush.bf16.msrb.mxu2 %v7199_v60  ;;  %v4584_v40 = vadd.f32 %v4583_v8, %v4570_v1 }
 0x25a   :  { %4932 = vmatmul.bf16.vlgmr.msrb.gmra.mxu1 %v8452_v33  ;;  %v7175_v33 = vor.u32 %v7853_v63, %v7174_v16  ;;  %v4571_v13 = vpop.f32.mrf.mxu3  ;;  %v4598_v7 = vadd.f32 %v4597_v36, %v4584_v40  ;;  %v7222_v16 = vld [vmem:[#allocation7 + $0x848] sm:$0xf] }
 0x25b   :  { %4903 = vmatpush.bf16.msra.mxu3 %v6839_v39  ;;  %v4585_v6 = vpop.f32.mrf.mxu0  ;;  %v4572_v4 = vadd.f32 %v4571_v13, %v4558_v12  ;;  %v7868_v39 = vld [vmem:[#allocation7 + $0x868] sm:$0xf0]  ;;  %v4613_v45 = vpop.f32.mrf.mxu2  ;;  %v7223_v22 = vor.u32 %v7865_v55, %v7222_v16 }
 0x25c   :  { %4940 = vmatpush.bf16.msrb.mxu2 %v7187_v2  ;;  %v4612_v42 = vadd.f32 %v4611_v47, %v4598_v7  ;;  %v7235_v2 = vor.u32 %v7868_v39, %v7234_v11  ;;  %v4653_v28 = vpop.f32.mrf.mxu1 }
 0x25d   :  { %v4586_v27 = vadd.f32 %v4585_v6, %v4572_v4 }
 0x25e   :  { %4904 = vmatmul.bf16.vlgmr.msra.gmra.mxu3 %v8424_v9  ;;  %v7151_v9 = vor.u32 %v7847_v49, %v7150_v32 }
 0x25f   :  { %4952 = vmatpush.bf16.msrb.mxu3 %v7307_v57  ;;  %v4600_v25 = vadd.f32 %v4599_v56, %v4586_v27 }
 0x260   :  { %4941 = vmatpush.bf16.msrb.mxu2 %v7175_v33 }
 0x261   :  { %v4614_v57 = vadd.f32 %v4613_v45, %v4600_v25 }
 0x262   :  { %v4625_v60 = vpop.f32.mrf.mxu3 }
 0x263   :  { %4953 = vmatpush.bf16.msrb.mxu3 %v7295_v21  ;;  %v4626_v15 = vadd.f32 %v4625_v60, %v4612_v42  ;;  %v4639_v62 = vpop.f32.mrf.mxu0  ;;  %v4667_v23 = vpop.f32.mrf.mxu2 }
 0x264   :  { %4942 = vmatpush.bf16.msrb.mxu2 %v7163_v38  ;;  %v4655_v21 = vpop.f32.mrf.mxu1  ;;  %v4654_v0 = vadd.f32 %v4653_v28, %v4639_v62 }
 0x265   :  { %4966 = vst [vmem:[#allocation8] sm:$0xff] %v4626_v15 }
 0x266   :  { %v4668_v50 = vadd.f32 %v4667_v23, %v4654_v0 }
 0x267   :  { %4954 = vmatpush.bf16.msrb.mxu3 %v7283_v3 }
 0x268   :  { %4943 = vmatpush.bf16.msrb.mxu2 %v7151_v9 }
 0x26a   :  { %v4627_v63 = vpop.f32.mrf.mxu3 }
 0x26b   :  { %4955 = vmatpush.bf16.msrb.mxu3 %v7271_v59  ;;  %v4628_v20 = vadd.f32 %v4627_v63, %v4614_v57  ;;  %v4641_v33 = vpop.f32.mrf.mxu0  ;;  %v4669_v17 = vpop.f32.mrf.mxu2 }
 0x26c   :  { %4944 = vmatpush.bf16.msrb.mxu2 %v7139_v26  ;;  %v4709_v48 = vpop.f32.mrf.mxu1  ;;  %v4656_v38 = vadd.f32 %v4655_v21, %v4641_v33 }
 0x26d   :  { %4969 = vst [vmem:[#allocation8 + $0x18] sm:$0xff] %v4628_v20 }
 0x26e   :  { %v4670_v14 = vadd.f32 %v4669_v17, %v4656_v38 }
 0x26f   :  { %4956 = vmatpush.bf16.msrb.mxu3 %v7259_v51 }
 0x270   :  { %4945 = vmatpush.bf16.msrb.mxu2 %v7127_v19 }
 0x272   :  { %v4681_v54 = vpop.f32.mrf.mxu3 }
 0x273   :  { %4957 = vmatpush.bf16.msrb.mxu3 %v7247_v37  ;;  %4946 = vmatmul.bf16.vlgmr.msrb.gmra.mxu2 %v8477_v34  ;;  %v4695_v41 = vpop.f32.mrf.mxu0  ;;  %v4723_v8 = vpop.f32.mrf.mxu2  ;;  %v4682_v34 = vadd.f32 %v4681_v54, %v4668_v50 }
 0x274   :  { %v4711_v35 = vpop.f32.mrf.mxu1 }
 0x275   :  { %v4696_v3 = vadd.f32 %v4695_v41, %v4682_v34 }
 0x277   :  { %4958 = vmatpush.bf16.msrb.mxu3 %v7235_v2  ;;  %v4710_v52 = vadd.f32 %v4709_v48, %v4696_v3 }
 0x279   :  { %v4724_v13 = vadd.f32 %v4723_v8, %v4710_v52 }
 0x27a   :  { %v4683_v44 = vpop.f32.mrf.mxu3 }
 0x27b   :  { %4959 = vmatpush.bf16.msrb.mxu3 %v7223_v22  ;;  %v4697_v32 = vpop.f32.mrf.mxu0  ;;  %v4684_v49 = vadd.f32 %v4683_v44, %v4670_v14 }
 0x27c   :  { %v4765_v5 = vpop.f32.mrf.mxu1 }
 0x27d   :  { %v4698_v36 = vadd.f32 %v4697_v32, %v4684_v49 }
 0x27e   :  { %4960 = vmatmul.bf16.vlgmr.msrb.gmra.mxu3 %v8483_v10  ;;  %v4725_v10 = vpop.f32.mrf.mxu2 }
 0x27f   :  { %v4712_v9 = vadd.f32 %v4711_v35, %v4698_v36 }
 0x281   :  { %v4726_v30 = vadd.f32 %v4725_v10, %v4712_v9 }
 0x282   :  { %v4737_v29 = vpop.f32.mrf.mxu3 }
 0x283   :  { %v4738_v31 = vadd.f32 %v4737_v29, %v4724_v13  ;;  %v4751_v1 = vpop.f32.mrf.mxu0 }
 0x284   :  { %v4767_v12 = vpop.f32.mrf.mxu1 }
 0x285   :  { %v4752_v59 = vadd.f32 %v4751_v1, %v4738_v31 }
 0x287   :  { %v4766_v43 = vadd.f32 %v4765_v5, %v4752_v59 }
 0x28a   :  { %v4739_v47 = vpop.f32.mrf.mxu3 }
 0x28b   :  { %v4740_v53 = vadd.f32 %v4739_v47, %v4726_v30  ;;  %v4753_v7 = vpop.f32.mrf.mxu0 }
 0x28d   :  { %v4754_v51 = vadd.f32 %v4753_v7, %v4740_v53 }
 0x28f   :  { %v4768_v18 = vadd.f32 %v4767_v12, %v4754_v51 }
 0x293   :  { %v4779_v40 = vpop.f32.mrf.mxu2  ;;  %v4807_v60 = vpop.f32.mrf.mxu0 }
 0x294   :  { %v4780_v61 = vadd.f32 %v4779_v40, %v4766_v43 }
 0x297   :  { %v4821_v4 = vpop.f32.mrf.mxu1 }
 0x298   :  { %v4822_v39 = vadd.f32 %v4821_v4, %v4807_v60 }
 0x29b   :  { %v4781_v42 = vpop.f32.mrf.mxu2  ;;  %v4809_v56 = vpop.f32.mrf.mxu0 }
 0x29c   :  { %v4782_v58 = vadd.f32 %v4781_v42, %v4768_v18 }
 0x29f   :  { %v4823_v37 = vpop.f32.mrf.mxu1 }
 0x2a0   :  { %v4824_v55 = vadd.f32 %v4823_v37, %v4809_v56 }
 0x2a1   :  { %v4793_v26 = vpop.f32.mrf.mxu3 }
 0x2a2   :  { %v4794_v24 = vadd.f32 %v4793_v26, %v4780_v61 }
 0x2a4   :  { %4967 = vst [vmem:[#allocation8 + $0x8] sm:$0xff] %v4794_v24 }
 0x2a9   :  { %v4795_v46 = vpop.f32.mrf.mxu3 }
 0x2aa   :  { %v4796_v6 = vadd.f32 %v4795_v46, %v4782_v58 }
 0x2ac   :  { %4970 = vst [vmem:[#allocation8 + $0x20] sm:$0xff] %v4796_v6 }
 0x2ae   :  { %v4863_v11 = vpop.f32.mrf.mxu0 }
 0x2b3   :  { %v4835_v15 = vpop.f32.mrf.mxu2 }
 0x2b4   :  { %v4836_v25 = vadd.f32 %v4835_v15, %v4822_v39 }
 0x2b6   :  { %v4865_v20 = vpop.f32.mrf.mxu0 }
 0x2b7   :  { %v4877_v2 = vpop.f32.mrf.mxu1 }
 0x2bb   :  { %v4837_v27 = vpop.f32.mrf.mxu2 }
 0x2bc   :  { %v4838_v62 = vadd.f32 %v4837_v27, %v4824_v55 }
 0x2bf   :  { %v4879_v54 = vpop.f32.mrf.mxu1 }
 0x2c1   :  { %v4849_v19 = vpop.f32.mrf.mxu3 }
 0x2c2   :  { %v4850_v16 = vadd.f32 %v4849_v19, %v4836_v25 }
 0x2c4   :  { %v4864_v63 = vadd.f32 %v4863_v11, %v4850_v16 }
 0x2c6   :  { %v4878_v23 = vadd.f32 %v4877_v2, %v4864_v63 }
 0x2c9   :  { %v4851_v45 = vpop.f32.mrf.mxu3 }
 0x2ca   :  { %v4852_v28 = vadd.f32 %v4851_v45, %v4838_v62 }
 0x2cc   :  { %v4866_v17 = vadd.f32 %v4865_v20, %v4852_v28 }
 0x2ce   :  { %v4919_v44 = vpop.f32.mrf.mxu0  ;;  %v4880_v50 = vadd.f32 %v4879_v54, %v4866_v17 }
 0x2d3   :  { %v4891_v57 = vpop.f32.mrf.mxu2 }
 0x2d4   :  { %v4892_v21 = vadd.f32 %v4891_v57, %v4878_v23 }
 0x2d6   :  { %v4921_v14 = vpop.f32.mrf.mxu0 }
 0x2d7   :  { %v4933_v8 = vpop.f32.mrf.mxu1 }
 0x2db   :  { %v4893_v33 = vpop.f32.mrf.mxu2 }
 0x2dc   :  { %v4894_v38 = vadd.f32 %v4893_v33, %v4880_v50 }
 0x2df   :  { %v4935_v10 = vpop.f32.mrf.mxu1 }
 0x2e1   :  { %v4905_v22 = vpop.f32.mrf.mxu3 }
 0x2e2   :  { %v4906_v41 = vadd.f32 %v4905_v22, %v4892_v21 }
 0x2e4   :  { %v4920_v48 = vadd.f32 %v4919_v44, %v4906_v41 }
 0x2e6   :  { %v4934_v32 = vadd.f32 %v4933_v8, %v4920_v48 }
 0x2e9   :  { %v4907_v0 = vpop.f32.mrf.mxu3 }
 0x2ea   :  { %v4908_v3 = vadd.f32 %v4907_v0, %v4894_v38 }
 0x2ec   :  { %v4922_v52 = vadd.f32 %v4921_v14, %v4908_v3 }
 0x2ee   :  { %v4936_v36 = vadd.f32 %v4935_v10, %v4922_v52 }
 0x2f6   :  { %v4947_v34 = vpop.f32.mrf.mxu2 }
 0x2f7   :  { %v4948_v29 = vadd.f32 %v4947_v34, %v4934_v32 }
 0x2fe   :  { %v4949_v13 = vpop.f32.mrf.mxu2 }
 0x2ff   :  { %v4950_v31 = vadd.f32 %v4949_v13, %v4936_v36 }
 0x301   :  { %v4961_v49 = vpop.f32.mrf.mxu3 }
 0x302   :  { %v4962_v35 = vadd.f32 %v4961_v49, %v4948_v29 }
 0x304   :  { %4968 = vst [vmem:[#allocation8 + $0x10] sm:$0xff] %v4962_v35 }
 0x309   :  { %v4963_v1 = vpop.f32.mrf.mxu3 }
 0x30a   :  { %v4964_v47 = vadd.f32 %v4963_v1, %v4950_v31 }
 0x30c   :  { %4971 = vst [vmem:[#allocation8 + $0x28] sm:$0xff] %v4964_v47 }
 0x30d   :  { %4984 = dma.vmem_to_hbm [thread:$0]  %s4977_s2, 768, %s4979_s5, [#allocation4], %s8055_s6, %s8055_s6, %s8056_s7  }
 0x30e   :  { %8045 = dma.done.wait [#allocation4], 768  }
 0x30f   :  { %8046 = vsyncadd [#allocation4], 4294966528 }
 0x310   :  { %4989 = vsyncpa [#allocation3], 1 }
 0x311   :  { %4990 = vsyncpa [#allocation6], 1 }
 0x312   :  { %4991 = vsyncpa [#allocation4], 1 }

</bundles_post_ra>
